<compile_context>
chip_gen: v6e
topology: v6e:2x2x1
jax: 0.10.0
libtpu: 0.0.40
codegen_flags: <defaults>
</compile_context>

<pallas_src>
import functools

import jax
import jax.numpy as jnp
from jax.experimental import pallas as pl
from jax.experimental.pallas import tpu as pltpu

_P = 128                 # lane-dense padded feature width
_F32 = jnp.float32
_BF16 = jnp.bfloat16


def _round_up(v, m):
    return (v + m - 1) // m * m


def _row_mask(shape, tile_start, n_valid):
    row = jax.lax.broadcasted_iota(jnp.int32, shape, 0) + tile_start
    return row < n_valid


def _col_stats(sum_ref, sq_ref, vals, is_first):
    """Accumulate column sum / sum-of-squares (VPU sums) into resident outputs."""
    @pl.when(is_first)
    def _():
        sum_ref[...] = jnp.zeros_like(sum_ref)
        sq_ref[...] = jnp.zeros_like(sq_ref)
    sum_ref[...] += jnp.sum(vals, axis=0, keepdims=True)
    sq_ref[...] += jnp.sum(vals * vals, axis=0, keepdims=True)


def _gnorm_from_stats(x, s_ref, ss_ref, rows):
    """GlobalNorm from global column sum / sum-of-squares over `rows` real rows."""
    mean = s_ref[...] * (1.0 / rows)
    var = (ss_ref[...] - s_ref[...] * mean) * (1.0 / (rows - 1))  # unbiased
    return (x - mean) * jax.lax.rsqrt(var + 1e-5)


# --------------------------------------------------------------------------
# Edge-stage kernels (1-D grid over edge tiles)
# --------------------------------------------------------------------------
def _edge_stage1_kernel(feats_ref, w_ref, b_ref, h_ref, s_ref, ss_ref, *,
                        e_real, tile_e):
    i = pl.program_id(0)
    h = jnp.dot(feats_ref[...], w_ref[...], preferred_element_type=_F32) + b_ref[...]
    h = jnp.maximum(h, 0.0)
    h = jnp.where(_row_mask(h.shape, i * tile_e, e_real), h, 0.0)   # mask pad edges
    h_ref[...] = h.astype(_BF16)
    _col_stats(s_ref, ss_ref, h, i == 0)


def _edge_stage2_kernel(feats_ref, h_ref, s1_ref, ss1_ref, aw2_ref, ab2_ref,
                        w_ref, b_ref, o_ref, s2_ref, ss2_ref, *,
                        e_real, tile_e, dn):
    i = pl.program_id(0)
    hn = _gnorm_from_stats(h_ref[...].astype(_F32), s1_ref, ss1_ref, e_real)
    logit = jnp.dot(hn.astype(_BF16), aw2_ref[...],
                    preferred_element_type=_F32) + ab2_ref[...]         # [tE, 1]
    logit = jnp.clip(logit, -30.0, 30.0)                                # safe exp
    wagg = pl.reciprocal(1.0 + jnp.exp(-logit), approx=True)            # sigmoid (EUP)

    # Scale lanes [dn, 2*dn) (= x[row]) of the packed features by wAgg; the
    # x[col] lanes hit zero weight rows and edge_attr lanes keep scale 1.
    lane = jax.lax.broadcasted_iota(jnp.int32, (1, _P), 1)
    sel = jnp.logical_and(lane >= dn, lane < 2 * dn)
    scale = jnp.where(sel, wagg, 1.0).astype(_BF16)                     # [tE, 128]

    o = jnp.dot(feats_ref[...] * scale, w_ref[...],
                preferred_element_type=_F32) + b_ref[...]
    o = jnp.maximum(o, 0.0)
    o = jnp.where(_row_mask(o.shape, i * tile_e, e_real), o, 0.0)
    o_ref[...] = o.astype(_BF16)
    _col_stats(s2_ref, ss2_ref, o, i == 0)


def _edge_stage3_kernel(o1_ref, s2_ref, ss2_ref, w_ref, b_ref,
                        o_ref, s3_ref, ss3_ref, *, e_real, tile_e):
    i = pl.program_id(0)
    on = _gnorm_from_stats(o1_ref[...].astype(_F32), s2_ref, ss2_ref, e_real)
    o = jnp.dot(on.astype(_BF16), w_ref[...], preferred_element_type=_F32) + b_ref[...]
    o = jnp.maximum(o, 0.0)
    o = jnp.where(_row_mask(o.shape, i * tile_e, e_real), o, 0.0)
    o_ref[...] = o.astype(_BF16)
    _col_stats(s3_ref, ss3_ref, o, i == 0)


# --------------------------------------------------------------------------
# Scatter-mean + node_mlp_2 kernel (same edge grid; node MLP on the last tile)
# --------------------------------------------------------------------------
def _scatter_node_kernel(o2_ref, s3_ref, ss3_ref, col_ref, x_ref,
                         w1a_ref, w1b_ref, b1_ref, w2_ref, b2_ref,
                         out_ref, acc_ref, *, e_real, n_real, tile_e, dn):
    i = pl.program_id(0)

    @pl.when(i == 0)
    def _():
        acc_ref[...] = jnp.zeros_like(acc_ref)

    on = _gnorm_from_stats(o2_ref[...].astype(_F32), s3_ref, ss3_ref, e_real)
    # Lane `dn` of `on` is exactly 0 (zero-padded weight cols + gnorm of a zero
    # column), so a broadcast add of 1.0 there lets the per-node edge counts
    # ride in the same one-hot matmul as the feature sums.
    lane = jax.lax.broadcasted_iota(jnp.int32, (1, _P), 1)
    o_sc = (on + jnp.where(lane == dn, 1.0, 0.0)).astype(_BF16)

    n_pad = acc_ref.shape[0]
    onehot = (jax.lax.broadcasted_iota(jnp.int32, (n_pad, tile_e), 0)
              == col_ref[...]).astype(_BF16)                            # [N, tE]
    acc_ref[...] += jnp.dot(onehot, o_sc, preferred_element_type=_F32)

    @pl.when(i == pl.num_programs(0) - 1)
    def _():
        acc = acc_ref[...]
        counts = acc[:, dn:dn + 1]                                      # [N, 1]
        segm = acc * (1.0 / jnp.maximum(counts, 1.0))  # exact divide (parity)
        # NOTE: segm lane `dn` carries counts/counts ~ 1.0; this is harmless
        # ONLY because w1b (= m2w1 rows >= dn) is zero-padded there.

        def gnorm_resident(d):
            mask = _row_mask(d.shape, 0, n_real)
            dm = jnp.where(mask, d, 0.0)
            mean = jnp.sum(dm, axis=0, keepdims=True) * (1.0 / n_real)
            c = d - mean
            csq = jnp.where(mask, c * c, 0.0)
            var = jnp.sum(csq, axis=0, keepdims=True) * (1.0 / (n_real - 1))
            return c * jax.lax.rsqrt(var + 1e-5)

        h = (jnp.dot(x_ref[...], w1a_ref[...], preferred_element_type=_F32)
             + jnp.dot(segm.astype(_BF16), w1b_ref[...],
                       preferred_element_type=_F32)
             + b1_ref[...])
        h = gnorm_resident(jnp.maximum(h, 0.0))
        h = jnp.dot(h.astype(_BF16), w2_ref[...],
                    preferred_element_type=_F32) + b2_ref[...]
        h = gnorm_resident(jnp.maximum(h, 0.0))
        out_ref[...] = h.astype(out_ref.dtype)


# --------------------------------------------------------------------------
# Wrapper
# --------------------------------------------------------------------------
def pack_params(params, dim_edge, dim_node):
    """Pad / cast the Linear weights once (lane-dense 128-wide, bf16)."""
    dn, de = dim_node, dim_edge
    assert 2 * dn + de <= _P and de + dn <= _P and 2 * dn <= _P

    def place(blocks, rows=_P, cols=_P):
        w = jnp.zeros((rows, cols), _F32)
        for r0, blk in blocks:
            w = w.at[r0:r0 + blk.shape[0], :blk.shape[1]].set(blk)
        return w.astype(_BF16)

    def bpad(b):
        return jnp.pad(b, ((0, 0), (0, _P - b.shape[1]))).astype(_F32)

    aw1, m1w1, m2w1 = params["aw1"], params["m1w1"], params["m2w1"]
    return dict(
        # packed edge lanes: [0:dn]=x[col], [dn:2dn]=x[row], [2dn:2dn+de]=edge_attr
        aw1p=place([(0, aw1[:dn]), (dn, aw1[dn:])]),
        ab1p=bpad(params["ab1"]),
        aw2p=place([(0, params["aw2"])], cols=1),
        ab2=params["ab2"].astype(_F32),
        m1w1p=place([(dn, m1w1[:dn]), (2 * dn, m1w1[dn:])]),
        m1b1p=bpad(params["m1b1"]),
        m1w2p=place([(0, params["m1w2"])]),
        m1b2p=bpad(params["m1b2"]),
        m2w1a=place([(0, m2w1[:dn])], rows=dn),
        m2w1b=place([(0, m2w1[dn:])]),   # rows >= dn MUST stay zero (count lane)
        m2b1p=bpad(params["m2b1"]),
        m2w2p=place([(0, params["m2w2"])]),
        m2b2p=bpad(params["m2b2"]),
    )


def node_model_forward(x, edge_index, edge_attr, packed, *, tile_e=256):
    """u=None path of NodeModel.forward (the only shape-consistent path)."""
    n, dn = x.shape
    e, de = edge_attr.shape
    assert tile_e % 128 == 0, "tile_e is the scatter-matmul K depth; keep it 128-aligned"
    assert e >= 2 and n >= 2, "GlobalNorm's unbiased variance needs >= 2 rows"
    assert 2 * dn + de <= _P
    row, col = edge_index[0], edge_index[1]

    n_pad = _round_up(n, 8)
    e_pad = _round_up(e, tile_e)
    grid = (e_pad // tile_e,)

    # Lane-packed bf16 edge activations [x[col] | x[row] | edge_attr].
    x_b = x.astype(_BF16)
    xr = jnp.take(x_b, row, axis=0)
    xc = jnp.take(x_b, col, axis=0)
    feats = jnp.zeros((e_pad, _P), _BF16)
    feats = feats.at[:e, 0:dn].set(xc)
    feats = feats.at[:e, dn:2 * dn].set(xr)
    feats = feats.at[:e, 2 * dn:2 * dn + de].set(edge_attr.astype(_BF16))
    # Pad edges scatter to sentinel node id n_pad -> one-hot column of zeros.
    col_p = jnp.full((1, e_pad), n_pad, jnp.int32).at[0, :e].set(col.astype(jnp.int32))
    x_node = jnp.zeros((n_pad, dn), _BF16).at[:n].set(x_b)

    tile_spec = pl.BlockSpec((tile_e, _P), lambda i: (i, 0))

    def resident(shape):
        return pl.BlockSpec(shape, lambda i: (0,) * len(shape))

    stat_spec = resident((1, _P))
    stat_shape = jax.ShapeDtypeStruct((1, _P), _F32)
    edge_out_shape = jax.ShapeDtypeStruct((e_pad, _P), _BF16)

    # vmem_limit_bytes sized from the actual footprint (+ headroom).
    tile_bytes = tile_e * _P * 2                      # one bf16 [tile_e,128] tile
    vmem_limit = int(3 * 2 * tile_bytes               # <=3 tiled streams, double-buffered
                     + 6 * _P * _P * 2                # resident weight tiles
                     + 3 * n_pad * _P * 4             # scatter acc + node-stage temps
                     + (8 << 20))                     # stats/bias buffers + headroom
    cparams = pltpu.CompilerParams(dimension_semantics=("arbitrary",),
                                   vmem_limit_bytes=vmem_limit)

    # K1: relu(Lin1([x[col] | x[row]])) + column stats.
    h_pre, s1, ss1 = pl.pallas_call(
        functools.partial(_edge_stage1_kernel, e_real=e, tile_e=tile_e),
        grid=grid,
        in_specs=[tile_spec, resident((_P, _P)), stat_spec],
        out_specs=(tile_spec, stat_spec, stat_spec),
        out_shape=(edge_out_shape, stat_shape, stat_shape),
        compiler_params=cparams,
    )(feats, packed["aw1p"], packed["ab1p"])

    # K2: GlobalNorm -> Lin -> sigmoid -> wAgg ; relu(Lin([x[row]*wAgg | ea])) + stats.
    o1_pre, s2, ss2 = pl.pallas_call(
        functools.partial(_edge_stage2_kernel, e_real=e, tile_e=tile_e, dn=dn),
        grid=grid,
        in_specs=[tile_spec, tile_spec, stat_spec, stat_spec,
                  resident((_P, 1)), resident((1, 1)),
                  resident((_P, _P)), stat_spec],
        out_specs=(tile_spec, stat_spec, stat_spec),
        out_shape=(edge_out_shape, stat_shape, stat_shape),
        compiler_params=cparams,
    )(feats, h_pre, s1, ss1, packed["aw2p"], packed["ab2"],
      packed["m1w1p"], packed["m1b1p"])

    # K3: GlobalNorm -> Lin -> relu + stats.
    o2_pre, s3, ss3 = pl.pallas_call(
        functools.partial(_edge_stage3_kernel, e_real=e, tile_e=tile_e),
        grid=grid,
        in_specs=[tile_spec, stat_spec, stat_spec, resident((_P, _P)), stat_spec],
        out_specs=(tile_spec, stat_spec, stat_spec),
        out_shape=(edge_out_shape, stat_shape, stat_shape),
        compiler_params=cparams,
    )(o1_pre, s2, ss2, packed["m1w2p"], packed["m1b2p"])

    # K4: GlobalNorm -> scatter_mean over col -> node_mlp_2 (on the last tile).
    col_spec = pl.BlockSpec((1, tile_e), lambda i: (0, i))
    node_out = pl.pallas_call(
        functools.partial(_scatter_node_kernel, e_real=e, n_real=n,
                          tile_e=tile_e, dn=dn),
        grid=grid,
        in_specs=[tile_spec, stat_spec, stat_spec, col_spec,
                  resident((n_pad, dn)), resident((dn, _P)),
                  resident((_P, _P)), stat_spec,
                  resident((_P, _P)), stat_spec],
        out_specs=pl.BlockSpec((n_pad, _P), lambda i: (0, 0)),
        out_shape=jax.ShapeDtypeStruct((n_pad, _P), _BF16),
        scratch_shapes=[pltpu.VMEM((n_pad, _P), _F32)],
        compiler_params=cparams,
    )(o2_pre, s3, ss3, col_p, x_node, packed["m2w1a"], packed["m2w1b"],
      packed["m2b1p"], packed["m2w2p"], packed["m2b2p"])

    return node_out[:n, :dn]


# --------------------------------------------------------------------------
# Parameter init + pure-JAX f32 reference (verification only)
# --------------------------------------------------------------------------
def init_params(key, dim_edge, dim_node):
    """Deterministic PyTorch-Linear-style init (uniform +-1/sqrt(fan_in))."""
    def lin(k, fan_in, fan_out):
        kw, kb = jax.random.split(k)
        lim = 1.0 / float(fan_in) ** 0.5
        w = jax.random.uniform(kw, (fan_in, fan_out), jnp.float32, -lim, lim)
        b = jax.random.uniform(kb, (1, fan_out), jnp.float32, -lim, lim)
        return w, b

    ks = jax.random.split(key, 6)
    dn, de = dim_node, dim_edge
    aw1, ab1 = lin(ks[0], 2 * dn, dn)
    aw2, ab2 = lin(ks[1], dn, 1)
    m1w1, m1b1 = lin(ks[2], de + dn, de + dn)
    m1w2, m1b2 = lin(ks[3], de + dn, dn)
    m2w1, m2b1 = lin(ks[4], 2 * dn, 2 * dn)
    m2w2, m2b2 = lin(ks[5], 2 * dn, dn)
    return dict(aw1=aw1, ab1=ab1, aw2=aw2, ab2=ab2,
                m1w1=m1w1, m1b1=m1b1, m1w2=m1w2, m1b2=m1b2,
                m2w1=m2w1, m2b1=m2b1, m2w2=m2w2, m2b2=m2b2)


def _global_norm(d):
    r = d.shape[0]
    mean = jnp.mean(d, axis=0, keepdims=True)
    var = jnp.sum((d - mean) ** 2, axis=0, keepdims=True) / (r - 1)
    return (d - mean) / jnp.sqrt(var + 1e-5)


def reference_forward(x, edge_index, edge_attr, params):
    row, col = edge_index[0], edge_index[1]
    n = x.shape[0]

    h = jnp.concatenate([x[col], x[row]], axis=1)
    h = _global_norm(jnp.maximum(h @ params["aw1"] + params["ab1"], 0.0))
    wagg = jax.nn.sigmoid(h @ params["aw2"] + params["ab2"])

    o = jnp.concatenate([x[row] * wagg, edge_attr], axis=1)
    o = _global_norm(jnp.maximum(o @ params["m1w1"] + params["m1b1"], 0.0))
    o = _global_norm(jnp.maximum(o @ params["m1w2"] + params["m1b2"], 0.0))

    seg_sum = jax.ops.segment_sum(o, col, num_segments=n)
    counts = jax.ops.segment_sum(jnp.ones((o.shape[0], 1), jnp.float32), col,
                                 num_segments=n)
    seg_mean = seg_sum / jnp.maximum(counts, 1.0)

    o2 = jnp.concatenate([x, seg_mean], axis=1)
    o2 = _global_norm(jnp.maximum(o2 @ params["m2w1"] + params["m2b1"], 0.0))
    o2 = _global_norm(jnp.maximum(o2 @ params["m2w2"] + params["m2b2"], 0.0))
    return o2


if __name__ == "__main__":
    key = jax.random.PRNGKey(0)
    N, E, dim_node, dim_edge = 16, 200, 32, 32

    k_x, k_ea, k_row, k_col, k_p = jax.random.split(key, 5)
    x = jax.random.normal(k_x, (N, dim_node), jnp.float32)
    edge_attr = jax.random.normal(k_ea, (E, dim_edge), jnp.float32)
    row = jax.random.randint(k_row, (E,), 0, N, jnp.int32)
    col = jax.random.randint(k_col, (E,), 0, N, jnp.int32)
    edge_index = jnp.stack([row, col], axis=0)
    params = init_params(k_p, dim_edge, dim_node)
    packed = pack_params(params, dim_edge, dim_node)   # pad/cast weights ONCE

    # tile_e=128 with E=200 -> e_pad=256, grid=(2,): exercises the multi-tile
    # pipeline, the accumulated GlobalNorm stats and the sentinel-padded scatter.
    fwd = jax.jit(functools.partial(node_model_forward, tile_e=128))
    out = fwd(x, edge_index, edge_attr, packed)
    jax.block_until_ready(out)

    ref = reference_forward(x, edge_index, edge_attr, params)
    out_f32 = out.astype(jnp.float32)
    assert out.shape == (N, dim_node)
    assert bool(jnp.all(jnp.isfinite(out_f32)))
    # bf16 matmul operands, bf16 inter-stage activations/output and the approx
    # sigmoid reciprocal => looser tolerance than a pure-f32 path (all matmul
    # and statistics accumulation stays f32).
    assert bool(jnp.allclose(out_f32, ref, atol=5e-2, rtol=5e-2)), (
        f"max abs diff = {float(jnp.max(jnp.abs(out_f32 - ref)))}")
    print("KERNEL_OK")
</pallas_src>

<mosaic_0001>
module attributes {stable_mosaic.version = 11 : i64} {
  func.func @_edge_stage1_kernel(%arg0: i32, %arg1: memref<128x128xbf16, #tpu.memory_space<vmem>>, %arg2: memref<128x128xbf16, #tpu.memory_space<vmem>>, %arg3: memref<1x128xf32, #tpu.memory_space<vmem>>, %arg4: memref<128x128xbf16, #tpu.memory_space<vmem>>, %arg5: memref<1x128xf32, #tpu.memory_space<vmem>>, %arg6: memref<1x128xf32, #tpu.memory_space<vmem>>) attributes {dimension_semantics = [#tpu.dimension_semantics<arbitrary>], iteration_bounds = array<i64: 2>, scalar_prefetch = 0 : i64, scratch_operands = 0 : i64, tpu.core_type = #tpu.core_type<tc>, window_params = [{transform_indices = @transform_0, window_bounds = array<i64: 128, 128>}, {pipeline_mode = #tpu.pipeline_mode<synchronous>, transform_indices = @transform_1, window_bounds = array<i64: 128, 128>}, {pipeline_mode = #tpu.pipeline_mode<synchronous>, transform_indices = @transform_2, window_bounds = array<i64: 1, 128>}, {transform_indices = @transform_3, window_bounds = array<i64: 128, 128>}, {pipeline_mode = #tpu.pipeline_mode<synchronous>, transform_indices = @transform_4, window_bounds = array<i64: 1, 128>}, {pipeline_mode = #tpu.pipeline_mode<synchronous>, transform_indices = @transform_5, window_bounds = array<i64: 1, 128>}]} {
    %c0 = arith.constant 0 : index
    %c0_0 = arith.constant 0 : index
    %0 = vector.load %arg1[%c0, %c0_0] : memref<128x128xbf16, #tpu.memory_space<vmem>>, vector<128x128xbf16>
    %c0_1 = arith.constant 0 : index
    %c0_2 = arith.constant 0 : index
    %1 = vector.load %arg2[%c0_1, %c0_2] : memref<128x128xbf16, #tpu.memory_space<vmem>>, vector<128x128xbf16>
    %cst = arith.constant dense<0.000000e+00> : vector<128x128xf32>
    %2 = tpu.matmul %0, %1, %cst {dimension_numbers = #tpu.dot_dimension_numbers<[1], [0], [0], [1], [0, 0, 1, 1], [], []>} : vector<128x128xbf16>, vector<128x128xbf16>, vector<128x128xf32> -> vector<128x128xf32>
    %c0_3 = arith.constant 0 : index
    %c0_4 = arith.constant 0 : index
    %3 = vector.load %arg3[%c0_3, %c0_4] : memref<1x128xf32, #tpu.memory_space<vmem>>, vector<1x128xf32>
    %4 = vector.broadcast %3 : vector<1x128xf32> to vector<128x128xf32>
    %5 = arith.addf %2, %4 : vector<128x128xf32>
    %cst_5 = arith.constant 0.000000e+00 : f32
    %6 = vector.broadcast %cst_5 : f32 to vector<128x128xf32>
    %7 = arith.maximumf %5, %6 : vector<128x128xf32>
    %c128_i32 = arith.constant 128 : i32
    %8 = arith.muli %arg0, %c128_i32 : i32
    %9 = tpu.iota {dimensions = array<i32: 0>} : vector<128x128xi32>
    %10 = vector.broadcast %8 : i32 to vector<128x128xi32>
    %11 = arith.addi %9, %10 : vector<128x128xi32>
    %c200_i32 = arith.constant 200 : i32
    %12 = vector.broadcast %c200_i32 : i32 to vector<128x128xi32>
    %13 = arith.cmpi slt, %11, %12 : vector<128x128xi32>
    %cst_6 = arith.constant 0.000000e+00 : f32
    %14 = vector.broadcast %cst_6 : f32 to vector<128x128xf32>
    %15 = arith.select %13, %7, %14 : vector<128x128xi1>, vector<128x128xf32>
    %16 = arith.truncf %15 : vector<128x128xf32> to vector<128x128xbf16>
    %c0_7 = arith.constant 0 : index
    %c0_8 = arith.constant 0 : index
    %17 = vector.load %arg4[%c0_7, %c0_8] : memref<128x128xbf16, #tpu.memory_space<vmem>>, vector<128x128xbf16>
    tpu.vector_store %arg4[%c0_7, %c0_8], %16 {strides = array<i32>} : memref<128x128xbf16, #tpu.memory_space<vmem>>, vector<128x128xbf16>,
    %c0_i32 = arith.constant 0 : i32
    %18 = arith.cmpi eq, %arg0, %c0_i32 : i32
    %19 = arith.extui %18 : i1 to i32
    %c0_i32_9 = arith.constant 0 : i32
    %20 = arith.cmpi ne, %19, %c0_i32_9 : i32
    scf.if %20 {
      %cst_20 = arith.constant 0.000000e+00 : f32
      %32 = vector.broadcast %cst_20 : f32 to vector<1x128xf32>
      %c0_21 = arith.constant 0 : index
      %c0_22 = arith.constant 0 : index
      %33 = vector.load %arg5[%c0_21, %c0_22] : memref<1x128xf32, #tpu.memory_space<vmem>>, vector<1x128xf32>
      tpu.vector_store %arg5[%c0_21, %c0_22], %32 {strides = array<i32>} : memref<1x128xf32, #tpu.memory_space<vmem>>, vector<1x128xf32>,
      %cst_23 = arith.constant 0.000000e+00 : f32
      %34 = vector.broadcast %cst_23 : f32 to vector<1x128xf32>
      %c0_24 = arith.constant 0 : index
      %c0_25 = arith.constant 0 : index
      %35 = vector.load %arg6[%c0_24, %c0_25] : memref<1x128xf32, #tpu.memory_space<vmem>>, vector<1x128xf32>
      tpu.vector_store %arg6[%c0_24, %c0_25], %34 {strides = array<i32>} : memref<1x128xf32, #tpu.memory_space<vmem>>, vector<1x128xf32>,
    } else {
    }
    %c0_10 = arith.constant 0 : index
    %c0_11 = arith.constant 0 : index
    %21 = vector.load %arg5[%c0_10, %c0_11] : memref<1x128xf32, #tpu.memory_space<vmem>>, vector<1x128xf32>
    %cst_12 = arith.constant dense<0.000000e+00> : vector<128xf32>
    %22 = vector.multi_reduction <add>, %15, %cst_12 [0] : vector<128x128xf32> to vector<128xf32>
    %23 = vector.shape_cast %22 : vector<128xf32> to vector<1x128xf32>
    %24 = arith.addf %21, %23 : vector<1x128xf32>
    %c0_13 = arith.constant 0 : index
    %c0_14 = arith.constant 0 : index
    %25 = vector.load %arg5[%c0_13, %c0_14] : memref<1x128xf32, #tpu.memory_space<vmem>>, vector<1x128xf32>
    tpu.vector_store %arg5[%c0_13, %c0_14], %24 {strides = array<i32>} : memref<1x128xf32, #tpu.memory_space<vmem>>, vector<1x128xf32>,
    %c0_15 = arith.constant 0 : index
    %c0_16 = arith.constant 0 : index
    %26 = vector.load %arg6[%c0_15, %c0_16] : memref<1x128xf32, #tpu.memory_space<vmem>>, vector<1x128xf32>
    %27 = arith.mulf %15, %15 : vector<128x128xf32>
    %cst_17 = arith.constant dense<0.000000e+00> : vector<128xf32>
    %28 = vector.multi_reduction <add>, %27, %cst_17 [0] : vector<128x128xf32> to vector<128xf32>
    %29 = vector.shape_cast %28 : vector<128xf32> to vector<1x128xf32>
    %30 = arith.addf %26, %29 : vector<1x128xf32>
    %c0_18 = arith.constant 0 : index
    %c0_19 = arith.constant 0 : index
    %31 = vector.load %arg6[%c0_18, %c0_19] : memref<1x128xf32, #tpu.memory_space<vmem>>, vector<1x128xf32>
    tpu.vector_store %arg6[%c0_18, %c0_19], %30 {strides = array<i32>} : memref<1x128xf32, #tpu.memory_space<vmem>>, vector<1x128xf32>,
    return
  }
  func.func @transform_0(%arg0: i32) -> (i32, i32) {
    %c0_i32 = arith.constant 0 : i32
    %c0_i32_0 = arith.constant 0 : i32
    return %arg0, %c0_i32 : i32, i32
  }
  func.func @transform_1(%arg0: i32) -> (i32, i32) {
    %c0_i32 = arith.constant 0 : i32
    %c0_i32_0 = arith.constant 0 : i32
    %c0_i32_1 = arith.constant 0 : i32
    return %c0_i32, %c0_i32_0 : i32, i32
  }
  func.func @transform_2(%arg0: i32) -> (i32, i32) {
    %c0_i32 = arith.constant 0 : i32
    %c0_i32_0 = arith.constant 0 : i32
    %c0_i32_1 = arith.constant 0 : i32
    return %c0_i32, %c0_i32_0 : i32, i32
  }
  func.func @transform_3(%arg0: i32) -> (i32, i32) {
    %c0_i32 = arith.constant 0 : i32
    %c0_i32_0 = arith.constant 0 : i32
    return %arg0, %c0_i32 : i32, i32
  }
  func.func @transform_4(%arg0: i32) -> (i32, i32) {
    %c0_i32 = arith.constant 0 : i32
    %c0_i32_0 = arith.constant 0 : i32
    %c0_i32_1 = arith.constant 0 : i32
    return %c0_i32, %c0_i32_0 : i32, i32
  }
  func.func @transform_5(%arg0: i32) -> (i32, i32) {
    %c0_i32 = arith.constant 0 : i32
    %c0_i32_0 = arith.constant 0 : i32
    %c0_i32_1 = arith.constant 0 : i32
    return %c0_i32, %c0_i32_0 : i32, i32
  }
}

module attributes {stable_mosaic.version = 11 : i64} {
  func.func @_edge_stage2_kernel(%arg0: i32, %arg1: memref<128x128xbf16, #tpu.memory_space<vmem>>, %arg2: memref<128x128xbf16, #tpu.memory_space<vmem>>, %arg3: memref<1x128xf32, #tpu.memory_space<vmem>>, %arg4: memref<1x128xf32, #tpu.memory_space<vmem>>, %arg5: memref<128x1xbf16, #tpu.memory_space<vmem>>, %arg6: memref<1x1xf32, #tpu.memory_space<vmem>>, %arg7: memref<128x128xbf16, #tpu.memory_space<vmem>>, %arg8: memref<1x128xf32, #tpu.memory_space<vmem>>, %arg9: memref<128x128xbf16, #tpu.memory_space<vmem>>, %arg10: memref<1x128xf32, #tpu.memory_space<vmem>>, %arg11: memref<1x128xf32, #tpu.memory_space<vmem>>) attributes {dimension_semantics = [#tpu.dimension_semantics<arbitrary>], iteration_bounds = array<i64: 2>, scalar_prefetch = 0 : i64, scratch_operands = 0 : i64, tpu.core_type = #tpu.core_type<tc>, window_params = [{transform_indices = @transform_0, window_bounds = array<i64: 128, 128>}, {transform_indices = @transform_1, window_bounds = array<i64: 128, 128>}, {pipeline_mode = #tpu.pipeline_mode<synchronous>, transform_indices = @transform_2, window_bounds = array<i64: 1, 128>}, {pipeline_mode = #tpu.pipeline_mode<synchronous>, transform_indices = @transform_3, window_bounds = array<i64: 1, 128>}, {pipeline_mode = #tpu.pipeline_mode<synchronous>, transform_indices = @transform_4, window_bounds = array<i64: 128, 1>}, {pipeline_mode = #tpu.pipeline_mode<synchronous>, transform_indices = @transform_5, window_bounds = array<i64: 1, 1>}, {pipeline_mode = #tpu.pipeline_mode<synchronous>, transform_indices = @transform_6, window_bounds = array<i64: 128, 128>}, {pipeline_mode = #tpu.pipeline_mode<synchronous>, transform_indices = @transform_7, window_bounds = array<i64: 1, 128>}, {transform_indices = @transform_8, window_bounds = array<i64: 128, 128>}, {pipeline_mode = #tpu.pipeline_mode<synchronous>, transform_indices = @transform_9, window_bounds = array<i64: 1, 128>}, {pipeline_mode = #tpu.pipeline_mode<synchronous>, transform_indices = @transform_10, window_bounds = array<i64: 1, 128>}]} {
    %c0 = arith.constant 0 : index
    %c0_0 = arith.constant 0 : index
    %0 = vector.load %arg2[%c0, %c0_0] : memref<128x128xbf16, #tpu.memory_space<vmem>>, vector<128x128xbf16>
    %1 = arith.extf %0 : vector<128x128xbf16> to vector<128x128xf32>
    %c0_1 = arith.constant 0 : index
    %c0_2 = arith.constant 0 : index
    %2 = vector.load %arg3[%c0_1, %c0_2] : memref<1x128xf32, #tpu.memory_space<vmem>>, vector<1x128xf32>
    %cst = arith.constant 5.000000e-03 : f32
    %3 = vector.broadcast %cst : f32 to vector<1x128xf32>
    %4 = arith.mulf %2, %3 : vector<1x128xf32>
    %c0_3 = arith.constant 0 : index
    %c0_4 = arith.constant 0 : index
    %5 = vector.load %arg4[%c0_3, %c0_4] : memref<1x128xf32, #tpu.memory_space<vmem>>, vector<1x128xf32>
    %c0_5 = arith.constant 0 : index
    %c0_6 = arith.constant 0 : index
    %6 = vector.load %arg3[%c0_5, %c0_6] : memref<1x128xf32, #tpu.memory_space<vmem>>, vector<1x128xf32>
    %7 = arith.mulf %6, %4 : vector<1x128xf32>
    %8 = arith.subf %5, %7 : vector<1x128xf32>
    %cst_7 = arith.constant 0.00502512557 : f32
    %9 = vector.broadcast %cst_7 : f32 to vector<1x128xf32>
    %10 = arith.mulf %8, %9 : vector<1x128xf32>
    %11 = vector.broadcast %4 : vector<1x128xf32> to vector<128x128xf32>
    %12 = arith.subf %1, %11 : vector<128x128xf32>
    %cst_8 = arith.constant 9.99999974E-6 : f32
    %13 = vector.broadcast %cst_8 : f32 to vector<1x128xf32>
    %14 = arith.addf %10, %13 : vector<1x128xf32>
    %15 = math.rsqrt %14 : vector<1x128xf32>
    %16 = vector.broadcast %15 : vector<1x128xf32> to vector<128x128xf32>
    %17 = arith.mulf %12, %16 : vector<128x128xf32>
    %18 = arith.truncf %17 : vector<128x128xf32> to vector<128x128xbf16>
    %c0_9 = arith.constant 0 : index
    %c0_10 = arith.constant 0 : index
    %19 = vector.load %arg5[%c0_9, %c0_10] : memref<128x1xbf16, #tpu.memory_space<vmem>>, vector<128x1xbf16>
    %cst_11 = arith.constant dense<0.000000e+00> : vector<128x1xf32>
    %20 = tpu.matmul %18, %19, %cst_11 {dimension_numbers = #tpu.dot_dimension_numbers<[1], [0], [0], [1], [0, 0, 1, 1], [], []>} : vector<128x128xbf16>, vector<128x1xbf16>, vector<128x1xf32> -> vector<128x1xf32>
    %c0_12 = arith.constant 0 : index
    %c0_13 = arith.constant 0 : index
    %21 = vector.load %arg6[%c0_12, %c0_13] : memref<1x1xf32, #tpu.memory_space<vmem>>, vector<1x1xf32>
    %22 = vector.broadcast %21 : vector<1x1xf32> to vector<128x1xf32>
    %23 = arith.addf %20, %22 : vector<128x1xf32>
    %cst_14 = arith.constant -3.000000e+01 : f32
    %cst_15 = arith.constant 3.000000e+01 : f32
    %24 = vector.broadcast %cst_14 : f32 to vector<128x1xf32>
    %25 = arith.maximumf %24, %23 : vector<128x1xf32>
    %26 = vector.broadcast %cst_15 : f32 to vector<128x1xf32>
    %27 = arith.minimumf %26, %25 : vector<128x1xf32>
    %cst_16 = arith.constant 0.000000e+00 : f32
    %28 = vector.broadcast %cst_16 : f32 to vector<128x1xf32>
    %29 = arith.subf %28, %27 : vector<128x1xf32>
    %30 = math.exp %29 : vector<128x1xf32>
    %cst_17 = arith.constant 1.000000e+00 : f32
    %31 = vector.broadcast %cst_17 : f32 to vector<128x1xf32>
    %32 = arith.addf %31, %30 : vector<128x1xf32>
    %33 = tpu.reciprocal %32 {approx = true} : vector<128x1xf32> -> vector<128x1xf32>
    %34 = tpu.iota {dimensions = array<i32: 1>} : vector<1x128xi32>
    %c32_i32 = arith.constant 32 : i32
    %35 = vector.broadcast %c32_i32 : i32 to vector<1x128xi32>
    %36 = arith.cmpi sge, %34, %35 : vector<1x128xi32>
    %c64_i32 = arith.constant 64 : i32
    %37 = vector.broadcast %c64_i32 : i32 to vector<1x128xi32>
    %38 = arith.cmpi slt, %34, %37 : vector<1x128xi32>
    %39 = arith.andi %36, %38 : vector<1x128xi1>
    %cst_18 = arith.constant 1.000000e+00 : f32
    %40 = vector.shape_cast %39 : vector<1x128xi1> to vector<1x128xi1>
    %41 = vector.broadcast %40 : vector<1x128xi1> to vector<128x128xi1>
    %42 = vector.shape_cast %33 : vector<128x1xf32> to vector<128x1xf32>
    %43 = vector.broadcast %42 : vector<128x1xf32> to vector<128x128xf32>
    %44 = vector.broadcast %cst_18 : f32 to vector<128x128xf32>
    %45 = arith.select %41, %43, %44 : vector<128x128xi1>, vector<128x128xf32>
    %46 = arith.truncf %45 : vector<128x128xf32> to vector<128x128xbf16>
    %c0_19 = arith.constant 0 : index
    %c0_20 = arith.constant 0 : index
    %47 = vector.load %arg1[%c0_19, %c0_20] : memref<128x128xbf16, #tpu.memory_space<vmem>>, vector<128x128xbf16>
    %48 = arith.mulf %47, %46 : vector<128x128xbf16>
    %c0_21 = arith.constant 0 : index
    %c0_22 = arith.constant 0 : index
    %49 = vector.load %arg7[%c0_21, %c0_22] : memref<128x128xbf16, #tpu.memory_space<vmem>>, vector<128x128xbf16>
    %cst_23 = arith.constant dense<0.000000e+00> : vector<128x128xf32>
    %50 = tpu.matmul %48, %49, %cst_23 {dimension_numbers = #tpu.dot_dimension_numbers<[1], [0], [0], [1], [0, 0, 1, 1], [], []>} : vector<128x128xbf16>, vector<128x128xbf16>, vector<128x128xf32> -> vector<128x128xf32>
    %c0_24 = arith.constant 0 : index
    %c0_25 = arith.constant 0 : index
    %51 = vector.load %arg8[%c0_24, %c0_25] : memref<1x128xf32, #tpu.memory_space<vmem>>, vector<1x128xf32>
    %52 = vector.broadcast %51 : vector<1x128xf32> to vector<128x128xf32>
    %53 = arith.addf %50, %52 : vector<128x128xf32>
    %cst_26 = arith.constant 0.000000e+00 : f32
    %54 = vector.broadcast %cst_26 : f32 to vector<128x128xf32>
    %55 = arith.maximumf %53, %54 : vector<128x128xf32>
    %c128_i32 = arith.constant 128 : i32
    %56 = arith.muli %arg0, %c128_i32 : i32
    %57 = tpu.iota {dimensions = array<i32: 0>} : vector<128x128xi32>
    %58 = vector.broadcast %56 : i32 to vector<128x128xi32>
    %59 = arith.addi %57, %58 : vector<128x128xi32>
    %c200_i32 = arith.constant 200 : i32
    %60 = vector.broadcast %c200_i32 : i32 to vector<128x128xi32>
    %61 = arith.cmpi slt, %59, %60 : vector<128x128xi32>
    %cst_27 = arith.constant 0.000000e+00 : f32
    %62 = vector.broadcast %cst_27 : f32 to vector<128x128xf32>
    %63 = arith.select %61, %55, %62 : vector<128x128xi1>, vector<128x128xf32>
    %64 = arith.truncf %63 : vector<128x128xf32> to vector<128x128xbf16>
    %c0_28 = arith.constant 0 : index
    %c0_29 = arith.constant 0 : index
    %65 = vector.load %arg9[%c0_28, %c0_29] : memref<128x128xbf16, #tpu.memory_space<vmem>>, vector<128x128xbf16>
    tpu.vector_store %arg9[%c0_28, %c0_29], %64 {strides = array<i32>} : memref<128x128xbf16, #tpu.memory_space<vmem>>, vector<128x128xbf16>,
    %c0_i32 = arith.constant 0 : i32
    %66 = arith.cmpi eq, %arg0, %c0_i32 : i32
    %67 = arith.extui %66 : i1 to i32
    %c0_i32_30 = arith.constant 0 : i32
    %68 = arith.cmpi ne, %67, %c0_i32_30 : i32
    scf.if %68 {
      %cst_41 = arith.constant 0.000000e+00 : f32
      %80 = vector.broadcast %cst_41 : f32 to vector<1x128xf32>
      %c0_42 = arith.constant 0 : index
      %c0_43 = arith.constant 0 : index
      %81 = vector.load %arg10[%c0_42, %c0_43] : memref<1x128xf32, #tpu.memory_space<vmem>>, vector<1x128xf32>
      tpu.vector_store %arg10[%c0_42, %c0_43], %80 {strides = array<i32>} : memref<1x128xf32, #tpu.memory_space<vmem>>, vector<1x128xf32>,
      %cst_44 = arith.constant 0.000000e+00 : f32
      %82 = vector.broadcast %cst_44 : f32 to vector<1x128xf32>
      %c0_45 = arith.constant 0 : index
      %c0_46 = arith.constant 0 : index
      %83 = vector.load %arg11[%c0_45, %c0_46] : memref<1x128xf32, #tpu.memory_space<vmem>>, vector<1x128xf32>
      tpu.vector_store %arg11[%c0_45, %c0_46], %82 {strides = array<i32>} : memref<1x128xf32, #tpu.memory_space<vmem>>, vector<1x128xf32>,
    } else {
    }
    %c0_31 = arith.constant 0 : index
    %c0_32 = arith.constant 0 : index
    %69 = vector.load %arg10[%c0_31, %c0_32] : memref<1x128xf32, #tpu.memory_space<vmem>>, vector<1x128xf32>
    %cst_33 = arith.constant dense<0.000000e+00> : vector<128xf32>
    %70 = vector.multi_reduction <add>, %63, %cst_33 [0] : vector<128x128xf32> to vector<128xf32>
    %71 = vector.shape_cast %70 : vector<128xf32> to vector<1x128xf32>
    %72 = arith.addf %69, %71 : vector<1x128xf32>
    %c0_34 = arith.constant 0 : index
    %c0_35 = arith.constant 0 : index
    %73 = vector.load %arg10[%c0_34, %c0_35] : memref<1x128xf32, #tpu.memory_space<vmem>>, vector<1x128xf32>
    tpu.vector_store %arg10[%c0_34, %c0_35], %72 {strides = array<i32>} : memref<1x128xf32, #tpu.memory_space<vmem>>, vector<1x128xf32>,
    %c0_36 = arith.constant 0 : index
    %c0_37 = arith.constant 0 : index
    %74 = vector.load %arg11[%c0_36, %c0_37] : memref<1x128xf32, #tpu.memory_space<vmem>>, vector<1x128xf32>
    %75 = arith.mulf %63, %63 : vector<128x128xf32>
    %cst_38 = arith.constant dense<0.000000e+00> : vector<128xf32>
    %76 = vector.multi_reduction <add>, %75, %cst_38 [0] : vector<128x128xf32> to vector<128xf32>
    %77 = vector.shape_cast %76 : vector<128xf32> to vector<1x128xf32>
    %78 = arith.addf %74, %77 : vector<1x128xf32>
    %c0_39 = arith.constant 0 : index
    %c0_40 = arith.constant 0 : index
    %79 = vector.load %arg11[%c0_39, %c0_40] : memref<1x128xf32, #tpu.memory_space<vmem>>, vector<1x128xf32>
    tpu.vector_store %arg11[%c0_39, %c0_40], %78 {strides = array<i32>} : memref<1x128xf32, #tpu.memory_space<vmem>>, vector<1x128xf32>,
    return
  }
  func.func @transform_0(%arg0: i32) -> (i32, i32) {
    %c0_i32 = arith.constant 0 : i32
    %c0_i32_0 = arith.constant 0 : i32
    return %arg0, %c0_i32 : i32, i32
  }
  func.func @transform_1(%arg0: i32) -> (i32, i32) {
    %c0_i32 = arith.constant 0 : i32
    %c0_i32_0 = arith.constant 0 : i32
    return %arg0, %c0_i32 : i32, i32
  }
  func.func @transform_2(%arg0: i32) -> (i32, i32) {
    %c0_i32 = arith.constant 0 : i32
    %c0_i32_0 = arith.constant 0 : i32
    %c0_i32_1 = arith.constant 0 : i32
    return %c0_i32, %c0_i32_0 : i32, i32
  }
  func.func @transform_3(%arg0: i32) -> (i32, i32) {
    %c0_i32 = arith.constant 0 : i32
    %c0_i32_0 = arith.constant 0 : i32
    %c0_i32_1 = arith.constant 0 : i32
    return %c0_i32, %c0_i32_0 : i32, i32
  }
  func.func @transform_4(%arg0: i32) -> (i32, i32) {
    %c0_i32 = arith.constant 0 : i32
    %c0_i32_0 = arith.constant 0 : i32
    %c0_i32_1 = arith.constant 0 : i32
    return %c0_i32, %c0_i32_0 : i32, i32
  }
  func.func @transform_5(%arg0: i32) -> (i32, i32) {
    %c0_i32 = arith.constant 0 : i32
    %c0_i32_0 = arith.constant 0 : i32
    %c0_i32_1 = arith.constant 0 : i32
    return %c0_i32, %c0_i32_0 : i32, i32
  }
  func.func @transform_6(%arg0: i32) -> (i32, i32) {
    %c0_i32 = arith.constant 0 : i32
    %c0_i32_0 = arith.constant 0 : i32
    %c0_i32_1 = arith.constant 0 : i32
    return %c0_i32, %c0_i32_0 : i32, i32
  }
  func.func @transform_7(%arg0: i32) -> (i32, i32) {
    %c0_i32 = arith.constant 0 : i32
    %c0_i32_0 = arith.constant 0 : i32
    %c0_i32_1 = arith.constant 0 : i32
    return %c0_i32, %c0_i32_0 : i32, i32
  }
  func.func @transform_8(%arg0: i32) -> (i32, i32) {
    %c0_i32 = arith.constant 0 : i32
    %c0_i32_0 = arith.constant 0 : i32
    return %arg0, %c0_i32 : i32, i32
  }
  func.func @transform_9(%arg0: i32) -> (i32, i32) {
    %c0_i32 = arith.constant 0 : i32
    %c0_i32_0 = arith.constant 0 : i32
    %c0_i32_1 = arith.constant 0 : i32
    return %c0_i32, %c0_i32_0 : i32, i32
  }
  func.func @transform_10(%arg0: i32) -> (i32, i32) {
    %c0_i32 = arith.constant 0 : i32
    %c0_i32_0 = arith.constant 0 : i32
    %c0_i32_1 = arith.constant 0 : i32
    return %c0_i32, %c0_i32_0 : i32, i32
  }
}

module attributes {stable_mosaic.version = 11 : i64} {
  func.func @_edge_stage3_kernel(%arg0: i32, %arg1: memref<128x128xbf16, #tpu.memory_space<vmem>>, %arg2: memref<1x128xf32, #tpu.memory_space<vmem>>, %arg3: memref<1x128xf32, #tpu.memory_space<vmem>>, %arg4: memref<128x128xbf16, #tpu.memory_space<vmem>>, %arg5: memref<1x128xf32, #tpu.memory_space<vmem>>, %arg6: memref<128x128xbf16, #tpu.memory_space<vmem>>, %arg7: memref<1x128xf32, #tpu.memory_space<vmem>>, %arg8: memref<1x128xf32, #tpu.memory_space<vmem>>) attributes {dimension_semantics = [#tpu.dimension_semantics<arbitrary>], iteration_bounds = array<i64: 2>, scalar_prefetch = 0 : i64, scratch_operands = 0 : i64, tpu.core_type = #tpu.core_type<tc>, window_params = [{transform_indices = @transform_0, window_bounds = array<i64: 128, 128>}, {pipeline_mode = #tpu.pipeline_mode<synchronous>, transform_indices = @transform_1, window_bounds = array<i64: 1, 128>}, {pipeline_mode = #tpu.pipeline_mode<synchronous>, transform_indices = @transform_2, window_bounds = array<i64: 1, 128>}, {pipeline_mode = #tpu.pipeline_mode<synchronous>, transform_indices = @transform_3, window_bounds = array<i64: 128, 128>}, {pipeline_mode = #tpu.pipeline_mode<synchronous>, transform_indices = @transform_4, window_bounds = array<i64: 1, 128>}, {transform_indices = @transform_5, window_bounds = array<i64: 128, 128>}, {pipeline_mode = #tpu.pipeline_mode<synchronous>, transform_indices = @transform_6, window_bounds = array<i64: 1, 128>}, {pipeline_mode = #tpu.pipeline_mode<synchronous>, transform_indices = @transform_7, window_bounds = array<i64: 1, 128>}]} {
    %c0 = arith.constant 0 : index
    %c0_0 = arith.constant 0 : index
    %0 = vector.load %arg1[%c0, %c0_0] : memref<128x128xbf16, #tpu.memory_space<vmem>>, vector<128x128xbf16>
    %1 = arith.extf %0 : vector<128x128xbf16> to vector<128x128xf32>
    %c0_1 = arith.constant 0 : index
    %c0_2 = arith.constant 0 : index
    %2 = vector.load %arg2[%c0_1, %c0_2] : memref<1x128xf32, #tpu.memory_space<vmem>>, vector<1x128xf32>
    %cst = arith.constant 5.000000e-03 : f32
    %3 = vector.broadcast %cst : f32 to vector<1x128xf32>
    %4 = arith.mulf %2, %3 : vector<1x128xf32>
    %c0_3 = arith.constant 0 : index
    %c0_4 = arith.constant 0 : index
    %5 = vector.load %arg3[%c0_3, %c0_4] : memref<1x128xf32, #tpu.memory_space<vmem>>, vector<1x128xf32>
    %c0_5 = arith.constant 0 : index
    %c0_6 = arith.constant 0 : index
    %6 = vector.load %arg2[%c0_5, %c0_6] : memref<1x128xf32, #tpu.memory_space<vmem>>, vector<1x128xf32>
    %7 = arith.mulf %6, %4 : vector<1x128xf32>
    %8 = arith.subf %5, %7 : vector<1x128xf32>
    %cst_7 = arith.constant 0.00502512557 : f32
    %9 = vector.broadcast %cst_7 : f32 to vector<1x128xf32>
    %10 = arith.mulf %8, %9 : vector<1x128xf32>
    %11 = vector.broadcast %4 : vector<1x128xf32> to vector<128x128xf32>
    %12 = arith.subf %1, %11 : vector<128x128xf32>
    %cst_8 = arith.constant 9.99999974E-6 : f32
    %13 = vector.broadcast %cst_8 : f32 to vector<1x128xf32>
    %14 = arith.addf %10, %13 : vector<1x128xf32>
    %15 = math.rsqrt %14 : vector<1x128xf32>
    %16 = vector.broadcast %15 : vector<1x128xf32> to vector<128x128xf32>
    %17 = arith.mulf %12, %16 : vector<128x128xf32>
    %18 = arith.truncf %17 : vector<128x128xf32> to vector<128x128xbf16>
    %c0_9 = arith.constant 0 : index
    %c0_10 = arith.constant 0 : index
    %19 = vector.load %arg4[%c0_9, %c0_10] : memref<128x128xbf16, #tpu.memory_space<vmem>>, vector<128x128xbf16>
    %cst_11 = arith.constant dense<0.000000e+00> : vector<128x128xf32>
    %20 = tpu.matmul %18, %19, %cst_11 {dimension_numbers = #tpu.dot_dimension_numbers<[1], [0], [0], [1], [0, 0, 1, 1], [], []>} : vector<128x128xbf16>, vector<128x128xbf16>, vector<128x128xf32> -> vector<128x128xf32>
    %c0_12 = arith.constant 0 : index
    %c0_13 = arith.constant 0 : index
    %21 = vector.load %arg5[%c0_12, %c0_13] : memref<1x128xf32, #tpu.memory_space<vmem>>, vector<1x128xf32>
    %22 = vector.broadcast %21 : vector<1x128xf32> to vector<128x128xf32>
    %23 = arith.addf %20, %22 : vector<128x128xf32>
    %cst_14 = arith.constant 0.000000e+00 : f32
    %24 = vector.broadcast %cst_14 : f32 to vector<128x128xf32>
    %25 = arith.maximumf %23, %24 : vector<128x128xf32>
    %c128_i32 = arith.constant 128 : i32
    %26 = arith.muli %arg0, %c128_i32 : i32
    %27 = tpu.iota {dimensions = array<i32: 0>} : vector<128x128xi32>
    %28 = vector.broadcast %26 : i32 to vector<128x128xi32>
    %29 = arith.addi %27, %28 : vector<128x128xi32>
    %c200_i32 = arith.constant 200 : i32
    %30 = vector.broadcast %c200_i32 : i32 to vector<128x128xi32>
    %31 = arith.cmpi slt, %29, %30 : vector<128x128xi32>
    %cst_15 = arith.constant 0.000000e+00 : f32
    %32 = vector.broadcast %cst_15 : f32 to vector<128x128xf32>
    %33 = arith.select %31, %25, %32 : vector<128x128xi1>, vector<128x128xf32>
    %34 = arith.truncf %33 : vector<128x128xf32> to vector<128x128xbf16>
    %c0_16 = arith.constant 0 : index
    %c0_17 = arith.constant 0 : index
    %35 = vector.load %arg6[%c0_16, %c0_17] : memref<128x128xbf16, #tpu.memory_space<vmem>>, vector<128x128xbf16>
    tpu.vector_store %arg6[%c0_16, %c0_17], %34 {strides = array<i32>} : memref<128x128xbf16, #tpu.memory_space<vmem>>, vector<128x128xbf16>,
    %c0_i32 = arith.constant 0 : i32
    %36 = arith.cmpi eq, %arg0, %c0_i32 : i32
    %37 = arith.extui %36 : i1 to i32
    %c0_i32_18 = arith.constant 0 : i32
    %38 = arith.cmpi ne, %37, %c0_i32_18 : i32
    scf.if %38 {
      %cst_29 = arith.constant 0.000000e+00 : f32
      %50 = vector.broadcast %cst_29 : f32 to vector<1x128xf32>
      %c0_30 = arith.constant 0 : index
      %c0_31 = arith.constant 0 : index
      %51 = vector.load %arg7[%c0_30, %c0_31] : memref<1x128xf32, #tpu.memory_space<vmem>>, vector<1x128xf32>
      tpu.vector_store %arg7[%c0_30, %c0_31], %50 {strides = array<i32>} : memref<1x128xf32, #tpu.memory_space<vmem>>, vector<1x128xf32>,
      %cst_32 = arith.constant 0.000000e+00 : f32
      %52 = vector.broadcast %cst_32 : f32 to vector<1x128xf32>
      %c0_33 = arith.constant 0 : index
      %c0_34 = arith.constant 0 : index
      %53 = vector.load %arg8[%c0_33, %c0_34] : memref<1x128xf32, #tpu.memory_space<vmem>>, vector<1x128xf32>
      tpu.vector_store %arg8[%c0_33, %c0_34], %52 {strides = array<i32>} : memref<1x128xf32, #tpu.memory_space<vmem>>, vector<1x128xf32>,
    } else {
    }
    %c0_19 = arith.constant 0 : index
    %c0_20 = arith.constant 0 : index
    %39 = vector.load %arg7[%c0_19, %c0_20] : memref<1x128xf32, #tpu.memory_space<vmem>>, vector<1x128xf32>
    %cst_21 = arith.constant dense<0.000000e+00> : vector<128xf32>
    %40 = vector.multi_reduction <add>, %33, %cst_21 [0] : vector<128x128xf32> to vector<128xf32>
    %41 = vector.shape_cast %40 : vector<128xf32> to vector<1x128xf32>
    %42 = arith.addf %39, %41 : vector<1x128xf32>
    %c0_22 = arith.constant 0 : index
    %c0_23 = arith.constant 0 : index
    %43 = vector.load %arg7[%c0_22, %c0_23] : memref<1x128xf32, #tpu.memory_space<vmem>>, vector<1x128xf32>
    tpu.vector_store %arg7[%c0_22, %c0_23], %42 {strides = array<i32>} : memref<1x128xf32, #tpu.memory_space<vmem>>, vector<1x128xf32>,
    %c0_24 = arith.constant 0 : index
    %c0_25 = arith.constant 0 : index
    %44 = vector.load %arg8[%c0_24, %c0_25] : memref<1x128xf32, #tpu.memory_space<vmem>>, vector<1x128xf32>
    %45 = arith.mulf %33, %33 : vector<128x128xf32>
    %cst_26 = arith.constant dense<0.000000e+00> : vector<128xf32>
    %46 = vector.multi_reduction <add>, %45, %cst_26 [0] : vector<128x128xf32> to vector<128xf32>
    %47 = vector.shape_cast %46 : vector<128xf32> to vector<1x128xf32>
    %48 = arith.addf %44, %47 : vector<1x128xf32>
    %c0_27 = arith.constant 0 : index
    %c0_28 = arith.constant 0 : index
    %49 = vector.load %arg8[%c0_27, %c0_28] : memref<1x128xf32, #tpu.memory_space<vmem>>, vector<1x128xf32>
    tpu.vector_store %arg8[%c0_27, %c0_28], %48 {strides = array<i32>} : memref<1x128xf32, #tpu.memory_space<vmem>>, vector<1x128xf32>,
    return
  }
  func.func @transform_0(%arg0: i32) -> (i32, i32) {
    %c0_i32 = arith.constant 0 : i32
    %c0_i32_0 = arith.constant 0 : i32
    return %arg0, %c0_i32 : i32, i32
  }
  func.func @transform_1(%arg0: i32) -> (i32, i32) {
    %c0_i32 = arith.constant 0 : i32
    %c0_i32_0 = arith.constant 0 : i32
    %c0_i32_1 = arith.constant 0 : i32
    return %c0_i32, %c0_i32_0 : i32, i32
  }
  func.func @transform_2(%arg0: i32) -> (i32, i32) {
    %c0_i32 = arith.constant 0 : i32
    %c0_i32_0 = arith.constant 0 : i32
    %c0_i32_1 = arith.constant 0 : i32
    return %c0_i32, %c0_i32_0 : i32, i32
  }
  func.func @transform_3(%arg0: i32) -> (i32, i32) {
    %c0_i32 = arith.constant 0 : i32
    %c0_i32_0 = arith.constant 0 : i32
    %c0_i32_1 = arith.constant 0 : i32
    return %c0_i32, %c0_i32_0 : i32, i32
  }
  func.func @transform_4(%arg0: i32) -> (i32, i32) {
    %c0_i32 = arith.constant 0 : i32
    %c0_i32_0 = arith.constant 0 : i32
    %c0_i32_1 = arith.constant 0 : i32
    return %c0_i32, %c0_i32_0 : i32, i32
  }
  func.func @transform_5(%arg0: i32) -> (i32, i32) {
    %c0_i32 = arith.constant 0 : i32
    %c0_i32_0 = arith.constant 0 : i32
    return %arg0, %c0_i32 : i32, i32
  }
  func.func @transform_6(%arg0: i32) -> (i32, i32) {
    %c0_i32 = arith.constant 0 : i32
    %c0_i32_0 = arith.constant 0 : i32
    %c0_i32_1 = arith.constant 0 : i32
    return %c0_i32, %c0_i32_0 : i32, i32
  }
  func.func @transform_7(%arg0: i32) -> (i32, i32) {
    %c0_i32 = arith.constant 0 : i32
    %c0_i32_0 = arith.constant 0 : i32
    %c0_i32_1 = arith.constant 0 : i32
    return %c0_i32, %c0_i32_0 : i32, i32
  }
}

module attributes {stable_mosaic.version = 11 : i64} {
  func.func @_scatter_node_kernel(%arg0: i32, %arg1: memref<128x128xbf16, #tpu.memory_space<vmem>>, %arg2: memref<1x128xf32, #tpu.memory_space<vmem>>, %arg3: memref<1x128xf32, #tpu.memory_space<vmem>>, %arg4: memref<1x128xi32, #tpu.memory_space<vmem>>, %arg5: memref<16x32xbf16, #tpu.memory_space<vmem>>, %arg6: memref<32x128xbf16, #tpu.memory_space<vmem>>, %arg7: memref<128x128xbf16, #tpu.memory_space<vmem>>, %arg8: memref<1x128xf32, #tpu.memory_space<vmem>>, %arg9: memref<128x128xbf16, #tpu.memory_space<vmem>>, %arg10: memref<1x128xf32, #tpu.memory_space<vmem>>, %arg11: memref<16x128xbf16, #tpu.memory_space<vmem>>, %arg12: memref<16x128xf32, #tpu.memory_space<vmem>>) attributes {dimension_semantics = [#tpu.dimension_semantics<arbitrary>], iteration_bounds = array<i64: 2>, scalar_prefetch = 0 : i64, scratch_operands = 1 : i64, tpu.core_type = #tpu.core_type<tc>, window_params = [{transform_indices = @transform_0, window_bounds = array<i64: 128, 128>}, {pipeline_mode = #tpu.pipeline_mode<synchronous>, transform_indices = @transform_1, window_bounds = array<i64: 1, 128>}, {pipeline_mode = #tpu.pipeline_mode<synchronous>, transform_indices = @transform_2, window_bounds = array<i64: 1, 128>}, {transform_indices = @transform_3, window_bounds = array<i64: 1, 128>}, {pipeline_mode = #tpu.pipeline_mode<synchronous>, transform_indices = @transform_4, window_bounds = array<i64: 16, 32>}, {pipeline_mode = #tpu.pipeline_mode<synchronous>, transform_indices = @transform_5, window_bounds = array<i64: 32, 128>}, {pipeline_mode = #tpu.pipeline_mode<synchronous>, transform_indices = @transform_6, window_bounds = array<i64: 128, 128>}, {pipeline_mode = #tpu.pipeline_mode<synchronous>, transform_indices = @transform_7, window_bounds = array<i64: 1, 128>}, {pipeline_mode = #tpu.pipeline_mode<synchronous>, transform_indices = @transform_8, window_bounds = array<i64: 128, 128>}, {pipeline_mode = #tpu.pipeline_mode<synchronous>, transform_indices = @transform_9, window_bounds = array<i64: 1, 128>}, {pipeline_mode = #tpu.pipeline_mode<synchronous>, transform_indices = @transform_10, window_bounds = array<i64: 16, 128>}]} {
    %c0_i32 = arith.constant 0 : i32
    %0 = arith.cmpi eq, %arg0, %c0_i32 : i32
    %1 = arith.extui %0 : i1 to i32
    %c0_i32_0 = arith.constant 0 : i32
    %2 = arith.cmpi ne, %1, %c0_i32_0 : i32
    scf.if %2 {
      %cst_20 = arith.constant 0.000000e+00 : f32
      %44 = vector.broadcast %cst_20 : f32 to vector<16x128xf32>
      %c0_21 = arith.constant 0 : index
      %c0_22 = arith.constant 0 : index
      %45 = vector.load %arg12[%c0_21, %c0_22] : memref<16x128xf32, #tpu.memory_space<vmem>>, vector<16x128xf32>
      tpu.vector_store %arg12[%c0_21, %c0_22], %44 {strides = array<i32>} : memref<16x128xf32, #tpu.memory_space<vmem>>, vector<16x128xf32>,
    } else {
    }
    %c0 = arith.constant 0 : index
    %c0_1 = arith.constant 0 : index
    %3 = vector.load %arg1[%c0, %c0_1] : memref<128x128xbf16, #tpu.memory_space<vmem>>, vector<128x128xbf16>
    %4 = arith.extf %3 : vector<128x128xbf16> to vector<128x128xf32>
    %c0_2 = arith.constant 0 : index
    %c0_3 = arith.constant 0 : index
    %5 = vector.load %arg2[%c0_2, %c0_3] : memref<1x128xf32, #tpu.memory_space<vmem>>, vector<1x128xf32>
    %cst = arith.constant 5.000000e-03 : f32
    %6 = vector.broadcast %cst : f32 to vector<1x128xf32>
    %7 = arith.mulf %5, %6 : vector<1x128xf32>
    %c0_4 = arith.constant 0 : index
    %c0_5 = arith.constant 0 : index
    %8 = vector.load %arg3[%c0_4, %c0_5] : memref<1x128xf32, #tpu.memory_space<vmem>>, vector<1x128xf32>
    %c0_6 = arith.constant 0 : index
    %c0_7 = arith.constant 0 : index
    %9 = vector.load %arg2[%c0_6, %c0_7] : memref<1x128xf32, #tpu.memory_space<vmem>>, vector<1x128xf32>
    %10 = arith.mulf %9, %7 : vector<1x128xf32>
    %11 = arith.subf %8, %10 : vector<1x128xf32>
    %cst_8 = arith.constant 0.00502512557 : f32
    %12 = vector.broadcast %cst_8 : f32 to vector<1x128xf32>
    %13 = arith.mulf %11, %12 : vector<1x128xf32>
    %14 = vector.broadcast %7 : vector<1x128xf32> to vector<128x128xf32>
    %15 = arith.subf %4, %14 : vector<128x128xf32>
    %cst_9 = arith.constant 9.99999974E-6 : f32
    %16 = vector.broadcast %cst_9 : f32 to vector<1x128xf32>
    %17 = arith.addf %13, %16 : vector<1x128xf32>
    %18 = math.rsqrt %17 : vector<1x128xf32>
    %19 = vector.broadcast %18 : vector<1x128xf32> to vector<128x128xf32>
    %20 = arith.mulf %15, %19 : vector<128x128xf32>
    %21 = tpu.iota {dimensions = array<i32: 1>} : vector<1x128xi32>
    %c32_i32 = arith.constant 32 : i32
    %22 = vector.broadcast %c32_i32 : i32 to vector<1x128xi32>
    %23 = arith.cmpi eq, %21, %22 : vector<1x128xi32>
    %cst_10 = arith.constant 1.000000e+00 : f32
    %cst_11 = arith.constant 0.000000e+00 : f32
    %24 = vector.broadcast %cst_10 : f32 to vector<1x128xf32>
    %25 = vector.broadcast %cst_11 : f32 to vector<1x128xf32>
    %26 = arith.select %23, %24, %25 : vector<1x128xi1>, vector<1x128xf32>
    %27 = vector.broadcast %26 : vector<1x128xf32> to vector<128x128xf32>
    %28 = arith.addf %20, %27 : vector<128x128xf32>
    %29 = arith.truncf %28 : vector<128x128xf32> to vector<128x128xbf16>
    %30 = tpu.iota {dimensions = array<i32: 0>} : vector<16x128xi32>
    %c0_12 = arith.constant 0 : index
    %c0_13 = arith.constant 0 : index
    %31 = vector.load %arg4[%c0_12, %c0_13] : memref<1x128xi32, #tpu.memory_space<vmem>>, vector<1x128xi32>
    %32 = vector.broadcast %31 : vector<1x128xi32> to vector<16x128xi32>
    %33 = arith.cmpi eq, %30, %32 : vector<16x128xi32>
    %34 = arith.extui %33 : vector<16x128xi1> to vector<16x128xi32>
    %35 = arith.sitofp %34 : vector<16x128xi32> to vector<16x128xf32>
    %36 = arith.truncf %35 : vector<16x128xf32> to vector<16x128xbf16>
    %c0_14 = arith.constant 0 : index
    %c0_15 = arith.constant 0 : index
    %37 = vector.load %arg12[%c0_14, %c0_15] : memref<16x128xf32, #tpu.memory_space<vmem>>, vector<16x128xf32>
    %cst_16 = arith.constant dense<0.000000e+00> : vector<16x128xf32>
    %38 = tpu.matmul %36, %29, %cst_16 {dimension_numbers = #tpu.dot_dimension_numbers<[1], [0], [0], [1], [0, 0, 1, 1], [], []>} : vector<16x128xbf16>, vector<128x128xbf16>, vector<16x128xf32> -> vector<16x128xf32>
    %39 = arith.addf %37, %38 : vector<16x128xf32>
    %c0_17 = arith.constant 0 : index
    %c0_18 = arith.constant 0 : index
    %40 = vector.load %arg12[%c0_17, %c0_18] : memref<16x128xf32, #tpu.memory_space<vmem>>, vector<16x128xf32>
    tpu.vector_store %arg12[%c0_17, %c0_18], %39 {strides = array<i32>} : memref<16x128xf32, #tpu.memory_space<vmem>>, vector<16x128xf32>,
    %c1_i32 = arith.constant 1 : i32
    %41 = arith.cmpi eq, %arg0, %c1_i32 : i32
    %42 = arith.extui %41 : i1 to i32
    %c0_i32_19 = arith.constant 0 : i32
    %43 = arith.cmpi ne, %42, %c0_i32_19 : i32
    scf.if %43 {
      %c0_20 = arith.constant 0 : index
      %c0_21 = arith.constant 0 : index
      %44 = vector.load %arg12[%c0_20, %c0_21] : memref<16x128xf32, #tpu.memory_space<vmem>>, vector<16x128xf32>
      %45 = vector.extract_strided_slice %44 {offsets = [0, 32], sizes = [16, 1], strides = [1, 1]} : vector<16x128xf32> to vector<16x1xf32>
      %cst_22 = arith.constant 1.000000e+00 : f32
      %46 = vector.broadcast %cst_22 : f32 to vector<16x1xf32>
      %47 = arith.maximumf %45, %46 : vector<16x1xf32>
      %cst_23 = arith.constant 1.000000e+00 : f32
      %48 = vector.broadcast %cst_23 : f32 to vector<16x1xf32>
      %49 = arith.divf %48, %47 : vector<16x1xf32>
      %50 = vector.broadcast %49 : vector<16x1xf32> to vector<16x128xf32>
      %51 = arith.mulf %44, %50 : vector<16x128xf32>
      %c0_24 = arith.constant 0 : index
      %c0_25 = arith.constant 0 : index
      %52 = vector.load %arg5[%c0_24, %c0_25] : memref<16x32xbf16, #tpu.memory_space<vmem>>, vector<16x32xbf16>
      %c0_26 = arith.constant 0 : index
      %c0_27 = arith.constant 0 : index
      %53 = vector.load %arg6[%c0_26, %c0_27] : memref<32x128xbf16, #tpu.memory_space<vmem>>, vector<32x128xbf16>
      %cst_28 = arith.constant dense<0.000000e+00> : vector<16x128xf32>
      %54 = tpu.matmul %52, %53, %cst_28 {dimension_numbers = #tpu.dot_dimension_numbers<[1], [0], [0], [1], [0, 0, 1, 1], [], []>} : vector<16x32xbf16>, vector<32x128xbf16>, vector<16x128xf32> -> vector<16x128xf32>
      %55 = arith.truncf %51 : vector<16x128xf32> to vector<16x128xbf16>
      %c0_29 = arith.constant 0 : index
      %c0_30 = arith.constant 0 : index
      %56 = vector.load %arg7[%c0_29, %c0_30] : memref<128x128xbf16, #tpu.memory_space<vmem>>, vector<128x128xbf16>
      %cst_31 = arith.constant dense<0.000000e+00> : vector<16x128xf32>
      %57 = tpu.matmul %55, %56, %cst_31 {dimension_numbers = #tpu.dot_dimension_numbers<[1], [0], [0], [1], [0, 0, 1, 1], [], []>} : vector<16x128xbf16>, vector<128x128xbf16>, vector<16x128xf32> -> vector<16x128xf32>
      %58 = arith.addf %54, %57 : vector<16x128xf32>
      %c0_32 = arith.constant 0 : index
      %c0_33 = arith.constant 0 : index
      %59 = vector.load %arg8[%c0_32, %c0_33] : memref<1x128xf32, #tpu.memory_space<vmem>>, vector<1x128xf32>
      %60 = vector.broadcast %59 : vector<1x128xf32> to vector<16x128xf32>
      %61 = arith.addf %58, %60 : vector<16x128xf32>
      %cst_34 = arith.constant 0.000000e+00 : f32
      %62 = vector.broadcast %cst_34 : f32 to vector<16x128xf32>
      %63 = arith.maximumf %61, %62 : vector<16x128xf32>
      %64 = tpu.iota {dimensions = array<i32: 0>} : vector<16x128xi32>
      %c0_i32_35 = arith.constant 0 : i32
      %65 = vector.broadcast %c0_i32_35 : i32 to vector<16x128xi32>
      %66 = arith.addi %64, %65 : vector<16x128xi32>
      %c16_i32 = arith.constant 16 : i32
      %67 = vector.broadcast %c16_i32 : i32 to vector<16x128xi32>
      %68 = arith.cmpi slt, %66, %67 : vector<16x128xi32>
      %cst_36 = arith.constant 0.000000e+00 : f32
      %69 = vector.broadcast %cst_36 : f32 to vector<16x128xf32>
      %70 = arith.select %68, %63, %69 : vector<16x128xi1>, vector<16x128xf32>
      %cst_37 = arith.constant dense<0.000000e+00> : vector<128xf32>
      %71 = vector.multi_reduction <add>, %70, %cst_37 [0] : vector<16x128xf32> to vector<128xf32>
      %72 = vector.shape_cast %71 : vector<128xf32> to vector<1x128xf32>
      %cst_38 = arith.constant 6.250000e-02 : f32
      %73 = vector.broadcast %cst_38 : f32 to vector<1x128xf32>
      %74 = arith.mulf %72, %73 : vector<1x128xf32>
      %75 = vector.broadcast %74 : vector<1x128xf32> to vector<16x128xf32>
      %76 = arith.subf %63, %75 : vector<16x128xf32>
      %77 = arith.mulf %76, %76 : vector<16x128xf32>
      %cst_39 = arith.constant 0.000000e+00 : f32
      %78 = vector.broadcast %cst_39 : f32 to vector<16x128xf32>
      %79 = arith.select %68, %77, %78 : vector<16x128xi1>, vector<16x128xf32>
      %cst_40 = arith.constant dense<0.000000e+00> : vector<128xf32>
      %80 = vector.multi_reduction <add>, %79, %cst_40 [0] : vector<16x128xf32> to vector<128xf32>
      %81 = vector.shape_cast %80 : vector<128xf32> to vector<1x128xf32>
      %cst_41 = arith.constant 0.0666666701 : f32
      %82 = vector.broadcast %cst_41 : f32 to vector<1x128xf32>
      %83 = arith.mulf %81, %82 : vector<1x128xf32>
      %cst_42 = arith.constant 9.99999974E-6 : f32
      %84 = vector.broadcast %cst_42 : f32 to vector<1x128xf32>
      %85 = arith.addf %83, %84 : vector<1x128xf32>
      %86 = math.rsqrt %85 : vector<1x128xf32>
      %87 = vector.broadcast %86 : vector<1x128xf32> to vector<16x128xf32>
      %88 = arith.mulf %76, %87 : vector<16x128xf32>
      %89 = arith.truncf %88 : vector<16x128xf32> to vector<16x128xbf16>
      %c0_43 = arith.constant 0 : index
      %c0_44 = arith.constant 0 : index
      %90 = vector.load %arg9[%c0_43, %c0_44] : memref<128x128xbf16, #tpu.memory_space<vmem>>, vector<128x128xbf16>
      %cst_45 = arith.constant dense<0.000000e+00> : vector<16x128xf32>
      %91 = tpu.matmul %89, %90, %cst_45 {dimension_numbers = #tpu.dot_dimension_numbers<[1], [0], [0], [1], [0, 0, 1, 1], [], []>} : vector<16x128xbf16>, vector<128x128xbf16>, vector<16x128xf32> -> vector<16x128xf32>
      %c0_46 = arith.constant 0 : index
      %c0_47 = arith.constant 0 : index
      %92 = vector.load %arg10[%c0_46, %c0_47] : memref<1x128xf32, #tpu.memory_space<vmem>>, vector<1x128xf32>
      %93 = vector.broadcast %92 : vector<1x128xf32> to vector<16x128xf32>
      %94 = arith.addf %91, %93 : vector<16x128xf32>
      %cst_48 = arith.constant 0.000000e+00 : f32
      %95 = vector.broadcast %cst_48 : f32 to vector<16x128xf32>
      %96 = arith.maximumf %94, %95 : vector<16x128xf32>
      %97 = tpu.iota {dimensions = array<i32: 0>} : vector<16x128xi32>
      %c0_i32_49 = arith.constant 0 : i32
      %98 = vector.broadcast %c0_i32_49 : i32 to vector<16x128xi32>
      %99 = arith.addi %97, %98 : vector<16x128xi32>
      %c16_i32_50 = arith.constant 16 : i32
      %100 = vector.broadcast %c16_i32_50 : i32 to vector<16x128xi32>
      %101 = arith.cmpi slt, %99, %100 : vector<16x128xi32>
      %cst_51 = arith.constant 0.000000e+00 : f32
      %102 = vector.broadcast %cst_51 : f32 to vector<16x128xf32>
      %103 = arith.select %101, %96, %102 : vector<16x128xi1>, vector<16x128xf32>
      %cst_52 = arith.constant dense<0.000000e+00> : vector<128xf32>
      %104 = vector.multi_reduction <add>, %103, %cst_52 [0] : vector<16x128xf32> to vector<128xf32>
      %105 = vector.shape_cast %104 : vector<128xf32> to vector<1x128xf32>
      %cst_53 = arith.constant 6.250000e-02 : f32
      %106 = vector.broadcast %cst_53 : f32 to vector<1x128xf32>
      %107 = arith.mulf %105, %106 : vector<1x128xf32>
      %108 = vector.broadcast %107 : vector<1x128xf32> to vector<16x128xf32>
      %109 = arith.subf %96, %108 : vector<16x128xf32>
      %110 = arith.mulf %109, %109 : vector<16x128xf32>
      %cst_54 = arith.constant 0.000000e+00 : f32
      %111 = vector.broadcast %cst_54 : f32 to vector<16x128xf32>
      %112 = arith.select %101, %110, %111 : vector<16x128xi1>, vector<16x128xf32>
      %cst_55 = arith.constant dense<0.000000e+00> : vector<128xf32>
      %113 = vector.multi_reduction <add>, %112, %cst_55 [0] : vector<16x128xf32> to vector<128xf32>
      %114 = vector.shape_cast %113 : vector<128xf32> to vector<1x128xf32>
      %cst_56 = arith.constant 0.0666666701 : f32
      %115 = vector.broadcast %cst_56 : f32 to vector<1x128xf32>
      %116 = arith.mulf %114, %115 : vector<1x128xf32>
      %cst_57 = arith.constant 9.99999974E-6 : f32
      %117 = vector.broadcast %cst_57 : f32 to vector<1x128xf32>
      %118 = arith.addf %116, %117 : vector<1x128xf32>
      %119 = math.rsqrt %118 : vector<1x128xf32>
      %120 = vector.broadcast %119 : vector<1x128xf32> to vector<16x128xf32>
      %121 = arith.mulf %109, %120 : vector<16x128xf32>
      %122 = arith.truncf %121 : vector<16x128xf32> to vector<16x128xbf16>
      %c0_58 = arith.constant 0 : index
      %c0_59 = arith.constant 0 : index
      %123 = vector.load %arg11[%c0_58, %c0_59] : memref<16x128xbf16, #tpu.memory_space<vmem>>, vector<16x128xbf16>
      tpu.vector_store %arg11[%c0_58, %c0_59], %122 {strides = array<i32>} : memref<16x128xbf16, #tpu.memory_space<vmem>>, vector<16x128xbf16>,
    } else {
    }
    return
  }
  func.func @transform_0(%arg0: i32) -> (i32, i32) {
    %c0_i32 = arith.constant 0 : i32
    %c0_i32_0 = arith.constant 0 : i32
    return %arg0, %c0_i32 : i32, i32
  }
  func.func @transform_1(%arg0: i32) -> (i32, i32) {
    %c0_i32 = arith.constant 0 : i32
    %c0_i32_0 = arith.constant 0 : i32
    %c0_i32_1 = arith.constant 0 : i32
    return %c0_i32, %c0_i32_0 : i32, i32
  }
  func.func @transform_2(%arg0: i32) -> (i32, i32) {
    %c0_i32 = arith.constant 0 : i32
    %c0_i32_0 = arith.constant 0 : i32
    %c0_i32_1 = arith.constant 0 : i32
    return %c0_i32, %c0_i32_0 : i32, i32
  }
  func.func @transform_3(%arg0: i32) -> (i32, i32) {
    %c0_i32 = arith.constant 0 : i32
    %c0_i32_0 = arith.constant 0 : i32
    return %c0_i32, %arg0 : i32, i32
  }
  func.func @transform_4(%arg0: i32) -> (i32, i32) {
    %c0_i32 = arith.constant 0 : i32
    %c0_i32_0 = arith.constant 0 : i32
    %c0_i32_1 = arith.constant 0 : i32
    return %c0_i32, %c0_i32_0 : i32, i32
  }
  func.func @transform_5(%arg0: i32) -> (i32, i32) {
    %c0_i32 = arith.constant 0 : i32
    %c0_i32_0 = arith.constant 0 : i32
    %c0_i32_1 = arith.constant 0 : i32
    return %c0_i32, %c0_i32_0 : i32, i32
  }
  func.func @transform_6(%arg0: i32) -> (i32, i32) {
    %c0_i32 = arith.constant 0 : i32
    %c0_i32_0 = arith.constant 0 : i32
    %c0_i32_1 = arith.constant 0 : i32
    return %c0_i32, %c0_i32_0 : i32, i32
  }
  func.func @transform_7(%arg0: i32) -> (i32, i32) {
    %c0_i32 = arith.constant 0 : i32
    %c0_i32_0 = arith.constant 0 : i32
    %c0_i32_1 = arith.constant 0 : i32
    return %c0_i32, %c0_i32_0 : i32, i32
  }
  func.func @transform_8(%arg0: i32) -> (i32, i32) {
    %c0_i32 = arith.constant 0 : i32
    %c0_i32_0 = arith.constant 0 : i32
    %c0_i32_1 = arith.constant 0 : i32
    return %c0_i32, %c0_i32_0 : i32, i32
  }
  func.func @transform_9(%arg0: i32) -> (i32, i32) {
    %c0_i32 = arith.constant 0 : i32
    %c0_i32_0 = arith.constant 0 : i32
    %c0_i32_1 = arith.constant 0 : i32
    return %c0_i32, %c0_i32_0 : i32, i32
  }
  func.func @transform_10(%arg0: i32) -> (i32, i32) {
    %c0_i32 = arith.constant 0 : i32
    %c0_i32_0 = arith.constant 0 : i32
    %c0_i32_1 = arith.constant 0 : i32
    return %c0_i32, %c0_i32_0 : i32, i32
  }
}

</mosaic_0001>

<bundles_post_ra>
// kernel: node_model_forward.4
= control target key start
LH: loop header
LB: loop body
LE: loop exit
PB: predicated region body
PF: predicated region fallthrough
CT: control target
= control target key end

     0   :  { %s994_s18 = smov 0   ;;  %s1208_s0 = inlined_call_operand.vmem [shape: bf16[256,128], index: 0, kind: input, shape index: {}]   ;;  %s1209_s1 = inlined_call_operand.vmem [shape: bf16[128,128], index: 1, kind: input, shape index: {}]   ;;  %s1210_s2 = inlined_call_operand.vmem [shape: f32[1,128], index: 2, kind: input, shape index: {}]   ;;  %s1211_s3 = inlined_call_operand.vmem [shape: bf16[256,128], index: 3, kind: output, shape index: {0}]   ;;  %s1212_s4 = inlined_call_operand.vmem [shape: f32[1,128], index: 4, kind: output, shape index: {1}]   ;;  %s1213_s5 = inlined_call_operand.vmem [shape: f32[1,128], index: 5, kind: output, shape index: {2}]  }
   0x1 LB: > { %s1000_s19 = sadd.s32 4294967295, %s961_s18   ;;  %p761_p0 = scmp.ge.s32.totalorder %s961_s18, 1  ;;  %s961_s18 = sphi %s994_s18, %s16_s18  }
   0x2   : > { %p183_p1 = scmp.lt.s32.totalorder %s961_s18, 3 }
   0x4   : > { %p184_p2 = pnand %p761_p0, %p183_p1 }
   0x5   : > { %s762_s22 = sshll.u32 (!%p184_p2), %s1000_s19, 4  ;;  %s783_s16 = sshll.u32 (!%p184_p2), %s1000_s19, 7 }
   0x6   : > { %187 = sbr.rel (%p184_p2) target bundleno = 309 (0x135), region = 32  ;;  %p212_p3 = scmp.lt.s32.totalorder (!%p184_p2), %s762_s22, 31 }
   0x7   : > { %p800_p4 = scmp.ne.s32.totalorder (!%p184_p2), %s1000_s19, 0 }
   0xb   : > { %v939_v0 = vld [vmem:[%s1209_s1 + $0x38] sm:$0xff]   ;;  %v940_v1 = vld [vmem:[%s1209_s1 + $0x30] sm:$0xff]   ;;  %s1215_s22 = smov (!%p212_p3, %s762_s22), 31  ;;  %v941_v2 = vld [vmem:[%s1209_s1 + $0x28] sm:$0xff]   ;;  %v473_v16 = vlaneseq  ;;  %v490_v21 = vstv %s783_s16 }
   0xc   : > { %882 = vmatprep.subr.bf16.mxu0 %v939_v0  ;;  %914 = vmatprep.subr.bf16.mxu1 %v939_v0  ;;  %s763_s27 = sshll.u32 %s1215_s22, 2  ;;  %v942_v3 = vld [vmem:[%s1209_s1 + $0x20] sm:$0xff]   ;;  %v943_v6 = vld [vmem:[%s1209_s1 + $0x18] sm:$0xff]   ;;  %v944_v7 = vld [vmem:[%s1209_s1 + $0x10] sm:$0xff]  }
   0xd   : > { %883 = vmatpush3.bf16.msra.mxu0 %v939_v0  ;;  %922 = vmatpush3.bf16.msra.mxu1 %v939_v0  ;;  %s1022_s30 = scalar_lea.vmem %s1208_s0, %s763_s27  ;;  %v945_v8 = vld [vmem:[%s1209_s1 + $0x8] sm:$0xff]   ;;  %v946_v9 = vld [vmem:[%s1209_s1] sm:$0xff]   ;;  %v474_v17 = vshrl.u32 %v473_v16, 7  ;;  %s1112_s24 = scalar_lea.vmem %s1211_s3, %s763_s27 }
   0xe   : > { %884 = vmatprep.subr.bf16.mxu0 %v940_v1  ;;  %915 = vmatprep.subr.bf16.mxu1 %v940_v1  ;;  %v947_v4 = vld [vmem:[%s1022_s30] sm:$0xff]   ;;  %v949_v10 = vld [vmem:[%s1022_s30 + $0x8] sm:$0xff]   ;;  %v951_v12 = vld [vmem:[%s1022_s30 + $0x10] sm:$0xff]  }
   0xf   : > { %v948_v5 = vld [vmem:[%s1022_s30 + $0x20] sm:$0xff]   ;;  %898 = vmatprep.mubr.bf16.mxu0 %v947_v4  ;;  %v950_v11 = vld [vmem:[%s1022_s30 + $0x28] sm:$0xff]   ;;  %v952_v13 = vld [vmem:[%s1022_s30 + $0x30] sm:$0xff]   ;;  %v476_v18 = vadd.s32 16, %v474_v17  ;;  %v484_v19 = vadd.s32 80, %v474_v17  ;;  %v482_v20 = vadd.s32 64, %v474_v17  ;;  %v1048_v26 = vadd.s32 %v490_v21, %v474_v17 }
  0x10   : > { %906 = vmatprep.mubr.bf16.mxu1 %v948_v5  ;;  %v953_v14 = vld [vmem:[%s1022_s30 + $0x18] sm:$0xff]   ;;  %v477_v22 = vadd.s32 24, %v474_v17  ;;  %v485_v23 = vadd.s32 88, %v474_v17  ;;  %v475_v28 = vadd.s32 8, %v474_v17  ;;  %v483_v29 = vadd.s32 72, %v474_v17 }
  0x11   : > { %885 = vmatpush3.bf16.msra.mxu0 %v940_v1  ;;  %923 = vmatpush3.bf16.msra.mxu1 %v940_v1  ;;  %v954_v15 = vld [vmem:[%s1022_s30 + $0x38] sm:$0xff]   ;;  %v493_v24 = vadd.s32 %v490_v21, %v476_v18  ;;  %v501_v25 = vadd.s32 %v490_v21, %v484_v19  ;;  %v1050_v27 = vadd.s32 %v490_v21, %v482_v20  ;;  %v1055_v30 = vld [vmem:[%s1210_s2] ss:$0 sm:$0xff]  ;;  %v480_v33 = vadd.s32 48, %v474_v17 }
  0x12   : > { %886 = vmatprep.subr.bf16.mxu0 %v941_v2  ;;  %916 = vmatprep.subr.bf16.mxu1 %v941_v2  ;;  %v1057_v31 = vadd.s32 %v490_v21, %v477_v22  ;;  %v1059_v32 = vadd.s32 %v490_v21, %v485_v23  ;;  %v488_v34 = vadd.s32 112, %v474_v17  ;;  %vm507_vm2 = vcmp.lt.s32.totalorder %v1048_v26, 200 }
  0x13   : > { %vm509_vm0 = vcmp.lt.s32.totalorder %v493_v24, 200  ;;  %vm517_vm1 = vcmp.lt.s32.totalorder %v501_v25, 200  ;;  %vm515_vm3 = vcmp.lt.s32.totalorder %v1050_v27, 200  ;;  %v492_v37 = vadd.s32 %v490_v21, %v475_v28 }
  0x14   : > { %v500_v38 = vadd.s32 %v490_v21, %v483_v29  ;;  %v478_v39 = vadd.s32 32, %v474_v17  ;;  %v486_v40 = vadd.s32 96, %v474_v17  ;;  %v481_v43 = vadd.s32 56, %v474_v17 }
  0x15   : > { %887 = vmatpush3.bf16.msra.mxu0 %v941_v2  ;;  %924 = vmatpush3.bf16.msra.mxu1 %v941_v2  ;;  %v489_v44 = vadd.s32 120, %v474_v17  ;;  %vm510_vm4 = vcmp.lt.s32.totalorder %v1057_v31, 200  ;;  %vm518_vm5 = vcmp.lt.s32.totalorder %v1059_v32, 200  ;;  %v1067_v47 = vadd.s32 %v490_v21, %v480_v33 }
  0x16   : > { %888 = vmatprep.subr.bf16.mxu0 %v942_v3  ;;  %917 = vmatprep.subr.bf16.mxu1 %v942_v3  ;;  %v1069_v48 = vadd.s32 %v490_v21, %v488_v34  ;;  %v479_v51 = vadd.s32 40, %v474_v17  ;;  %v487_v52 = vadd.s32 104, %v474_v17  ;;  %vm508_vm6 = vcmp.lt.s32.totalorder %v492_v37, 200 }
  0x17   : > { %vm516_vm7 = vcmp.lt.s32.totalorder %v500_v38, 200  ;;  %v1073_v57 = vadd.s32 %v490_v21, %v478_v39  ;;  %v1075_v58 = vadd.s32 %v490_v21, %v486_v40  ;;  %v1077_v59 = vadd.s32 %v490_v21, %v481_v43 }
  0x18   : > { %v1079_v60 = vadd.s32 %v490_v21, %v489_v44  ;;  %vm513_vm8 = vcmp.lt.s32.totalorder %v1067_v47, 200  ;;  %vm521_vm9 = vcmp.lt.s32.totalorder %v1069_v48, 200  ;;  %v1087_v5 = vadd.s32 %v490_v21, %v479_v51 }
  0x19   : > { %889 = vmatpush3.bf16.msra.mxu0 %v942_v3  ;;  %925 = vmatpush3.bf16.msra.mxu1 %v942_v3  ;;  %vm511_vm10 = vcmp.lt.s32.totalorder %v1073_v57, 200  ;;  %vm519_vm11 = vcmp.lt.s32.totalorder %v1075_v58, 200  ;;  %vm514_vm12 = vcmp.lt.s32.totalorder %v1077_v59, 200 }
  0x1a   : > { %890 = vmatprep.subr.bf16.mxu0 %v943_v6  ;;  %918 = vmatprep.subr.bf16.mxu1 %v943_v6  ;;  %vm522_vm13 = vcmp.lt.s32.totalorder %v1079_v60, 200  ;;  %vm512_vm14 = vcmp.lt.s32.totalorder %v1087_v5, 200 }
  0x1d   : > { %891 = vmatpush3.bf16.msra.mxu0 %v943_v6  ;;  %926 = vmatpush3.bf16.msra.mxu1 %v943_v6  ;;  %v1089_v6 = vadd.s32 %v490_v21, %v487_v52 }
  0x1e   : > { %892 = vmatprep.subr.bf16.mxu0 %v944_v7  ;;  %919 = vmatprep.subr.bf16.mxu1 %v944_v7 }
  0x1f   : > { %vm520_vm15 = vcmp.lt.s32.totalorder %v1089_v6, 200 }
  0x21   : > { %893 = vmatpush3.bf16.msra.mxu0 %v944_v7  ;;  %927 = vmatpush3.bf16.msra.mxu1 %v944_v7 }
  0x22   : > { %894 = vmatprep.subr.bf16.mxu0 %v945_v8  ;;  %920 = vmatprep.subr.bf16.mxu1 %v945_v8 }
  0x25   : > { %895 = vmatpush3.bf16.msra.mxu0 %v945_v8  ;;  %928 = vmatpush3.bf16.msra.mxu1 %v945_v8 }
  0x26   : > { %896 = vmatprep.subr.bf16.mxu0 %v946_v9  ;;  %921 = vmatprep.subr.bf16.mxu1 %v946_v9 }
  0x29   : > { %897 = vmatpush3.bf16.msra.mxu0 %v946_v9  ;;  %929 = vmatpush3.bf16.msra.mxu1 %v946_v9 }
  0x2c   : > { %899 = vmatmul.mubr.bf16.vlgmr.msra.gmra.mxu0 %v949_v10  ;;  %907 = vmatmul.mubr.bf16.vlgmr.msra.gmra.mxu1 %v950_v11 }
  0x2d   : > { %902 = vmatprep.mubr.bf16.mxu0 %v951_v12  ;;  %910 = vmatprep.mubr.bf16.mxu1 %v952_v13 }
  0x34   : > { %903 = vmatmul.mubr.bf16.gmra.mxu0 %v953_v14  ;;  %911 = vmatmul.mubr.bf16.gmra.mxu1 %v954_v15 }
  0xec   : > { %v900_v35 = vpop.f32.mrf.mxu0  ;;  %v908_v36 = vpop.f32.mrf.mxu1 }
  0xed   : > { %v402_v41 = vadd.f32 %v900_v35, %v1055_v30  ;;  %v434_v42 = vadd.f32 %v908_v36, %v1055_v30 }
  0xee   : > { %v393_v45 = vpop.f32.mrf.mxu0  ;;  %v425_v46 = vpop.f32.mrf.mxu1 }
  0xef   : > { %v394_v49 = vadd.f32 %v1055_v30, %v393_v45  ;;  %v426_v50 = vadd.f32 %v1055_v30, %v425_v46  ;;  %v458_v53 = vmax.f32 %v402_v41, 0.0  ;;  %v466_v54 = vmax.f32 %v434_v42, 0.0 }
  0xf0   : > { %v901_v55 = vpop.f32.mrf.mxu0  ;;  %v909_v56 = vpop.f32.mrf.mxu1 }
  0xf1   : > { %v456_v61 = vmax.f32 %v394_v49, 0.0  ;;  %v464_v62 = vmax.f32 %v426_v50, 0.0  ;;  %v405_v63 = vadd.f32 %v901_v55, %v1055_v30  ;;  %v437_v0 = vadd.f32 %v909_v56, %v1055_v30 }
  0xf2   : > { %v396_v1 = vpop.f32.mrf.mxu0  ;;  %v428_v2 = vpop.f32.mrf.mxu1  ;;  %v1092_v7 = vsel %vm509_vm0, %v458_v53, 0.0  ;;  %v1095_v8 = vsel %vm517_vm1, %v466_v54, 0.0 }
  0xf3   : > { %v397_v3 = vadd.f32 %v1055_v30, %v396_v1  ;;  %v429_v4 = vadd.f32 %v1055_v30, %v428_v2  ;;  %v459_v9 = vmax.f32 %v405_v63, 0.0  ;;  %v467_v10 = vmax.f32 %v437_v0, 0.0 }
  0xf4   : > { %v904_v11 = vpop.f32.mrf.mxu0  ;;  %v912_v12 = vpop.f32.mrf.mxu1  ;;  %v1101_v17 = vsel %vm507_vm2, %v456_v61, 0.0  ;;  %v1105_v18 = vsel %vm515_vm3, %v464_v62, 0.0 }
  0xf5   : > { %v457_v13 = vmax.f32 %v397_v3, 0.0  ;;  %v465_v14 = vmax.f32 %v429_v4, 0.0  ;;  %v418_v15 = vadd.f32 %v904_v11, %v1055_v30  ;;  %v450_v16 = vadd.f32 %v912_v12, %v1055_v30 }
  0xf6   : > { %v1116_v19 = vsel %vm510_vm4, %v459_v9, 0.0  ;;  %v1120_v20 = vsel %vm518_vm5, %v467_v10, 0.0  ;;  %v409_v21 = vpop.f32.mrf.mxu0  ;;  %v441_v22 = vpop.f32.mrf.mxu1 }
  0xf7   : > { %v827_v23 = vpack.c.bf16 %v1116_v19, %v1092_v7  ;;  %v847_v24 = vpack.c.bf16 %v1120_v20, %v1095_v8  ;;  %v524_v25 = vsel %vm508_vm6, %v457_v13, 0.0  ;;  %v1128_v26 = vsel %vm516_vm7, %v465_v14, 0.0 }
  0xf8   : > { %v822_v27 = vpack.c.bf16 %v524_v25, %v1101_v17  ;;  %v842_v28 = vpack.c.bf16 %v1128_v26, %v1105_v18  ;;  %v462_v29 = vmax.f32 %v418_v15, 0.0  ;;  %v470_v31 = vmax.f32 %v450_v16, 0.0  ;;  %v905_v32 = vpop.f32.mrf.mxu0  ;;  %v913_v33 = vpop.f32.mrf.mxu1 }
  0xf9   : > { %859 = vst [vmem:[%s1112_s24 + $0x8] sm:$0xff] %v827_v23   ;;  %863 = vst [vmem:[%s1112_s24 + $0x28] sm:$0xff] %v847_v24   ;;  %v410_v34 = vadd.f32 %v1055_v30, %v409_v21  ;;  %v442_v35 = vadd.f32 %v1055_v30, %v441_v22  ;;  %v421_v36 = vadd.f32 %v905_v32, %v1055_v30 }
  0xfa   : > { %v453_v37 = vadd.f32 %v913_v33, %v1055_v30  ;;  %823 = vst [vmem:[%s1112_s24] sm:$0xff] %v822_v27   ;;  %862 = vst [vmem:[%s1112_s24 + $0x20] sm:$0xff] %v842_v28   ;;  %v412_v38 = vpop.f32.mrf.mxu0  ;;  %v444_v39 = vpop.f32.mrf.mxu1  ;;  %v529_v46 = vsel %vm513_vm8, %v462_v29, 0.0  ;;  %v537_v49 = vsel %vm521_vm9, %v470_v31, 0.0 }
  0xfb   : > { %v463_v40 = vmax.f32 %v421_v36, 0.0  ;;  %v460_v42 = vmax.f32 %v410_v34, 0.0  ;;  %v468_v43 = vmax.f32 %v442_v35, 0.0  ;;  %v413_v44 = vadd.f32 %v1055_v30, %v412_v38 }
  0xfc   : > { %v471_v41 = vmax.f32 %v453_v37, 0.0  ;;  %v445_v45 = vadd.f32 %v1055_v30, %v444_v39 }
  0xfd   : > { %v530_v50 = vsel %vm514_vm12, %v463_v40, 0.0  ;;  %v461_v54 = vmax.f32 %v413_v44, 0.0  ;;  %v527_v56 = vsel %vm511_vm10, %v460_v42, 0.0  ;;  %v535_v30 = vsel %vm519_vm11, %v468_v43, 0.0 }
  0xfe   : > { %v538_v51 = vsel %vm522_vm13, %v471_v41, 0.0  ;;  %v837_v52 = vpack.c.bf16 %v530_v50, %v529_v46  ;;  %v469_v55 = vmax.f32 %v445_v45, 0.0 }
  0xff   : > { %v857_v53 = vpack.c.bf16 %v538_v51, %v537_v49  ;;  %v528_v47 = vsel %vm512_vm14, %v461_v54, 0.0  ;;  %622 = sbr.rel (%p800_p4) target bundleno = 262 (0x106), region = 36 }
 0x100   : > { %861 = vst [vmem:[%s1112_s24 + $0x18] sm:$0xff] %v837_v52   ;;  %v536_v48 = vsel %vm520_vm15, %v469_v55, 0.0  ;;  %v832_v59 = vpack.c.bf16 %v528_v47, %v527_v56 }
 0x101   : > { %865 = vst [vmem:[%s1112_s24 + $0x38] sm:$0xff] %v857_v53   ;;  %v852_v60 = vpack.c.bf16 %v536_v48, %v535_v30 }
 0x102   : > { %860 = vst [vmem:[%s1112_s24 + $0x10] sm:$0xff] %v832_v59  }
 0x103   : > { %864 = vst [vmem:[%s1112_s24 + $0x30] sm:$0xff] %v852_v60  }
 0x104   : > { %v963_v57 = vmov 0.0  }
 0x105   : > { %623 = vst [vmem:[%s1212_s4] sm:$0x1] %v963_v57  ;;  %624 = vst [vmem:[%s1213_s5] sm:$0x1] %v963_v57 }
 0x106 PF: > { %v626_v58 = vadd.f32 %v524_v25, %v1101_v17  ;;  %v650_v61 = vmul.f32 %v1101_v17, %v1101_v17  ;;  %v651_v62 = vmul.f32 %v524_v25, %v524_v25  ;;  %v652_v0 = vmul.f32 %v1092_v7, %v1092_v7 }
 0x107   : > { %v653_v2 = vmul.f32 %v1116_v19, %v1116_v19  ;;  %v654_v5 = vmul.f32 %v527_v56, %v527_v56  ;;  %v655_v10 = vmul.f32 %v528_v47, %v528_v47  ;;  %v656_v13 = vmul.f32 %v529_v46, %v529_v46 }
 0x108   : > { %v627_v63 = vadd.f32 %v626_v58, %v1092_v7  ;;  %v666_v3 = vadd.f32 %v651_v62, %v650_v61  ;;  %v657_v16 = vmul.f32 %v530_v50, %v530_v50  ;;  %v658_v21 = vmul.f32 %v1105_v18, %v1105_v18 }
 0x109   : > { %v659_v23 = vmul.f32 %v1128_v26, %v1128_v26  ;;  %v660_v27 = vmul.f32 %v1095_v8, %v1095_v8  ;;  %v661_v31 = vmul.f32 %v1120_v20, %v1120_v20  ;;  %v662_v33 = vmul.f32 %v535_v30, %v535_v30 }
 0x10a   : > { %v628_v1 = vadd.f32 %v627_v63, %v1116_v19  ;;  %v667_v6 = vadd.f32 %v666_v3, %v652_v0  ;;  %v663_v36 = vmul.f32 %v536_v48, %v536_v48  ;;  %v664_v38 = vmul.f32 %v537_v49, %v537_v49 }
 0x10b   : > { %v665_v41 = vmul.f32 %v538_v51, %v538_v51 }
 0x10c   : > { %v629_v4 = vadd.f32 %v628_v1, %v527_v56  ;;  %v668_v11 = vadd.f32 %v667_v6, %v653_v2  ;;  %v625_v55 = vld [vmem:[%s1212_s4] sm:$0x1] }
 0x10e   : > { %v630_v9 = vadd.f32 %v629_v4, %v528_v47  ;;  %v669_v14 = vadd.f32 %v668_v11, %v654_v5 }
 0x110   : > { %v631_v12 = vadd.f32 %v630_v9, %v529_v46  ;;  %v670_v17 = vadd.f32 %v669_v14, %v655_v10 }
 0x112   : > { %v632_v15 = vadd.f32 %v631_v12, %v530_v50  ;;  %v671_v22 = vadd.f32 %v670_v17, %v656_v13 }
 0x114   : > { %v633_v7 = vadd.f32 %v632_v15, %v1105_v18  ;;  %v672_v24 = vadd.f32 %v671_v22, %v657_v16 }
 0x116   : > { %v634_v19 = vadd.f32 %v633_v7, %v1128_v26  ;;  %v673_v28 = vadd.f32 %v672_v24, %v658_v21 }
 0x118   : > { %v635_v25 = vadd.f32 %v634_v19, %v1095_v8  ;;  %v674_v32 = vadd.f32 %v673_v28, %v659_v23 }
 0x11a   : > { %v636_v29 = vadd.f32 %v635_v25, %v1120_v20  ;;  %v675_v34 = vadd.f32 %v674_v32, %v660_v27 }
 0x11c   : > { %v637_v18 = vadd.f32 %v636_v29, %v535_v30  ;;  %v676_v37 = vadd.f32 %v675_v34, %v661_v31 }
 0x11e   : > { %v638_v35 = vadd.f32 %v637_v18, %v536_v48  ;;  %v677_v39 = vadd.f32 %v676_v37, %v662_v33 }
 0x120   : > { %v639_v26 = vadd.f32 %v638_v35, %v537_v49  ;;  %v678_v42 = vadd.f32 %v677_v39, %v663_v36 }
 0x122   : > { %v640_v40 = vadd.f32 %v639_v26, %v538_v51  ;;  %v679_v43 = vadd.f32 %v678_v42, %v664_v38  ;;  %v649_v51 = vld [vmem:[%s1213_s5] sm:$0x1] }
 0x124   : > { %v641_v8 = vrot.slane %v640_v40, 4  ;;  %v680_v45 = vadd.f32 %v679_v43, %v665_v41 }
 0x126   : > { %v642_v44 = vadd.f32 %v641_v8, %v640_v40  ;;  %v681_v50 = vrot.slane %v680_v45, 4 }
 0x128   : > { %v643_v46 = vrot.slane %v642_v44, 2  ;;  %v682_v52 = vadd.f32 %v681_v50, %v680_v45 }
 0x12a   : > { %v644_v20 = vadd.f32 %v643_v46, %v642_v44  ;;  %v683_v54 = vrot.slane %v682_v52, 2 }
 0x12c   : > { %v645_v53 = vrot.slane %v644_v20, 1  ;;  %v684_v49 = vadd.f32 %v683_v54, %v682_v52 }
 0x12e   : > { %v646_v56 = vadd.f32 %v645_v53, %v644_v20  ;;  %v685_v47 = vrot.slane %v684_v49, 1 }
 0x130   : > { %v647_v30 = vadd.f32 %v646_v56, %v625_v55  ;;  %v686_v48 = vadd.f32 %v685_v47, %v684_v49 }
 0x132   : > { %648 = vst [vmem:[%s1212_s4] sm:$0x1] %v647_v30  ;;  %v687_v59 = vadd.f32 %v686_v48, %v649_v51 }
 0x134   : > { %688 = vst [vmem:[%s1213_s5] sm:$0x1] %v687_v59 }
 0x135 PF: > { %s16_s18 = sadd.s32 1, %s961_s18  }
 0x136   : > { %p13_p5 = scmp.ge.s32.totalorder %s16_s18, 4  }
 0x138   :  { %15 = sbr.rel (!%p13_p5) target bundleno = 1 (0x1), region = 82 }

// kernel: node_model_forward.6
= control target key start
LH: loop header
LB: loop body
LE: loop exit
PB: predicated region body
PF: predicated region fallthrough
CT: control target
= control target key end

     0   :  { %s1111_s24 = smov 0   ;;  %s1340_s0 = inlined_call_operand.vmem [shape: bf16[256,128], index: 0, kind: input, shape index: {}]   ;;  %s1341_s1 = inlined_call_operand.vmem [shape: f32[1,128], index: 1, kind: input, shape index: {}]   ;;  %s1342_s2 = inlined_call_operand.vmem [shape: f32[1,128], index: 2, kind: input, shape index: {}]   ;;  %s1343_s3 = inlined_call_operand.vmem [shape: bf16[128,128], index: 3, kind: input, shape index: {}]   ;;  %s1344_s4 = inlined_call_operand.vmem [shape: f32[1,128], index: 4, kind: input, shape index: {}]   ;;  %s1345_s5 = inlined_call_operand.vmem [shape: bf16[256,128], index: 5, kind: output, shape index: {0}]   ;;  %s1346_s6 = inlined_call_operand.vmem [shape: f32[1,128], index: 6, kind: output, shape index: {1}]   ;;  %s1347_s7 = inlined_call_operand.vmem [shape: f32[1,128], index: 7, kind: output, shape index: {2}]  }
   0x1 LB: > { %s1117_s25 = sadd.s32 4294967295, %s1068_s24   ;;  %p843_p0 = scmp.ge.s32.totalorder %s1068_s24, 1  ;;  %s1068_s24 = sphi %s1111_s24, %s18_s24  }
   0x2   : > { %p233_p1 = scmp.lt.s32.totalorder %s1068_s24, 3 }
   0x4   : > { %p234_p2 = pnand %p843_p0, %p233_p1 }
   0x5   : > { %s844_s9 = sshll.u32 (!%p234_p2), %s1117_s25, 4  ;;  %s857_s30 = sshll.u32 (!%p234_p2), %s1117_s25, 7 }
   0x6   : > { %237 = sbr.rel (%p234_p2) target bundleno = 310 (0x136), region = 40  ;;  %p266_p3 = scmp.lt.s32.totalorder (!%p234_p2), %s844_s9, 31 }
   0x7   : > { %p874_p4 = scmp.ne.s32.totalorder (!%p234_p2), %s1117_s25, 0 }
   0xb   : > { %v1052_v0 = vld [vmem:[%s1343_s3 + $0x38] sm:$0xff]   ;;  %v1053_v1 = vld [vmem:[%s1343_s3 + $0x30] sm:$0xff]   ;;  %v1054_v2 = vld [vmem:[%s1343_s3 + $0x28] sm:$0xff]   ;;  %s1349_s9 = smov (!%p266_p3, %s844_s9), 31  ;;  %v317_v10 = vlaneseq }
   0xc   : > { %995 = vmatprep.subr.bf16.mxu0 %v1052_v0  ;;  %1027 = vmatprep.subr.bf16.mxu1 %v1052_v0  ;;  %v1055_v3 = vld [vmem:[%s1343_s3 + $0x20] sm:$0xff]   ;;  %v1056_v8 = vld [vmem:[%s1343_s3 + $0x18] sm:$0xff]   ;;  %v1057_v12 = vld [vmem:[%s1343_s3 + $0x10] sm:$0xff]   ;;  %s845_s20 = sshll.u32 %s1349_s9, 2 }
   0xd   : > { %996 = vmatpush3.bf16.msra.mxu0 %v1052_v0  ;;  %1035 = vmatpush3.bf16.msra.mxu1 %v1052_v0  ;;  %v310_v4 = vld [vmem:[%s1341_s1] sm:$0x1]  ;;  %v1149_v13 = vshrl.u32 %v317_v10, 7  ;;  %s269_s23 = scalar_lea.vmem %s1340_s0, %s845_s20  ;;  %v1058_v15 = vld [vmem:[%s1343_s3 + $0x8] sm:$0xff]   ;;  %s1244_s13 = scalar_lea.vmem %s1345_s5, %s845_s20 }
   0xe   : > { %997 = vmatprep.subr.bf16.mxu0 %v1053_v1  ;;  %1028 = vmatprep.subr.bf16.mxu1 %v1053_v1  ;;  %v311_v5 = vmul.f32 0.005, %v310_v4  ;;  %v312_v6 = vld [vmem:[%s1342_s2] sm:$0x1]  ;;  %v965_v20 = vld [vmem:[%s269_s23 + $0x8] sm:$0xff]   ;;  %v966_v25 = vld [vmem:[%s269_s23 + $0x10] sm:$0xff]  }
   0xf   : > { %v319_v16 = vsub.s32 0, %v1149_v13  ;;  %v894_v17 = vld [vmem:[%s269_s23] sm:$0xff]   ;;  %v969_v24 = vld [vmem:[%s269_s23 + $0x28] sm:$0xff]   ;;  %v970_v26 = vld [vmem:[%s269_s23 + $0x30] sm:$0xff]   ;;  %v899_v29 = vunpack.c.l.bf16 %v965_v20  ;;  %v900_v30 = vunpack.c.h.bf16 %v965_v20  ;;  %v903_v35 = vunpack.c.l.bf16 %v966_v25 }
  0x10   : > { %v313_v7 = vmul.f32 %v311_v5, %v310_v4  ;;  %v1059_v18 = vld [vmem:[%s1343_s3] sm:$0xff]   ;;  %v895_v21 = vunpack.c.l.bf16 %v894_v17  ;;  %v896_v22 = vunpack.c.h.bf16 %v894_v17  ;;  %v967_v31 = vld [vmem:[%s269_s23 + $0x18] sm:$0xff]   ;;  %v915_v33 = vunpack.c.l.bf16 %v969_v24 }
  0x11   : > { %998 = vmatpush3.bf16.msra.mxu0 %v1053_v1  ;;  %1036 = vmatpush3.bf16.msra.mxu1 %v1053_v1  ;;  %v968_v19 = vld [vmem:[%s269_s23 + $0x20] sm:$0xff]   ;;  %v320_v23 = vrot.slane %v311_v5, %v319_v16  ;;  %v971_v32 = vld [vmem:[%s269_s23 + $0x38] sm:$0xff]   ;;  %v916_v34 = vunpack.c.h.bf16 %v969_v24  ;;  %v904_v36 = vunpack.c.h.bf16 %v966_v25  ;;  %v919_v39 = vunpack.c.l.bf16 %v970_v26 }
  0x12   : > { %999 = vmatprep.subr.bf16.mxu0 %v1054_v2  ;;  %1029 = vmatprep.subr.bf16.mxu1 %v1054_v2  ;;  %v314_v9 = vsub.f32 %v312_v6, %v313_v7  ;;  %v911_v27 = vunpack.c.l.bf16 %v968_v19  ;;  %v912_v28 = vunpack.c.h.bf16 %v968_v19  ;;  %v920_v40 = vunpack.c.h.bf16 %v970_v26 }
  0x13   : > { %v322_v37 = vsub.f32 %v895_v21, %v320_v23  ;;  %v323_v38 = vsub.f32 %v896_v22, %v320_v23  ;;  %v907_v41 = vunpack.c.l.bf16 %v967_v31  ;;  %v908_v42 = vunpack.c.h.bf16 %v967_v31 }
  0x14   : > { %v315_v11 = vmul.f32 0.0050251256, %v314_v9  ;;  %v923_v43 = vunpack.c.l.bf16 %v971_v32  ;;  %v924_v44 = vunpack.c.h.bf16 %v971_v32  ;;  %v330_v45 = vsub.f32 %v911_v27, %v320_v23 }
  0x15   : > { %1000 = vmatpush3.bf16.msra.mxu0 %v1054_v2  ;;  %1037 = vmatpush3.bf16.msra.mxu1 %v1054_v2  ;;  %v331_v46 = vsub.f32 %v912_v28, %v320_v23  ;;  %v324_v47 = vsub.f32 %v899_v29, %v320_v23  ;;  %v325_v49 = vsub.f32 %v900_v30, %v320_v23  ;;  %v558_v22 = vadd.s32 16, %v1149_v13 }
  0x16   : > { %1001 = vmatprep.subr.bf16.mxu0 %v1055_v3  ;;  %1030 = vmatprep.subr.bf16.mxu1 %v1055_v3  ;;  %v338_v14 = vadd.f32 1e-05, %v315_v11  ;;  %v332_v50 = vsub.f32 %v915_v33, %v320_v23  ;;  %v333_v51 = vsub.f32 %v916_v34, %v320_v23  ;;  %v326_v52 = vsub.f32 %v903_v35, %v320_v23  ;;  %v1179_v34 = vld [vmem:[%s1344_s4] ss:$0 sm:$0xff] }
  0x17   : > { %v327_v54 = vsub.f32 %v904_v36, %v320_v23  ;;  %v334_v55 = vsub.f32 %v919_v39, %v320_v23  ;;  %v335_v56 = vsub.f32 %v920_v40, %v320_v23  ;;  %v328_v57 = vsub.f32 %v907_v41, %v320_v23 }
  0x18   : > { %1060 = vrsqrt.f32 %v338_v14  ;;  %v329_v58 = vsub.f32 %v908_v42, %v320_v23  ;;  %v336_v59 = vsub.f32 %v923_v43, %v320_v23  ;;  %v337_v60 = vsub.f32 %v924_v44, %v320_v23 }
  0x19   : > { %1002 = vmatpush3.bf16.msra.mxu0 %v1055_v3  ;;  %1038 = vmatpush3.bf16.msra.mxu1 %v1055_v3  ;;  %v566_v23 = vadd.s32 80, %v1149_v13  ;;  %v564_v24 = vadd.s32 64, %v1149_v13  ;;  %v572_v25 = vstv %s857_s30  ;;  %v559_v26 = vadd.s32 24, %v1149_v13 }
  0x1a   : > { %1003 = vmatprep.subr.bf16.mxu0 %v1056_v8  ;;  %1031 = vmatprep.subr.bf16.mxu1 %v1056_v8  ;;  %v567_v27 = vadd.s32 88, %v1149_v13  ;;  %v575_v28 = vadd.s32 %v572_v25, %v558_v22  ;;  %v1170_v30 = vadd.s32 %v572_v25, %v1149_v13  ;;  %v557_v32 = vadd.s32 8, %v1149_v13 }
  0x1b   : > { %v583_v29 = vadd.s32 %v572_v25, %v566_v23  ;;  %v1172_v31 = vadd.s32 %v572_v25, %v564_v24  ;;  %v565_v33 = vadd.s32 72, %v1149_v13  ;;  %v1181_v35 = vadd.s32 %v572_v25, %v559_v26 }
  0x1c   : > { %v1183_v36 = vadd.s32 %v572_v25, %v567_v27  ;;  %vm591_vm0 = vcmp.lt.s32.totalorder %v575_v28, 200  ;;  %vm589_vm2 = vcmp.lt.s32.totalorder %v1170_v30, 200  ;;  %v574_v41 = vadd.s32 %v572_v25, %v557_v32 }
  0x1d   : > { %1004 = vmatpush3.bf16.msra.mxu0 %v1056_v8  ;;  %1039 = vmatpush3.bf16.msra.mxu1 %v1056_v8  ;;  %vm599_vm1 = vcmp.lt.s32.totalorder %v583_v29, 200  ;;  %vm597_vm3 = vcmp.lt.s32.totalorder %v1172_v31, 200  ;;  %v582_v42 = vadd.s32 %v572_v25, %v565_v33  ;;  %v560_v43 = vadd.s32 32, %v1149_v13 }
  0x1e   : > { %1005 = vmatprep.subr.bf16.mxu0 %v1057_v12  ;;  %1032 = vmatprep.subr.bf16.mxu1 %v1057_v12  ;;  %v568_v44 = vadd.s32 96, %v1149_v13  ;;  %vm592_vm4 = vcmp.lt.s32.totalorder %v1181_v35, 200  ;;  %vm600_vm5 = vcmp.lt.s32.totalorder %v1183_v36, 200  ;;  %vm590_vm6 = vcmp.lt.s32.totalorder %v574_v41, 200 }
  0x1f   : > { %vm598_vm7 = vcmp.lt.s32.totalorder %v582_v42, 200 }
  0x21   : > { %1006 = vmatpush3.bf16.msra.mxu0 %v1057_v12  ;;  %1040 = vmatpush3.bf16.msra.mxu1 %v1057_v12 }
  0x22   : > { %1007 = vmatprep.subr.bf16.mxu0 %v1058_v15  ;;  %1033 = vmatprep.subr.bf16.mxu1 %v1058_v15 }
  0x25   : > { %1008 = vmatpush3.bf16.msra.mxu0 %v1058_v15  ;;  %1041 = vmatpush3.bf16.msra.mxu1 %v1058_v15  ;;  %v1061_v48 = vpop.eup %1060 }
  0x26   : > { %1009 = vmatprep.subr.bf16.mxu0 %v1059_v18  ;;  %1034 = vmatprep.subr.bf16.mxu1 %v1059_v18  ;;  %v344_v53 = vrot.slane %v1061_v48, %v319_v16  ;;  %v571_v48 = vadd.s32 120, %v1149_v13 }
  0x28   : > { %v346_v61 = vmul.f32 %v344_v53, %v322_v37  ;;  %v347_v62 = vmul.f32 %v344_v53, %v323_v38  ;;  %v354_v63 = vmul.f32 %v344_v53, %v330_v45  ;;  %v355_v0 = vmul.f32 %v344_v53, %v331_v46 }
  0x29   : > { %1010 = vmatpush3.bf16.msra.mxu0 %v1059_v18  ;;  %1042 = vmatpush3.bf16.msra.mxu1 %v1059_v18  ;;  %v348_v1 = vmul.f32 %v344_v53, %v324_v47  ;;  %v349_v2 = vmul.f32 %v344_v53, %v325_v49  ;;  %v356_v3 = vmul.f32 %v344_v53, %v332_v50  ;;  %v562_v37 = vadd.s32 48, %v1149_v13 }
  0x2a   : > { %v357_v4 = vmul.f32 %v344_v53, %v333_v51  ;;  %v362_v5 = vpack.c.bf16 %v347_v62, %v346_v61  ;;  %v366_v6 = vpack.c.bf16 %v355_v0, %v354_v63  ;;  %v350_v7 = vmul.f32 %v344_v53, %v326_v52 }
  0x2b   : > { %v351_v8 = vmul.f32 %v344_v53, %v327_v54  ;;  %v363_v9 = vpack.c.bf16 %v349_v2, %v348_v1  ;;  %v358_v11 = vmul.f32 %v344_v53, %v334_v55  ;;  %v359_v12 = vmul.f32 %v344_v53, %v335_v56 }
  0x2c   : > { %v367_v10 = vpack.c.bf16 %v357_v4, %v356_v3  ;;  %1011 = vmatprep.mubr.bf16.mxu0 %v362_v5  ;;  %1019 = vmatprep.mubr.bf16.mxu1 %v366_v6  ;;  %v352_v15 = vmul.f32 %v344_v53, %v328_v57  ;;  %v353_v16 = vmul.f32 %v344_v53, %v329_v58  ;;  %v570_v38 = vadd.s32 112, %v1149_v13 }
  0x2d   : > { %v364_v14 = vpack.c.bf16 %v351_v8, %v350_v7  ;;  %1012 = vmatmul.mubr.bf16.vlgmr.msra.gmra.mxu0 %v363_v9  ;;  %v368_v17 = vpack.c.bf16 %v359_v12, %v358_v11  ;;  %v360_v18 = vmul.f32 %v344_v53, %v336_v59  ;;  %v361_v19 = vmul.f32 %v344_v53, %v337_v60 }
  0x2e   : > { %1020 = vmatmul.mubr.bf16.vlgmr.msra.gmra.mxu1 %v367_v10  ;;  %v365_v20 = vpack.c.bf16 %v353_v16, %v352_v15  ;;  %v563_v47 = vadd.s32 56, %v1149_v13  ;;  %v1197_v51 = vadd.s32 %v572_v25, %v562_v37  ;;  %v1199_v52 = vadd.s32 %v572_v25, %v570_v38 }
  0x2f   : > { %1015 = vmatprep.mubr.bf16.mxu0 %v364_v14  ;;  %1023 = vmatprep.mubr.bf16.mxu1 %v368_v17  ;;  %v369_v21 = vpack.c.bf16 %v361_v19, %v360_v18  ;;  %v561_v55 = vadd.s32 40, %v1149_v13  ;;  %v569_v56 = vadd.s32 104, %v1149_v13  ;;  %v1205_v61 = vadd.s32 %v572_v25, %v560_v43 }
  0x30   : > { %v1207_v62 = vadd.s32 %v572_v25, %v568_v44  ;;  %v1209_v63 = vadd.s32 %v572_v25, %v563_v47  ;;  %v1211_v0 = vadd.s32 %v572_v25, %v571_v48  ;;  %vm595_vm8 = vcmp.lt.s32.totalorder %v1197_v51, 200 }
  0x31   : > { %vm603_vm9 = vcmp.lt.s32.totalorder %v1199_v52, 200  ;;  %v1219_v8 = vadd.s32 %v572_v25, %v561_v55  ;;  %v1221_v9 = vadd.s32 %v572_v25, %v569_v56  ;;  %vm593_vm10 = vcmp.lt.s32.totalorder %v1205_v61, 200 }
  0x32   : > { %vm601_vm11 = vcmp.lt.s32.totalorder %v1207_v62, 200  ;;  %vm596_vm12 = vcmp.lt.s32.totalorder %v1209_v63, 200  ;;  %vm604_vm13 = vcmp.lt.s32.totalorder %v1211_v0, 200 }
  0x33   : > { %vm594_vm14 = vcmp.lt.s32.totalorder %v1219_v8, 200  ;;  %vm602_vm15 = vcmp.lt.s32.totalorder %v1221_v9, 200 }
  0x35   : > { %1016 = vmatmul.mubr.bf16.gmra.mxu0 %v365_v20 }
  0x36   : > { %1024 = vmatmul.mubr.bf16.gmra.mxu1 %v369_v21 }
  0xed   : > { %v1013_v39 = vpop.f32.mrf.mxu0 }
  0xee   : > { %v1021_v40 = vpop.f32.mrf.mxu1  ;;  %v484_v45 = vadd.f32 %v1013_v39, %v1179_v34 }
  0xef   : > { %v516_v46 = vadd.f32 %v1021_v40, %v1179_v34  ;;  %v475_v49 = vpop.f32.mrf.mxu0 }
  0xf0   : > { %v507_v50 = vpop.f32.mrf.mxu1  ;;  %v476_v53 = vadd.f32 %v1179_v34, %v475_v49  ;;  %v540_v57 = vmax.f32 %v484_v45, 0.0 }
  0xf1   : > { %v508_v54 = vadd.f32 %v1179_v34, %v507_v50  ;;  %v548_v58 = vmax.f32 %v516_v46, 0.0  ;;  %v1014_v59 = vpop.f32.mrf.mxu0 }
  0xf2   : > { %v1022_v60 = vpop.f32.mrf.mxu1  ;;  %v538_v1 = vmax.f32 %v476_v53, 0.0  ;;  %v487_v3 = vadd.f32 %v1014_v59, %v1179_v34  ;;  %v1224_v10 = vsel %vm591_vm0, %v540_v57, 0.0 }
  0xf3   : > { %v546_v2 = vmax.f32 %v508_v54, 0.0  ;;  %v519_v13 = vadd.f32 %v1022_v60, %v1179_v34  ;;  %v478_v4 = vpop.f32.mrf.mxu0  ;;  %v1227_v11 = vsel %vm599_vm1, %v548_v58, 0.0 }
  0xf4   : > { %v510_v5 = vpop.f32.mrf.mxu1  ;;  %v479_v6 = vadd.f32 %v1179_v34, %v478_v4  ;;  %v541_v12 = vmax.f32 %v487_v3, 0.0  ;;  %v1233_v21 = vsel %vm589_vm2, %v538_v1, 0.0 }
  0xf5   : > { %v511_v7 = vadd.f32 %v1179_v34, %v510_v5  ;;  %v549_v14 = vmax.f32 %v519_v13, 0.0  ;;  %v1017_v15 = vpop.f32.mrf.mxu0  ;;  %v1237_v22 = vsel %vm597_vm3, %v546_v2, 0.0 }
  0xf6   : > { %v1025_v16 = vpop.f32.mrf.mxu1  ;;  %v539_v17 = vmax.f32 %v479_v6, 0.0  ;;  %v500_v19 = vadd.f32 %v1017_v15, %v1179_v34  ;;  %v1248_v23 = vsel %vm592_vm4, %v541_v12, 0.0 }
  0xf7   : > { %v547_v18 = vmax.f32 %v511_v7, 0.0  ;;  %v532_v20 = vadd.f32 %v1025_v16, %v1179_v34  ;;  %v1252_v24 = vsel %vm600_vm5, %v549_v14, 0.0  ;;  %v491_v25 = vpop.f32.mrf.mxu0  ;;  %v933_v27 = vpack.c.bf16 %v1248_v23, %v1224_v10 }
  0xf8   : > { %v523_v26 = vpop.f32.mrf.mxu1  ;;  %v953_v28 = vpack.c.bf16 %v1252_v24, %v1227_v11  ;;  %v606_v29 = vsel %vm590_vm6, %v539_v17, 0.0  ;;  %v544_v33 = vmax.f32 %v500_v19, 0.0  ;;  %v492_v38 = vadd.f32 %v1179_v34, %v491_v25 }
  0xf9   : > { %v1260_v30 = vsel %vm598_vm7, %v547_v18, 0.0  ;;  %v928_v31 = vpack.c.bf16 %v606_v29, %v1233_v21  ;;  %v552_v35 = vmax.f32 %v532_v20, 0.0  ;;  %v1018_v36 = vpop.f32.mrf.mxu0  ;;  %972 = vst [vmem:[%s1244_s13 + $0x8] sm:$0xff] %v933_v27   ;;  %v524_v39 = vadd.f32 %v1179_v34, %v523_v26 }
  0xfa   : > { %v948_v32 = vpack.c.bf16 %v1260_v30, %v1237_v22  ;;  %v1026_v37 = vpop.f32.mrf.mxu1  ;;  %976 = vst [vmem:[%s1244_s13 + $0x28] sm:$0xff] %v953_v28   ;;  %v503_v40 = vadd.f32 %v1018_v36, %v1179_v34  ;;  %v542_v46 = vmax.f32 %v492_v38, 0.0  ;;  %v611_v50 = vsel %vm595_vm8, %v544_v33, 0.0 }
  0xfb   : > { %v535_v41 = vadd.f32 %v1026_v37, %v1179_v34  ;;  %929 = vst [vmem:[%s1244_s13] sm:$0xff] %v928_v31   ;;  %v494_v42 = vpop.f32.mrf.mxu0  ;;  %v550_v47 = vmax.f32 %v524_v39, 0.0  ;;  %v619_v53 = vsel %vm603_vm9, %v552_v35, 0.0 }
  0xfc   : > { %975 = vst [vmem:[%s1244_s13 + $0x20] sm:$0xff] %v948_v32   ;;  %v526_v43 = vpop.f32.mrf.mxu1  ;;  %v545_v44 = vmax.f32 %v503_v40, 0.0  ;;  %v495_v48 = vadd.f32 %v1179_v34, %v494_v42  ;;  %v609_v60 = vsel %vm593_vm10, %v542_v46, 0.0 }
  0xfd   : > { %v553_v45 = vmax.f32 %v535_v41, 0.0  ;;  %v527_v49 = vadd.f32 %v1179_v34, %v526_v43  ;;  %v617_v34 = vsel %vm601_vm11, %v550_v47, 0.0 }
  0xfe   : > { %v612_v54 = vsel %vm596_vm12, %v545_v44, 0.0  ;;  %v543_v58 = vmax.f32 %v495_v48, 0.0 }
  0xff   : > { %v620_v55 = vsel %vm604_vm13, %v553_v45, 0.0  ;;  %v943_v56 = vpack.c.bf16 %v612_v54, %v611_v50  ;;  %v551_v59 = vmax.f32 %v527_v49, 0.0 }
 0x100   : > { %v963_v57 = vpack.c.bf16 %v620_v55, %v619_v53  ;;  %v610_v51 = vsel %vm594_vm14, %v543_v58, 0.0  ;;  %704 = sbr.rel (%p874_p4) target bundleno = 263 (0x107), region = 44 }
 0x101   : > { %974 = vst [vmem:[%s1244_s13 + $0x18] sm:$0xff] %v943_v56   ;;  %v618_v52 = vsel %vm602_vm15, %v551_v59, 0.0  ;;  %v938_v63 = vpack.c.bf16 %v610_v51, %v609_v60 }
 0x102   : > { %978 = vst [vmem:[%s1244_s13 + $0x38] sm:$0xff] %v963_v57   ;;  %v958_v0 = vpack.c.bf16 %v618_v52, %v617_v34 }
 0x103   : > { %973 = vst [vmem:[%s1244_s13 + $0x10] sm:$0xff] %v938_v63  }
 0x104   : > { %977 = vst [vmem:[%s1244_s13 + $0x30] sm:$0xff] %v958_v0  }
 0x105   : > { %v1070_v61 = vmov 0.0  }
 0x106   : > { %705 = vst [vmem:[%s1346_s6] sm:$0x1] %v1070_v61  ;;  %706 = vst [vmem:[%s1347_s7] sm:$0x1] %v1070_v61 }
 0x107 PF: > { %v708_v62 = vadd.f32 %v606_v29, %v1233_v21  ;;  %v732_v1 = vmul.f32 %v1233_v21, %v1233_v21  ;;  %v733_v2 = vmul.f32 %v606_v29, %v606_v29  ;;  %v734_v13 = vmul.f32 %v1224_v10, %v1224_v10 }
 0x108   : > { %v735_v5 = vmul.f32 %v1248_v23, %v1248_v23  ;;  %v736_v8 = vmul.f32 %v609_v60, %v609_v60  ;;  %v737_v14 = vmul.f32 %v610_v51, %v610_v51  ;;  %v738_v17 = vmul.f32 %v611_v50, %v611_v50 }
 0x109   : > { %v709_v3 = vadd.f32 %v708_v62, %v1224_v10  ;;  %v748_v6 = vadd.f32 %v733_v2, %v732_v1  ;;  %v739_v20 = vmul.f32 %v612_v54, %v612_v54  ;;  %v740_v25 = vmul.f32 %v1237_v22, %v1237_v22 }
 0x10a   : > { %v741_v27 = vmul.f32 %v1260_v30, %v1260_v30  ;;  %v742_v31 = vmul.f32 %v1227_v11, %v1227_v11  ;;  %v743_v35 = vmul.f32 %v1252_v24, %v1252_v24  ;;  %v744_v37 = vmul.f32 %v617_v34, %v617_v34 }
 0x10b   : > { %v710_v4 = vadd.f32 %v709_v3, %v1248_v23  ;;  %v749_v9 = vadd.f32 %v748_v6, %v734_v13  ;;  %v745_v40 = vmul.f32 %v618_v52, %v618_v52  ;;  %v746_v42 = vmul.f32 %v619_v53, %v619_v53 }
 0x10c   : > { %v747_v45 = vmul.f32 %v620_v55, %v620_v55 }
 0x10d   : > { %v711_v7 = vadd.f32 %v710_v4, %v609_v60  ;;  %v750_v15 = vadd.f32 %v749_v9, %v735_v5  ;;  %v707_v59 = vld [vmem:[%s1346_s6] sm:$0x1] }
 0x10f   : > { %v712_v12 = vadd.f32 %v711_v7, %v610_v51  ;;  %v751_v18 = vadd.f32 %v750_v15, %v736_v8 }
 0x111   : > { %v713_v16 = vadd.f32 %v712_v12, %v611_v50  ;;  %v752_v21 = vadd.f32 %v751_v18, %v737_v14 }
 0x113   : > { %v714_v19 = vadd.f32 %v713_v16, %v612_v54  ;;  %v753_v26 = vadd.f32 %v752_v21, %v738_v17 }
 0x115   : > { %v715_v10 = vadd.f32 %v714_v19, %v1237_v22  ;;  %v754_v28 = vadd.f32 %v753_v26, %v739_v20 }
 0x117   : > { %v716_v23 = vadd.f32 %v715_v10, %v1260_v30  ;;  %v755_v32 = vadd.f32 %v754_v28, %v740_v25 }
 0x119   : > { %v717_v29 = vadd.f32 %v716_v23, %v1227_v11  ;;  %v756_v36 = vadd.f32 %v755_v32, %v741_v27 }
 0x11b   : > { %v718_v33 = vadd.f32 %v717_v29, %v1252_v24  ;;  %v757_v38 = vadd.f32 %v756_v36, %v742_v31 }
 0x11d   : > { %v719_v22 = vadd.f32 %v718_v33, %v617_v34  ;;  %v758_v41 = vadd.f32 %v757_v38, %v743_v35 }
 0x11f   : > { %v720_v39 = vadd.f32 %v719_v22, %v618_v52  ;;  %v759_v43 = vadd.f32 %v758_v41, %v744_v37 }
 0x121   : > { %v721_v30 = vadd.f32 %v720_v39, %v619_v53  ;;  %v760_v46 = vadd.f32 %v759_v43, %v745_v40 }
 0x123   : > { %v722_v44 = vadd.f32 %v721_v30, %v620_v55  ;;  %v761_v47 = vadd.f32 %v760_v46, %v746_v42  ;;  %v731_v55 = vld [vmem:[%s1347_s7] sm:$0x1] }
 0x125   : > { %v723_v11 = vrot.slane %v722_v44, 4  ;;  %v762_v49 = vadd.f32 %v761_v47, %v747_v45 }
 0x127   : > { %v724_v48 = vadd.f32 %v723_v11, %v722_v44  ;;  %v763_v54 = vrot.slane %v762_v49, 4 }
 0x129   : > { %v725_v50 = vrot.slane %v724_v48, 2  ;;  %v764_v56 = vadd.f32 %v763_v54, %v762_v49 }
 0x12b   : > { %v726_v24 = vadd.f32 %v725_v50, %v724_v48  ;;  %v765_v58 = vrot.slane %v764_v56, 2 }
 0x12d   : > { %v727_v57 = vrot.slane %v726_v24, 1  ;;  %v766_v53 = vadd.f32 %v765_v58, %v764_v56 }
 0x12f   : > { %v728_v60 = vadd.f32 %v727_v57, %v726_v24  ;;  %v767_v51 = vrot.slane %v766_v53, 1 }
 0x131   : > { %v729_v34 = vadd.f32 %v728_v60, %v707_v59  ;;  %v768_v52 = vadd.f32 %v767_v51, %v766_v53 }
 0x133   : > { %730 = vst [vmem:[%s1346_s6] sm:$0x1] %v729_v34  ;;  %v769_v63 = vadd.f32 %v768_v52, %v731_v55 }
 0x135   : > { %770 = vst [vmem:[%s1347_s7] sm:$0x1] %v769_v63 }
 0x136 PF: > { %s18_s24 = sadd.s32 1, %s1068_s24  }
 0x137   : > { %p15_p5 = scmp.ge.s32.totalorder %s18_s24, 4  }
 0x139   :  { %17 = sbr.rel (!%p15_p5) target bundleno = 1 (0x1), region = 90 }

// kernel: node_model_forward.5
= control target key start
LH: loop header
LB: loop body
LE: loop exit
PB: predicated region body
PF: predicated region fallthrough
CT: control target
= control target key end

     0   :  { %s1988_s15 = smov 0   ;;  %s2320_s0 = inlined_call_operand.vmem [shape: bf16[256,128], index: 0, kind: input, shape index: {}]   ;;  %s2321_s1 = inlined_call_operand.vmem [shape: bf16[256,128], index: 1, kind: input, shape index: {}]   ;;  %s2322_s2 = inlined_call_operand.vmem [shape: f32[1,128], index: 2, kind: input, shape index: {}]   ;;  %s2323_s3 = inlined_call_operand.vmem [shape: f32[1,128], index: 3, kind: input, shape index: {}]   ;;  %s2324_s4 = inlined_call_operand.vmem [shape: bf16[128,1], index: 4, kind: input, shape index: {}]   ;;  %s2325_s5 = inlined_call_operand.<no memory space> [shape: f32[1,1], index: 5, kind: input, shape index: {}]   ;;  %s2326_s6 = inlined_call_operand.vmem [shape: bf16[128,128], index: 6, kind: input, shape index: {}]   ;;  %s2327_s7 = inlined_call_operand.vmem [shape: f32[1,128], index: 7, kind: input, shape index: {}]   ;;  %s2328_s8 = inlined_call_operand.vmem [shape: bf16[256,128], index: 8, kind: output, shape index: {0}]   ;;  %s2329_s9 = inlined_call_operand.vmem [shape: f32[1,128], index: 9, kind: output, shape index: {1}]   ;;  %s2330_s10 = inlined_call_operand.vmem [shape: f32[1,128], index: 10, kind: output, shape index: {2}]  }
   0x1   :  { %v16_v0 = vstv %s2325_s5 }
   0x2   :  { %17 = vst [vmem:[#allocation2] sm:$0x1] %v16_v0 }
   0x3 LB: > { %s1994_s16 = sadd.s32 4294967295, %s1926_s15   ;;  %p1487_p0 = scmp.ge.s32.totalorder %s1926_s15, 1  ;;  %s1926_s15 = sphi %s1988_s15, %s23_s15  }
   0x4   : > { %p321_p1 = scmp.lt.s32.totalorder %s1926_s15, 3 }
   0x6   : > { %p322_p2 = pnand %p1487_p0, %p321_p1 }
   0x7   : > { %s1488_s22 = sshll.u32 (!%p322_p2), %s1994_s16, 4  ;;  %s1552_s23 = sshll.u32 (!%p322_p2), %s1994_s16, 7 }
   0x8   : > { %325 = sbr.rel (%p322_p2) target bundleno = 704 (0x2c0), region = 52  ;;  %p365_p3 = scmp.lt.s32.totalorder (!%p322_p2), %s1488_s22, 31 }
   0x9   : > { %p1569_p4 = scmp.ne.s32.totalorder (!%p322_p2), %s1994_s16, 0 }
   0xd   : > { %v1838_v1 = vld [vmem:[%s2324_s4 + $0x38] sm:$0xff]   ;;  %v1839_v2 = vld [vmem:[%s2324_s4 + $0x30] sm:$0xff]   ;;  %v1840_v3 = vld [vmem:[%s2324_s4 + $0x28] sm:$0xff]   ;;  %s2334_s22 = smov (!%p365_p3, %s1488_s22), 31  ;;  %v422_v13 = vlaneseq }
   0xe   : > { %1722 = vmatprep.subr.bf16.mxu0 %v1838_v1  ;;  %v1841_v4 = vld [vmem:[%s2324_s4 + $0x20] sm:$0xff]   ;;  %v1842_v8 = vld [vmem:[%s2324_s4 + $0x18] sm:$0xff]   ;;  %v1843_v11 = vld [vmem:[%s2324_s4 + $0x10] sm:$0xff]   ;;  %s2023_s13 = sshll.u32 %s2334_s22, 2 }
   0xf   : > { %1723 = vmatpush3.bf16.msra.mxu0 %v1838_v1  ;;  %v415_v5 = vld [vmem:[%s2322_s2] sm:$0x1]  ;;  %v2026_v15 = vshrl.u32 %v422_v13, 7  ;;  %v1844_v16 = vld [vmem:[%s2324_s4 + $0x8] sm:$0xff]   ;;  %s2035_s19 = scalar_lea.vmem %s2321_s1, %s2023_s13  ;;  %s2114_s22 = scalar_lea.vmem %s2320_s0, %s2023_s13 }
  0x10   : > { %1724 = vmatprep.subr.bf16.mxu0 %v1839_v2  ;;  %v416_v6 = vmul.f32 0.005, %v415_v5  ;;  %v417_v7 = vld [vmem:[%s2323_s3] sm:$0x1]  ;;  %v1676_v20 = vld [vmem:[%s2035_s19 + $0x8] sm:$0xff]   ;;  %v1677_v21 = vld [vmem:[%s2035_s19 + $0x10] sm:$0xff]   ;;  %s2197_s28 = scalar_lea.vmem %s2328_s8, %s2023_s13 }
  0x11   : > { %v1605_v17 = vld [vmem:[%s2035_s19] sm:$0xff]   ;;  %v424_v18 = vsub.s32 0, %v2026_v15  ;;  %v1610_v25 = vunpack.c.l.bf16 %v1676_v20  ;;  %v1611_v26 = vunpack.c.h.bf16 %v1676_v20  ;;  %v1614_v27 = vunpack.c.l.bf16 %v1677_v21  ;;  %v1678_v29 = vld [vmem:[%s2035_s19 + $0x18] sm:$0xff]   ;;  %v1680_v55 = vld [vmem:[%s2035_s19 + $0x28] sm:$0xff]  }
  0x12   : > { %v418_v9 = vmul.f32 %v416_v6, %v415_v5  ;;  %v1845_v19 = vld [vmem:[%s2324_s4] sm:$0xff]   ;;  %v1606_v22 = vunpack.c.l.bf16 %v1605_v17  ;;  %v1607_v23 = vunpack.c.h.bf16 %v1605_v17  ;;  %v1615_v28 = vunpack.c.h.bf16 %v1677_v21  ;;  %v1681_v57 = vld [vmem:[%s2035_s19 + $0x30] sm:$0xff]  }
  0x13   : > { %1725 = vmatpush3.bf16.msra.mxu0 %v1839_v2  ;;  %v2044_v24 = vrot.slane %v416_v6, %v424_v18  ;;  %v1679_v30 = vld [vmem:[%s2035_s19 + $0x20] sm:$0xff]   ;;  %v1618_v38 = vunpack.c.l.bf16 %v1678_v29  ;;  %v1619_v39 = vunpack.c.h.bf16 %v1678_v29  ;;  %v1626_v60 = vunpack.c.l.bf16 %v1680_v55  ;;  %v1850_v29 = vld [vmem:[%s2326_s6 + $0x18] sm:$0xff]  }
  0x14   : > { %1726 = vmatprep.subr.bf16.mxu0 %v1840_v3  ;;  %v419_v10 = vsub.f32 %v417_v7, %v418_v9  ;;  %v1622_v41 = vunpack.c.l.bf16 %v1679_v30  ;;  %v1623_v42 = vunpack.c.h.bf16 %v1679_v30  ;;  %v1627_v61 = vunpack.c.h.bf16 %v1680_v55  ;;  %v2082_v30 = vld [vmem:[#allocation2] ss:$0 sm:$0xff] }
  0x15   : > { %v427_v31 = vsub.f32 %v1606_v22, %v2044_v24  ;;  %v428_v32 = vsub.f32 %v1607_v23, %v2044_v24  ;;  %v429_v33 = vsub.f32 %v1610_v25, %v2044_v24  ;;  %v430_v34 = vsub.f32 %v1611_v26, %v2044_v24  ;;  %v1846_v26 = vld [vmem:[%s2326_s6 + $0x38] sm:$0xff]  }
  0x16   : > { %v420_v12 = vmul.f32 0.0050251256, %v419_v10  ;;  %v431_v36 = vsub.f32 %v1614_v27, %v2044_v24  ;;  %v432_v37 = vsub.f32 %v1615_v28, %v2044_v24  ;;  %v433_v49 = vsub.f32 %v1618_v38, %v2044_v24  ;;  %v1847_v27 = vld [vmem:[%s2326_s6 + $0x30] sm:$0xff]   ;;  %1754 = vmatprep.subr.bf16.mxu1 %v1846_v26  ;;  %v1849_v28 = vld [vmem:[%s2326_s6 + $0x20] sm:$0xff]  }
  0x17   : > { %1727 = vmatpush3.bf16.msra.mxu0 %v1840_v3  ;;  %v434_v50 = vsub.f32 %v1619_v39, %v2044_v24  ;;  %v435_v53 = vsub.f32 %v1622_v41, %v2044_v24  ;;  %v436_v54 = vsub.f32 %v1623_v42, %v2044_v24  ;;  %v1630_v0 = vunpack.c.l.bf16 %v1681_v57  ;;  %1755 = vmatpush3.bf16.msra.mxu1 %v1846_v26 }
  0x18   : > { %1728 = vmatprep.subr.bf16.mxu0 %v1841_v4  ;;  %v443_v14 = vadd.f32 1e-05, %v420_v12  ;;  %v1631_v1 = vunpack.c.h.bf16 %v1681_v57  ;;  %v437_v3 = vsub.f32 %v1626_v60, %v2044_v24  ;;  %v1928_v25 = vmov 0   ;;  %1756 = vmatprep.subr.bf16.mxu1 %v1847_v27 }
  0x19   : > { %v439_v6 = vsub.f32 %v1630_v0, %v2044_v24  ;;  %1796 = vset.pattern.permute.xlu0 %v1928_v25  ;;  %1807 = vset.pattern.permute.xlu1 %v1928_v25 }
  0x1a   : > { %1854 = vrsqrt.f32 %v443_v14  ;;  %v440_v7 = vsub.f32 %v1631_v1, %v2044_v24 }
  0x1b   : > { %1729 = vmatpush3.bf16.msra.mxu0 %v1841_v4  ;;  %v438_v4 = vsub.f32 %v1627_v61, %v2044_v24  ;;  %1757 = vmatpush3.bf16.msra.mxu1 %v1847_v27 }
  0x1c   : > { %1730 = vmatprep.subr.bf16.mxu0 %v1842_v8 }
  0x1f   : > { %1731 = vmatpush3.bf16.msra.mxu0 %v1842_v8  ;;  %v1682_v8 = vld [vmem:[%s2035_s19 + $0x38] sm:$0xff]  }
  0x20   : > { %1732 = vmatprep.subr.bf16.mxu0 %v1843_v11  ;;  %v1635_v12 = vunpack.c.h.bf16 %v1682_v8 }
  0x23   : > { %1733 = vmatpush3.bf16.msra.mxu0 %v1843_v11  ;;  %v1634_v11 = vunpack.c.l.bf16 %v1682_v8 }
  0x24   : > { %1734 = vmatprep.subr.bf16.mxu0 %v1844_v16 }
  0x27   : > { %1735 = vmatpush3.bf16.msra.mxu0 %v1844_v16  ;;  %v1855_v35 = vpop.eup %1854 }
  0x28   : > { %1736 = vmatprep.subr.bf16.mxu0 %v1845_v19  ;;  %v449_v40 = vrot.slane %v1855_v35, %v424_v18  ;;  %v441_v18 = vsub.f32 %v1634_v11, %v2044_v24 }
  0x2a   : > { %v451_v43 = vmul.f32 %v449_v40, %v427_v31  ;;  %v452_v44 = vmul.f32 %v449_v40, %v428_v32  ;;  %v453_v45 = vmul.f32 %v449_v40, %v429_v33  ;;  %v454_v46 = vmul.f32 %v449_v40, %v430_v34 }
  0x2b   : > { %1737 = vmatpush3.bf16.msra.mxu0 %v1845_v19  ;;  %v455_v47 = vmul.f32 %v449_v40, %v431_v36  ;;  %v456_v48 = vmul.f32 %v449_v40, %v432_v37  ;;  %v457_v58 = vmul.f32 %v449_v40, %v433_v49  ;;  %v458_v59 = vmul.f32 %v449_v40, %v434_v50 }
  0x2c   : > { %v467_v51 = vpack.c.bf16 %v452_v44, %v451_v43  ;;  %v468_v52 = vpack.c.bf16 %v454_v46, %v453_v45  ;;  %v459_v62 = vmul.f32 %v449_v40, %v435_v53  ;;  %v460_v63 = vmul.f32 %v449_v40, %v436_v54 }
  0x2d   : > { %v469_v56 = vpack.c.bf16 %v456_v48, %v455_v47  ;;  %v470_v2 = vpack.c.bf16 %v458_v59, %v457_v58  ;;  %v461_v9 = vmul.f32 %v449_v40, %v437_v3  ;;  %v462_v10 = vmul.f32 %v449_v40, %v438_v4 }
  0x2e   : > { %1738 = vmatprep.mubr.bf16.mxu0 %v467_v51  ;;  %v471_v5 = vpack.c.bf16 %v460_v63, %v459_v62  ;;  %v463_v14 = vmul.f32 %v449_v40, %v439_v6  ;;  %v464_v16 = vmul.f32 %v449_v40, %v440_v7  ;;  %v442_v19 = vsub.f32 %v1635_v12, %v2044_v24  ;;  %v1848_v24 = vld [vmem:[%s2326_s6 + $0x28] sm:$0xff]  }
  0x2f   : > { %1739 = vmatmul.mubr.bf16.vlgmr.msra.gmra.mxu0 %v468_v52  ;;  %v472_v17 = vpack.c.bf16 %v462_v10, %v461_v9  ;;  %v465_v21 = vmul.f32 %v449_v40, %v441_v18  ;;  %1758 = vmatprep.subr.bf16.mxu1 %v1848_v24 }
  0x30   : > { %1742 = vmatprep.mubr.bf16.mxu0 %v469_v56  ;;  %v473_v20 = vpack.c.bf16 %v464_v16, %v463_v14  ;;  %v466_v22 = vmul.f32 %v449_v40, %v442_v19  ;;  %1759 = vmatpush3.bf16.msra.mxu1 %v1848_v24 }
  0x31   : > { %1760 = vmatprep.subr.bf16.mxu1 %v1849_v28 }
  0x32   : > { %v474_v23 = vpack.c.bf16 %v466_v22, %v465_v21 }
  0x34   : > { %1761 = vmatpush3.bf16.msra.mxu1 %v1849_v28 }
  0x35   : > { %1762 = vmatprep.subr.bf16.mxu1 %v1850_v29 }
  0x37   : > { %1743 = vmatmul.mubr.bf16.gmra.mxu0 %v470_v2 }
  0x38   : > { %1746 = vmatprep.mubr.bf16.mxu0 %v471_v5  ;;  %1763 = vmatpush3.bf16.msra.mxu1 %v1850_v29 }
  0x3f   : > { %1747 = vmatmul.mubr.bf16.gmra.mxu0 %v472_v17 }
  0x40   : > { %1750 = vmatprep.mubr.bf16.mxu0 %v473_v20 }
  0x47   : > { %1751 = vmatmul.mubr.bf16.gmra.mxu0 %v474_v23 }
  0xef   : > { %v1740_v31 = vpop.f32.mrf.mxu0 }
  0xf0   : > { %v589_v32 = vadd.f32 %v1740_v31, %v2082_v30 }
  0xf1   : > { %v580_v33 = vpop.f32.mrf.mxu0 }
  0xf2   : > { %v1505_v34 = vclamps-f32 %v589_v32, 30.0  ;;  %v581_v35 = vadd.f32 %v2082_v30, %v580_v33 }
  0xf3   : > { %v1741_v36 = vpop.f32.mrf.mxu0 }
  0xf4   : > { %v1503_v37 = vclamps-f32 %v581_v35, 30.0  ;;  %v592_v38 = vadd.f32 %v1741_v36, %v2082_v30  ;;  %v677_v39 = vsub.f32 0.0, %v1505_v34 }
  0xf5   : > { %v583_v40 = vpop.f32.mrf.mxu0 }
  0xf6   : > { %v675_v41 = vsub.f32 0.0, %v1503_v37  ;;  %v1506_v42 = vclamps-f32 %v592_v38, 30.0  ;;  %v584_v43 = vadd.f32 %v2082_v30, %v583_v40  ;;  %v695_v48 = vmul.f32 1.442695, %v677_v39 }
  0xf7   : > { %v1744_v44 = vpop.f32.mrf.mxu0 }
  0xf8   : > { %v691_v45 = vmul.f32 1.442695, %v675_v41  ;;  %v678_v46 = vsub.f32 0.0, %v1506_v42  ;;  %v1504_v47 = vclamps-f32 %v584_v43, 30.0  ;;  %v605_v49 = vadd.f32 %v1744_v44, %v2082_v30 }
  0xf9   : > { %v596_v50 = vpop.f32.mrf.mxu0 }
  0xfa   : > { %1856 = vpow2.f32 %v691_v45  ;;  %v697_v51 = vmul.f32 1.442695, %v678_v46  ;;  %v676_v52 = vsub.f32 0.0, %v1504_v47  ;;  %v597_v53 = vadd.f32 %v2082_v30, %v596_v50 }
  0xfb   : > { %v1509_v54 = vclamps-f32 %v605_v49, 30.0  ;;  %v1745_v55 = vpop.f32.mrf.mxu0 }
  0xfc   : > { %1858 = vpow2.f32 %v697_v51  ;;  %v693_v56 = vmul.f32 1.442695, %v676_v52  ;;  %v1507_v57 = vclamps-f32 %v597_v53, 30.0  ;;  %v608_v58 = vadd.f32 %v1745_v55, %v2082_v30 }
  0xfd   : > { %1860 = vpow2.f32 %v695_v48  ;;  %v681_v59 = vsub.f32 0.0, %v1509_v54  ;;  %v599_v60 = vpop.f32.mrf.mxu0 }
  0xfe   : > { %1862 = vpow2.f32 %v693_v56  ;;  %v679_v61 = vsub.f32 0.0, %v1507_v57  ;;  %v1510_v62 = vclamps-f32 %v608_v58, 30.0  ;;  %v600_v63 = vadd.f32 %v2082_v30, %v599_v60 }
  0xff   : > { %v1748_v0 = vpop.f32.mrf.mxu0  ;;  %v703_v5 = vmul.f32 1.442695, %v681_v59 }
 0x100   : > { %v699_v1 = vmul.f32 1.442695, %v679_v61  ;;  %v682_v2 = vsub.f32 0.0, %v1510_v62  ;;  %v1508_v3 = vclamps-f32 %v600_v63, 30.0  ;;  %v621_v4 = vadd.f32 %v1748_v0, %v2082_v30 }
 0x101   : > { %v612_v6 = vpop.f32.mrf.mxu0 }
 0x102   : > { %1864 = vpow2.f32 %v699_v1  ;;  %v705_v7 = vmul.f32 1.442695, %v682_v2  ;;  %v680_v8 = vsub.f32 0.0, %v1508_v3  ;;  %v1513_v9 = vclamps-f32 %v621_v4, 30.0 }
 0x103   : > { %v613_v10 = vadd.f32 %v2082_v30, %v612_v6  ;;  %v1749_v11 = vpop.f32.mrf.mxu0 }
 0x104   : > { %1866 = vpow2.f32 %v705_v7  ;;  %v701_v12 = vmul.f32 1.442695, %v680_v8  ;;  %v685_v14 = vsub.f32 0.0, %v1513_v9  ;;  %v624_v16 = vadd.f32 %v1749_v11, %v2082_v30  ;;  %v1851_v8 = vld [vmem:[%s2326_s6 + $0x10] sm:$0xff]  }
 0x105   : > { %1868 = vpow2.f32 %v703_v5  ;;  %v1511_v17 = vclamps-f32 %v613_v10, 30.0  ;;  %v615_v18 = vpop.f32.mrf.mxu0  ;;  %1764 = vmatprep.subr.bf16.mxu1 %v1851_v8 }
 0x106   : > { %1870 = vpow2.f32 %v701_v12  ;;  %v711_v19 = vmul.f32 1.442695, %v685_v14  ;;  %v1514_v20 = vclamps-f32 %v624_v16, 30.0  ;;  %v616_v23 = vadd.f32 %v2082_v30, %v615_v18  ;;  %1765 = vmatpush3.bf16.msra.mxu1 %v1851_v8 }
 0x107   : > { %v1857_v21 = vpop.eup %1856  ;;  %v683_v22 = vsub.f32 0.0, %v1511_v17  ;;  %v1752_v25 = vpop.f32.mrf.mxu0  ;;  %v1852_v17 = vld [vmem:[%s2326_s6 + $0x8] sm:$0xff]  }
 0x108   : > { %v723_v26 = vadd.f32 1.0, %v1857_v21  ;;  %v686_v27 = vsub.f32 0.0, %v1514_v20  ;;  %v637_v24 = vadd.f32 %v1752_v25, %v2082_v30  ;;  %1872 = vpow2.f32 %v711_v19  ;;  %1766 = vmatprep.subr.bf16.mxu1 %v1852_v17 }
 0x109   : > { %v1859_v28 = vpop.eup %1858  ;;  %v707_v29 = vmul.f32 1.442695, %v683_v22  ;;  %v1512_v31 = vclamps-f32 %v616_v23, 30.0  ;;  %v628_v32 = vpop.f32.mrf.mxu0 }
 0x10a   : > { %v1861_v33 = vpop.eup %1860  ;;  %1874 = vrcp.f32 %v723_v26  ;;  %v726_v34 = vadd.f32 1.0, %v1859_v28  ;;  %v713_v35 = vmul.f32 1.442695, %v686_v27  ;;  %v1517_v36 = vclamps-f32 %v637_v24, 30.0  ;;  %1767 = vmatpush3.bf16.msra.mxu1 %v1852_v17  ;;  %v1853_v26 = vld [vmem:[%s2326_s6] sm:$0xff]  }
 0x10b   : > { %v1863_v37 = vpop.eup %1862  ;;  %1876 = vpow2.f32 %v707_v29  ;;  %v684_v38 = vsub.f32 0.0, %v1512_v31  ;;  %v629_v39 = vadd.f32 %v2082_v30, %v628_v32  ;;  %v1753_v40 = vpop.f32.mrf.mxu0  ;;  %v725_v44 = vadd.f32 1.0, %v1861_v33  ;;  %1768 = vmatprep.subr.bf16.mxu1 %v1853_v26 }
 0x10c   : > { %1878 = vrcp.f32 %v726_v34  ;;  %v724_v41 = vadd.f32 1.0, %v1863_v37  ;;  %v689_v42 = vsub.f32 0.0, %v1517_v36  ;;  %v640_v43 = vadd.f32 %v1753_v40, %v2082_v30 }
 0x10d   : > { %1880 = vpow2.f32 %v713_v35  ;;  %v709_v45 = vmul.f32 1.442695, %v684_v38  ;;  %v1515_v46 = vclamps-f32 %v629_v39, 30.0  ;;  %v631_v47 = vpop.f32.mrf.mxu0 }
 0x10e   : > { %1882 = vrcp.f32 %v724_v41  ;;  %v719_v48 = vmul.f32 1.442695, %v689_v42  ;;  %v1518_v49 = vclamps-f32 %v640_v43, 30.0  ;;  %v632_v50 = vadd.f32 %v2082_v30, %v631_v47  ;;  %1769 = vmatpush3.bf16.msra.mxu1 %v1853_v26  ;;  %v872_v26 = vld [vmem:[%s2114_s22 + $0x18] sm:$0xf] }
 0x10f   : > { %v1865_v51 = vpop.eup %1864  ;;  %1884 = vpow2.f32 %v709_v45  ;;  %v687_v52 = vsub.f32 0.0, %v1515_v46  ;;  %v756_v47 = vand.u32 127, %v422_v13 }
 0x110   : > { %v727_v53 = vadd.f32 1.0, %v1865_v51  ;;  %1886 = vpow2.f32 %v719_v48  ;;  %v690_v54 = vsub.f32 0.0, %v1518_v49  ;;  %v1516_v55 = vclamps-f32 %v632_v50, 30.0  ;;  %v2172_v48 = vld [vmem:[%s2327_s7] ss:$0 sm:$0xff] }
 0x111   : > { %v1867_v56 = vpop.eup %1866  ;;  %v715_v57 = vmul.f32 1.442695, %v687_v52  ;;  %1888 = vrcp.f32 %v725_v44  ;;  %vm757_vm0 = vcmp.ge.s32.totalorder %v756_v47, 32  ;;  %vm758_vm1 = vcmp.lt.s32.totalorder %v756_v47, 64 }
 0x112   : > { %v1869_v58 = vpop.eup %1868  ;;  %v721_v59 = vmul.f32 1.442695, %v690_v54  ;;  %v688_v60 = vsub.f32 0.0, %v1516_v55  ;;  %v730_v62 = vadd.f32 1.0, %v1867_v56  ;;  %vm2116_vm2 = vmand %vm757_vm0, %vm758_vm1  ;;  %v867_v54 = vld [vmem:[%s2114_s22 + $0x4] sm:$0xf] }
 0x113   : > { %v1871_v61 = vpop.eup %1870  ;;  %1890 = vpow2.f32 %v715_v57  ;;  %v729_v1 = vadd.f32 1.0, %v1869_v58 }
 0x114   : > { %1892 = vrcp.f32 %v727_v53  ;;  %v728_v63 = vadd.f32 1.0, %v1871_v61  ;;  %v717_v0 = vmul.f32 1.442695, %v688_v60  ;;  %v866_v53 = vld [vmem:[%s2114_s22] sm:$0xf] }
 0x115   : > { %1894 = vpow2.f32 %v721_v59  ;;  %v1873_v30 = vpop.eup %1872 }
 0x116   : > { %1896 = vrcp.f32 %v728_v63  ;;  %v733_v4 = vadd.f32 1.0, %v1873_v30  ;;  %v869_v30 = vld [vmem:[%s2114_s22 + $0xc] sm:$0xf] }
 0x117   : > { %v1875_v2 = vpop.eup %1874  ;;  %1898 = vpow2.f32 %v717_v0  ;;  %v868_v0 = vld [vmem:[%s2114_s22 + $0x8] sm:$0xf] }
 0x118   : > { %v1877_v3 = vpop.eup %1876  ;;  %1900 = vrcp.f32 %v730_v62 }
 0x119   : > { %v1879_v5 = vpop.eup %1878  ;;  %1902 = vrcp.f32 %v729_v1  ;;  %v731_v7 = vadd.f32 1.0, %v1877_v3 }
 0x11a   : > { %v1881_v6 = vpop.eup %1880  ;;  %1904 = vrcp.f32 %v733_v4 }
 0x11b   : > { %v1883_v9 = vpop.eup %1882  ;;  %v734_v10 = vadd.f32 1.0, %v1881_v6 }
 0x11c   : > { %v1885_v11 = vpop.eup %1884  ;;  %v1797_v12 = vpack.i.bf16 %v1883_v9, %v1875_v2 }
 0x11d   : > { %v1887_v14 = vpop.eup %1886  ;;  %1906 = vrcp.f32 %v734_v10  ;;  %v732_v16 = vadd.f32 1.0, %v1885_v11  ;;  %v870_v11 = vld [vmem:[%s2114_s22 + $0x10] sm:$0xf] }
 0x11e   : > { %1908 = vrcp.f32 %v731_v7  ;;  %1798 = vperm.xlu0 %1796, %v1797_v12   ;;  %v1889_v18 = vpop.eup %1888  ;;  %v737_v19 = vadd.f32 1.0, %v1887_v14  ;;  %v871_v12 = vld [vmem:[%s2114_s22 + $0x14] sm:$0xf] }
 0x11f   : > { %1910 = vrcp.f32 %v732_v16  ;;  %v1802_v21 = vpack.i.bf16 %v1879_v5, %v1889_v18 }
 0x120   : > { %v1891_v20 = vpop.eup %1890  ;;  %1912 = vrcp.f32 %v737_v19 }
 0x121   : > { %v1893_v22 = vpop.eup %1892  ;;  %v735_v25 = vadd.f32 1.0, %v1891_v20 }
 0x122   : > { %v1895_v23 = vpop.eup %1894  ;;  %1803 = vperm.xlu0 %1796, %v1802_v21  }
 0x123   : > { %v1897_v27 = vpop.eup %1896  ;;  %v738_v24 = vadd.f32 1.0, %v1895_v23 }
 0x124   : > { %v1899_v28 = vpop.eup %1898  ;;  %v1808_v29 = vpack.i.bf16 %v1897_v27, %v1893_v22  ;;  %v873_v27 = vld [vmem:[%s2114_s22 + $0x1c] sm:$0xf] }
 0x125   : > { %v1901_v31 = vpop.eup %1900  ;;  %1914 = vrcp.f32 %v738_v24  ;;  %v736_v32 = vadd.f32 1.0, %v1899_v28 }
 0x126   : > { %1916 = vrcp.f32 %v735_v25  ;;  %1809 = vperm.xlu1 %1807, %v1808_v29   ;;  %v1903_v33 = vpop.eup %1902 }
 0x127   : > { %1918 = vrcp.f32 %v736_v32  ;;  %v1813_v34 = vpack.i.bf16 %v1901_v31, %v1903_v33  ;;  %v1905_v35 = vpop.eup %1904 }
 0x12a   : > { %v1907_v36 = vpop.eup %1906  ;;  %1814 = vperm.xlu1 %1807, %v1813_v34  }
 0x12b   : > { %v1909_v37 = vpop.eup %1908  ;;  %v1823_v39 = vpack.i.bf16 %v1907_v36, %v1905_v35 }
 0x12c   : > { %v1911_v38 = vpop.eup %1910 }
 0x12d   : > { %v1818_v40 = vpack.i.bf16 %v1911_v38, %v1909_v37  ;;  %v1913_v41 = vpop.eup %1912 }
 0x12e   : > { %1824 = vperm.xlu1 %1807, %v1823_v39  }
 0x12f   : > { %1819 = vperm.xlu0 %1796, %v1818_v40  }
 0x132   : > { %v1915_v42 = vpop.eup %1914 }
 0x133   : > { %v1917_v43 = vpop.eup %1916  ;;  %v1833_v44 = vpack.i.bf16 %v1915_v42, %v1913_v41 }
 0x134   : > { %v1919_v45 = vpop.eup %1918 }
 0x135   : > { %1834 = vperm.xlu1 %1807, %v1833_v44   ;;  %v1828_v46 = vpack.i.bf16 %v1919_v45, %v1917_v43  ;;  %v874_v45 = vld [vmem:[%s2114_s22 + $0x20] sm:$0xf] }
 0x137   : > { %1829 = vperm.xlu0 %1796, %v1828_v46   ;;  %v875_v46 = vld [vmem:[%s2114_s22 + $0x24] sm:$0xf] }
 0x199   : > { %v1799_v49 = vpop.permute.xlu0 %1798 }
 0x19a   : > { %v1801_v50 = vunpack.i.h.bf16 %v1799_v49  ;;  %v1800_v51 = vunpack.i.l.bf16 %v1799_v49 }
 0x19c   : > { %v843_v13 = vsel %vm2116_vm2, %v1801_v50, 1.0  ;;  %v842_v52 = vsel %vm2116_vm2, %v1800_v51, 1.0  ;;  %v876_v51 = vld [vmem:[%s2114_s22 + $0x28] sm:$0xf] }
 0x19d   : > { %v1804_v55 = vpop.permute.xlu0 %1803  ;;  %v1572_v56 = vpack.c.bf16 %v842_v52, %v842_v52  ;;  %v1573_v57 = vpack.c.bf16 %v843_v13, %v843_v13  ;;  %v877_v13 = vld [vmem:[%s2114_s22 + $0x2c] sm:$0xf] }
 0x19e   : > { %v1806_v58 = vunpack.i.h.bf16 %v1804_v55  ;;  %v1805_v59 = vunpack.i.l.bf16 %v1804_v55 }
 0x19f   : > { %v938_v60 = vmul.bf16 %v1572_v56, %v866_v53  ;;  %v939_v61 = vmul.bf16 %v1573_v57, %v867_v54 }
 0x1a0   : > { %v845_v62 = vsel %vm2116_vm2, %v1806_v58, 1.0  ;;  %v844_v63 = vsel %vm2116_vm2, %v1805_v59, 1.0 }
 0x1a1   : > { %v1575_v1 = vpack.c.bf16 %v845_v62, %v845_v62  ;;  %v1574_v2 = vpack.c.bf16 %v844_v63, %v844_v63  ;;  %v1810_v3 = vpop.permute.xlu1 %1809  ;;  %v1536_v4 = vcombine.low %v938_v60, %v939_v61 }
 0x1a2   : > { %v1812_v5 = vunpack.i.h.bf16 %v1810_v3  ;;  %v1811_v6 = vunpack.i.l.bf16 %v1810_v3  ;;  %v879_v3 = vld [vmem:[%s2114_s22 + $0x34] sm:$0xf] }
 0x1a3   : > { %1770 = vmatprep.mubr.bf16.mxu1 %v1536_v4  ;;  %v940_v7 = vmul.bf16 %v1574_v2, %v868_v0  ;;  %v941_v8 = vmul.bf16 %v1575_v1, %v869_v30  ;;  %v878_v2 = vld [vmem:[%s2114_s22 + $0x30] sm:$0xf] }
 0x1a4   : > { %v847_v9 = vsel %vm2116_vm2, %v1812_v5, 1.0  ;;  %v846_v10 = vsel %vm2116_vm2, %v1811_v6, 1.0 }
 0x1a5   : > { %v1577_v14 = vpack.c.bf16 %v847_v9, %v847_v9  ;;  %v1576_v16 = vpack.c.bf16 %v846_v10, %v846_v10  ;;  %v1815_v17 = vpop.permute.xlu1 %1814  ;;  %v1537_v18 = vcombine.low %v940_v7, %v941_v8  ;;  %v880_v9 = vld [vmem:[%s2114_s22 + $0x38] sm:$0xf]  ;;  %v881_v10 = vld [vmem:[%s2114_s22 + $0x3c] sm:$0xf] }
 0x1a6   : > { %v1817_v19 = vunpack.i.h.bf16 %v1815_v17  ;;  %v1816_v20 = vunpack.i.l.bf16 %v1815_v17 }
 0x1a7   : > { %1771 = vmatmul.mubr.bf16.vlgmr.msra.gmra.mxu1 %v1537_v18  ;;  %v942_v21 = vmul.bf16 %v1576_v16, %v870_v11  ;;  %v943_v22 = vmul.bf16 %v1577_v14, %v871_v12 }
 0x1a8   : > { %v849_v23 = vsel %vm2116_vm2, %v1817_v19, 1.0  ;;  %v848_v25 = vsel %vm2116_vm2, %v1816_v20, 1.0  ;;  %v1190_v19 = vadd.s32 16, %v2026_v15  ;;  %v1191_v20 = vadd.s32 24, %v2026_v15 }
 0x1a9   : > { %v1579_v24 = vpack.c.bf16 %v849_v23, %v849_v23  ;;  %v1578_v28 = vpack.c.bf16 %v848_v25, %v848_v25  ;;  %v1825_v29 = vpop.permute.xlu1 %1824  ;;  %v1538_v31 = vcombine.low %v942_v21, %v943_v22  ;;  %v2176_v21 = vstv %s1552_s23 }
 0x1aa   : > { %v1827_v32 = vunpack.i.h.bf16 %v1825_v29  ;;  %v1826_v33 = vunpack.i.l.bf16 %v1825_v29  ;;  %v1820_v34 = vpop.permute.xlu0 %1819  ;;  %v1189_v23 = vadd.s32 8, %v2026_v15  ;;  %v1205_v29 = vadd.s32 %v2176_v21, %v2026_v15 }
 0x1ab   : > { %v1822_v35 = vunpack.i.h.bf16 %v1820_v34  ;;  %v1821_v36 = vunpack.i.l.bf16 %v1820_v34  ;;  %1774 = vmatprep.mubr.bf16.mxu1 %v1538_v31  ;;  %v944_v37 = vmul.bf16 %v1578_v28, %v872_v26  ;;  %v945_v38 = vmul.bf16 %v1579_v24, %v873_v27 }
 0x1ac   : > { %v853_v39 = vsel %vm2116_vm2, %v1827_v32, 1.0  ;;  %v852_v40 = vsel %vm2116_vm2, %v1826_v33, 1.0  ;;  %v1207_v26 = vadd.s32 %v2176_v21, %v1190_v19  ;;  %v1208_v24 = vadd.s32 %v2176_v21, %v1191_v20 }
 0x1ad   : > { %v1583_v41 = vpack.c.bf16 %v853_v39, %v853_v39  ;;  %v1582_v42 = vpack.c.bf16 %v852_v40, %v852_v40  ;;  %v851_v43 = vsel %vm2116_vm2, %v1822_v35, 1.0  ;;  %v850_v44 = vsel %vm2116_vm2, %v1821_v36, 1.0 }
 0x1ae   : > { %v1581_v47 = vpack.c.bf16 %v851_v43, %v851_v43  ;;  %v1580_v49 = vpack.c.bf16 %v850_v44, %v850_v44  ;;  %v1539_v50 = vcombine.low %v944_v37, %v945_v38  ;;  %v1206_v32 = vadd.s32 %v2176_v21, %v1189_v23 }
 0x1af   : > { %v948_v57 = vmul.bf16 %v1582_v42, %v876_v51  ;;  %v949_v58 = vmul.bf16 %v1583_v41, %v877_v13  ;;  %vm1223_vm3 = vcmp.lt.s32.totalorder %v1207_v26, 200  ;;  %vm1224_vm4 = vcmp.lt.s32.totalorder %v1208_v24, 200 }
 0x1b0   : > { %v1835_v52 = vpop.permute.xlu1 %1834  ;;  %1775 = vmatmul.mubr.bf16.gmra.mxu1 %v1539_v50  ;;  %v946_v53 = vmul.bf16 %v1580_v49, %v874_v45  ;;  %v947_v54 = vmul.bf16 %v1581_v47, %v875_v46  ;;  %v1194_v36 = vadd.s32 48, %v2026_v15  ;;  %v1195_v40 = vadd.s32 56, %v2026_v15 }
 0x1b1   : > { %v1837_v55 = vunpack.i.h.bf16 %v1835_v52  ;;  %v1836_v56 = vunpack.i.l.bf16 %v1835_v52  ;;  %v1541_v4 = vcombine.low %v948_v57, %v949_v58  ;;  %vm1221_vm5 = vcmp.lt.s32.totalorder %v1205_v29, 200 }
 0x1b2   : > { %v1830_v59 = vpop.permute.xlu0 %1829  ;;  %v1540_v60 = vcombine.low %v946_v53, %v947_v54  ;;  %vm1222_vm6 = vcmp.lt.s32.totalorder %v1206_v32, 200  ;;  %v1192_v41 = vadd.s32 32, %v2026_v15  ;;  %v1193_v46 = vadd.s32 40, %v2026_v15 }
 0x1b3   : > { %v857_v61 = vsel %vm2116_vm2, %v1837_v55, 1.0  ;;  %v856_v62 = vsel %vm2116_vm2, %v1836_v56, 1.0  ;;  %v1832_v63 = vunpack.i.h.bf16 %v1830_v59  ;;  %v1831_v0 = vunpack.i.l.bf16 %v1830_v59 }
 0x1b4   : > { %1778 = vmatprep.mubr.bf16.mxu1 %v1540_v60  ;;  %v1587_v5 = vpack.c.bf16 %v857_v61, %v857_v61  ;;  %v1586_v6 = vpack.c.bf16 %v856_v62, %v856_v62  ;;  %v1211_v13 = vadd.s32 %v2176_v21, %v1194_v36  ;;  %v1212_v53 = vadd.s32 %v2176_v21, %v1195_v40 }
 0x1b5   : > { %v855_v30 = vsel %vm2116_vm2, %v1832_v63, 1.0  ;;  %v854_v1 = vsel %vm2116_vm2, %v1831_v0, 1.0  ;;  %v1209_v56 = vadd.s32 %v2176_v21, %v1192_v41  ;;  %v1210_v58 = vadd.s32 %v2176_v21, %v1193_v46 }
 0x1b6   : > { %v1585_v7 = vpack.c.bf16 %v855_v30, %v855_v30  ;;  %v1584_v8 = vpack.c.bf16 %v854_v1, %v854_v1  ;;  %v952_v14 = vmul.bf16 %v1586_v6, %v880_v9  ;;  %v953_v16 = vmul.bf16 %v1587_v5, %v881_v10 }
 0x1b7   : > { %vm1227_vm7 = vcmp.lt.s32.totalorder %v1211_v13, 200  ;;  %vm1228_vm8 = vcmp.lt.s32.totalorder %v1212_v53, 200  ;;  %v1198_v62 = vadd.s32 80, %v2026_v15  ;;  %v1199_v63 = vadd.s32 88, %v2026_v15 }
 0x1b8   : > { %v950_v11 = vmul.bf16 %v1584_v8, %v878_v2  ;;  %v951_v12 = vmul.bf16 %v1585_v7, %v879_v3  ;;  %1779 = vmatmul.mubr.bf16.gmra.mxu1 %v1541_v4  ;;  %v1543_v18 = vcombine.low %v952_v14, %v953_v16  ;;  %vm1225_vm9 = vcmp.lt.s32.totalorder %v1209_v56, 200 }
 0x1b9   : > { %vm1226_vm10 = vcmp.lt.s32.totalorder %v1210_v58, 200  ;;  %v1196_v3 = vadd.s32 64, %v2026_v15  ;;  %v1197_v4 = vadd.s32 72, %v2026_v15  ;;  %v1215_v10 = vadd.s32 %v2176_v21, %v1198_v62 }
 0x1ba   : > { %v1542_v17 = vcombine.low %v950_v11, %v951_v12  ;;  %v1216_v12 = vadd.s32 %v2176_v21, %v1199_v63  ;;  %v1203_v24 = vadd.s32 120, %v2026_v15 }
 0x1bb   : > { %v1213_v19 = vadd.s32 %v2176_v21, %v1196_v3  ;;  %vm1231_vm11 = vcmp.lt.s32.totalorder %v1215_v10, 200 }
 0x1bc   : > { %1782 = vmatprep.mubr.bf16.mxu1 %v1542_v17  ;;  %vm1232_vm12 = vcmp.lt.s32.totalorder %v1216_v12, 200 }
 0x1bd   : > { %vm1229_vm13 = vcmp.lt.s32.totalorder %v1213_v19, 200 }
 0x1c0   : > { %1783 = vmatmul.mubr.bf16.gmra.mxu1 %v1543_v18 }
 0x267   : > { %v1772_v22 = vpop.f32.mrf.mxu1 }
 0x268   : > { %v1116_v25 = vadd.f32 %v1772_v22, %v2172_v48  ;;  %v1214_v22 = vadd.s32 %v2176_v21, %v1197_v4 }
 0x269   : > { %v1107_v27 = vpop.f32.mrf.mxu1 }
 0x26a   : > { %v1108_v28 = vadd.f32 %v2172_v48, %v1107_v27  ;;  %v1172_v33 = vmax.f32 %v1116_v25, 0.0  ;;  %v1202_v27 = vadd.s32 112, %v2026_v15  ;;  %vm1230_vm14 = vcmp.lt.s32.totalorder %v1214_v22, 200 }
 0x26b   : > { %v1773_v31 = vpop.f32.mrf.mxu1 }
 0x26c   : > { %v1119_v34 = vadd.f32 %v1773_v31, %v2172_v48  ;;  %v1170_v37 = vmax.f32 %v1108_v28, 0.0  ;;  %v2191_v42 = vsel %vm1223_vm3, %v1172_v33, 0.0  ;;  %v1200_v33 = vadd.s32 96, %v2026_v15 }
 0x26d   : > { %v1110_v35 = vpop.f32.mrf.mxu1  ;;  %v1219_v40 = vadd.s32 %v2176_v21, %v1202_v27 }
 0x26e   : > { %v1173_v38 = vmax.f32 %v1119_v34, 0.0  ;;  %v1111_v39 = vadd.f32 %v2172_v48, %v1110_v35  ;;  %v2205_v50 = vsel %vm1221_vm5, %v1170_v37, 0.0  ;;  %v1201_v34 = vadd.s32 104, %v2026_v15 }
 0x26f   : > { %vm1235_vm15 = vcmp.lt.s32.totalorder %v1219_v40, 200 }
 0x270   : > { %v2199_v43 = vsel %vm1224_vm4, %v1173_v38, 0.0  ;;  %v1171_v44 = vmax.f32 %v1111_v39, 0.0  ;;  %v1776_v45 = vpop.f32.mrf.mxu1 }
 0x271   : > { %v1644_v47 = vpack.c.bf16 %v2199_v43, %v2191_v42  ;;  %v1132_v49 = vadd.f32 %v1776_v45, %v2172_v48 }
 0x272   : > { %v2207_v51 = vsel %vm1222_vm6, %v1171_v44, 0.0  ;;  %v1123_v52 = vpop.f32.mrf.mxu1  ;;  %v1220_v44 = vadd.s32 %v2176_v21, %v1203_v24 }
 0x273   : > { %1683 = vst [vmem:[%s2197_s28 + $0x8] sm:$0xff] %v1644_v47   ;;  %v1639_v54 = vpack.c.bf16 %v2207_v51, %v2205_v50  ;;  %v1124_v55 = vadd.f32 %v2172_v48, %v1123_v52  ;;  %v1176_v59 = vmax.f32 %v1132_v49, 0.0  ;;  %v1217_v49 = vadd.s32 %v2176_v21, %v1200_v33 }
 0x274   : > { %v1777_v57 = vpop.f32.mrf.mxu1  ;;  %v1218_v52 = vadd.s32 %v2176_v21, %v1201_v34  ;;  %vm1236_vm0 = vcmp.lt.s32.totalorder %v1220_v44, 200 }
 0x275   : > { %1640 = vst [vmem:[%s2197_s28] sm:$0xff] %v1639_v54   ;;  %v1135_v60 = vadd.f32 %v1777_v57, %v2172_v48  ;;  %v1174_v0 = vmax.f32 %v1124_v55, 0.0  ;;  %v2224_v5 = vsel %vm1227_vm7, %v1176_v59, 0.0  ;;  %vm1233_vm1 = vcmp.lt.s32.totalorder %v1217_v49, 200 }
 0x276   : > { %v1126_v61 = vpop.f32.mrf.mxu1  ;;  %vm1234_vm2 = vcmp.lt.s32.totalorder %v1218_v52, 200 }
 0x277   : > { %v1177_v30 = vmax.f32 %v1135_v60, 0.0  ;;  %v1127_v1 = vadd.f32 %v2172_v48, %v1126_v61  ;;  %v2233_v14 = vsel %vm1225_vm9, %v1174_v0, 0.0 }
 0x278   : > { %v1780_v2 = vpop.f32.mrf.mxu1 }
 0x279   : > { %v2226_v6 = vsel %vm1228_vm8, %v1177_v30, 0.0  ;;  %v1175_v7 = vmax.f32 %v1127_v1, 0.0  ;;  %v1148_v8 = vadd.f32 %v1780_v2, %v2172_v48 }
 0x27a   : > { %v1654_v9 = vpack.c.bf16 %v2226_v6, %v2224_v5  ;;  %v1139_v11 = vpop.f32.mrf.mxu1 }
 0x27b   : > { %v2235_v16 = vsel %vm1226_vm10, %v1175_v7, 0.0  ;;  %v1140_v17 = vadd.f32 %v2172_v48, %v1139_v11  ;;  %v1180_v23 = vmax.f32 %v1148_v8, 0.0 }
 0x27c   : > { %1685 = vst [vmem:[%s2197_s28 + $0x18] sm:$0xff] %v1654_v9   ;;  %v1649_v18 = vpack.c.bf16 %v2235_v16, %v2233_v14  ;;  %v1781_v20 = vpop.f32.mrf.mxu1 }
 0x27d   : > { %v1151_v25 = vadd.f32 %v1781_v20, %v2172_v48  ;;  %v1178_v28 = vmax.f32 %v1140_v17, 0.0  ;;  %v2250_v35 = vsel %vm1231_vm11, %v1180_v23, 0.0 }
 0x27e   : > { %1684 = vst [vmem:[%s2197_s28 + $0x10] sm:$0xff] %v1649_v18   ;;  %v1142_v26 = vpop.f32.mrf.mxu1 }
 0x27f   : > { %v1181_v29 = vmax.f32 %v1151_v25, 0.0  ;;  %v1143_v31 = vadd.f32 %v2172_v48, %v1142_v26  ;;  %v1245_v45 = vsel %vm1229_vm13, %v1178_v28, 0.0 }
 0x280   : > { %v1784_v32 = vpop.f32.mrf.mxu1 }
 0x281   : > { %v2252_v36 = vsel %vm1232_vm12, %v1181_v29, 0.0  ;;  %v1179_v37 = vmax.f32 %v1143_v31, 0.0  ;;  %v1164_v38 = vadd.f32 %v1784_v32, %v2172_v48 }
 0x282   : > { %v1664_v39 = vpack.c.bf16 %v2252_v36, %v2250_v35  ;;  %v1155_v41 = vpop.f32.mrf.mxu1 }
 0x283   : > { %v1246_v46 = vsel %vm1230_vm14, %v1179_v37, 0.0  ;;  %v1156_v15 = vadd.f32 %v2172_v48, %v1155_v41  ;;  %v1184_v53 = vmax.f32 %v1164_v38, 0.0 }
 0x284   : > { %1687 = vst [vmem:[%s2197_s28 + $0x28] sm:$0xff] %v1664_v39   ;;  %v1659_v47 = vpack.c.bf16 %v1246_v46, %v1245_v45  ;;  %v1785_v13 = vpop.f32.mrf.mxu1 }
 0x285   : > { %v1167_v54 = vadd.f32 %v1785_v13, %v2172_v48  ;;  %v1182_v56 = vmax.f32 %v1156_v15, 0.0  ;;  %v1251_v59 = vsel %vm1235_vm15, %v1184_v53, 0.0 }
 0x286   : > { %1686 = vst [vmem:[%s2197_s28 + $0x20] sm:$0xff] %v1659_v47   ;;  %v1158_v55 = vpop.f32.mrf.mxu1 }
 0x287   : > { %v1185_v57 = vmax.f32 %v1167_v54, 0.0  ;;  %v1159_v58 = vadd.f32 %v2172_v48, %v1158_v55  ;;  %v1249_v21 = vsel %vm1233_vm1, %v1182_v56, 0.0 }
 0x289   : > { %v1252_v60 = vsel %vm1236_vm0, %v1185_v57, 0.0  ;;  %v1183_v61 = vmax.f32 %v1159_v58, 0.0 }
 0x28a   : > { %v1674_v62 = vpack.c.bf16 %v1252_v60, %v1251_v59  ;;  %1336 = sbr.rel (%p1569_p4) target bundleno = 657 (0x291), region = 56 }
 0x28b   : > { %v1250_v63 = vsel %vm1234_vm2, %v1183_v61, 0.0 }
 0x28c   : > { %1689 = vst [vmem:[%s2197_s28 + $0x38] sm:$0xff] %v1674_v62   ;;  %v1669_v0 = vpack.c.bf16 %v1250_v63, %v1249_v21 }
 0x28e   : > { %1688 = vst [vmem:[%s2197_s28 + $0x30] sm:$0xff] %v1669_v0  }
 0x28f   : > { %v1929_v30 = vmov 0.0  }
 0x290   : > { %1337 = vst [vmem:[%s2329_s9] sm:$0x1] %v1929_v30  ;;  %1338 = vst [vmem:[%s2330_s10] sm:$0x1] %v1929_v30 }
 0x291 PF: > { %v1340_v48 = vadd.f32 %v2207_v51, %v2205_v50  ;;  %v1364_v1 = vmul.f32 %v2205_v50, %v2205_v50  ;;  %v1365_v2 = vmul.f32 %v2207_v51, %v2207_v51  ;;  %v1366_v4 = vmul.f32 %v2191_v42, %v2191_v42 }
 0x292   : > { %v1367_v8 = vmul.f32 %v2199_v43, %v2199_v43  ;;  %v1368_v11 = vmul.f32 %v2233_v14, %v2233_v14  ;;  %v1369_v51 = vmul.f32 %v2235_v16, %v2235_v16  ;;  %v1370_v18 = vmul.f32 %v2224_v5, %v2224_v5 }
 0x293   : > { %v1341_v3 = vadd.f32 %v1340_v48, %v2191_v42  ;;  %v1380_v9 = vadd.f32 %v1365_v2, %v1364_v1  ;;  %v1371_v20 = vmul.f32 %v2226_v6, %v2226_v6  ;;  %v1372_v23 = vmul.f32 %v1245_v45, %v1245_v45 }
 0x294   : > { %v1373_v27 = vmul.f32 %v1246_v46, %v1246_v46  ;;  %v1374_v28 = vmul.f32 %v2250_v35, %v2250_v35  ;;  %v1375_v31 = vmul.f32 %v2252_v36, %v2252_v36  ;;  %v1376_v33 = vmul.f32 %v1249_v21, %v1249_v21 }
 0x295   : > { %v1342_v7 = vadd.f32 %v1341_v3, %v2199_v43  ;;  %v1381_v50 = vadd.f32 %v1380_v9, %v1366_v4  ;;  %v1377_v38 = vmul.f32 %v1250_v63, %v1250_v63  ;;  %v1378_v41 = vmul.f32 %v1251_v59, %v1251_v59 }
 0x297   : > { %v1343_v10 = vadd.f32 %v1342_v7, %v2233_v14  ;;  %v1382_v17 = vadd.f32 %v1381_v50, %v1367_v8  ;;  %v1339_v57 = vld [vmem:[%s2329_s9] sm:$0x1] }
 0x299   : > { %v1344_v12 = vadd.f32 %v1343_v10, %v2235_v16  ;;  %v1383_v19 = vadd.f32 %v1382_v17, %v1368_v11 }
 0x29b   : > { %v1345_v42 = vadd.f32 %v1344_v12, %v2224_v5  ;;  %v1384_v22 = vadd.f32 %v1383_v19, %v1369_v51 }
 0x29d   : > { %v1346_v43 = vadd.f32 %v1345_v42, %v2226_v6  ;;  %v1385_v25 = vadd.f32 %v1384_v22, %v1370_v18 }
 0x29f   : > { %v1347_v14 = vadd.f32 %v1346_v43, %v1245_v45  ;;  %v1386_v24 = vadd.f32 %v1385_v25, %v1371_v20 }
 0x2a1   : > { %v1348_v26 = vadd.f32 %v1347_v14, %v1246_v46  ;;  %v1387_v29 = vadd.f32 %v1386_v24, %v1372_v23  ;;  %v1379_v46 = vmul.f32 %v1252_v60, %v1252_v60 }
 0x2a3   : > { %v1349_v16 = vadd.f32 %v1348_v26, %v2250_v35  ;;  %v1388_v32 = vadd.f32 %v1387_v29, %v1373_v27 }
 0x2a5   : > { %v1350_v5 = vadd.f32 %v1349_v16, %v2252_v36  ;;  %v1389_v34 = vadd.f32 %v1388_v32, %v1374_v28 }
 0x2a7   : > { %v1351_v6 = vadd.f32 %v1350_v5, %v1249_v21  ;;  %v1390_v39 = vadd.f32 %v1389_v34, %v1375_v31 }
 0x2a9   : > { %v1352_v37 = vadd.f32 %v1351_v6, %v1250_v63  ;;  %v1391_v44 = vadd.f32 %v1390_v39, %v1376_v33 }
 0x2ab   : > { %v1353_v40 = vadd.f32 %v1352_v37, %v1251_v59  ;;  %v1392_v15 = vadd.f32 %v1391_v44, %v1377_v38 }
 0x2ad   : > { %v1354_v45 = vadd.f32 %v1353_v40, %v1252_v60  ;;  %v1393_v47 = vadd.f32 %v1392_v15, %v1378_v41  ;;  %v1363_v60 = vld [vmem:[%s2330_s10] sm:$0x1] }
 0x2af   : > { %v1355_v35 = vrot.slane %v1354_v45, 4  ;;  %v1394_v13 = vadd.f32 %v1393_v47, %v1379_v46 }
 0x2b1   : > { %v1356_v49 = vadd.f32 %v1355_v35, %v1354_v45  ;;  %v1395_v53 = vrot.slane %v1394_v13, 4 }
 0x2b3   : > { %v1357_v52 = vrot.slane %v1356_v49, 2  ;;  %v1396_v54 = vadd.f32 %v1395_v53, %v1394_v13 }
 0x2b5   : > { %v1358_v36 = vadd.f32 %v1357_v52, %v1356_v49  ;;  %v1397_v56 = vrot.slane %v1396_v54, 2 }
 0x2b7   : > { %v1359_v55 = vrot.slane %v1358_v36, 1  ;;  %v1398_v59 = vadd.f32 %v1397_v56, %v1396_v54 }
 0x2b9   : > { %v1360_v58 = vadd.f32 %v1359_v55, %v1358_v36  ;;  %v1399_v62 = vrot.slane %v1398_v59, 1 }
 0x2bb   : > { %v1361_v61 = vadd.f32 %v1360_v58, %v1339_v57  ;;  %v1400_v21 = vadd.f32 %v1399_v62, %v1398_v59 }
 0x2bd   : > { %1362 = vst [vmem:[%s2329_s9] sm:$0x1] %v1361_v61  ;;  %v1401_v63 = vadd.f32 %v1400_v21, %v1363_v60 }
 0x2bf   : > { %1402 = vst [vmem:[%s2330_s10] sm:$0x1] %v1401_v63 }
 0x2c0 PF: > { %s23_s15 = sadd.s32 1, %s1926_s15  }
 0x2c1   : > { %p20_p5 = scmp.ge.s32.totalorder %s23_s15, 4  }
 0x2c3   :  { %22 = sbr.rel (!%p20_p5) target bundleno = 3 (0x3), region = 105 }

// kernel: node_model_forward.7
= control target key start
LH: loop header
LB: loop body
LE: loop exit
PB: predicated region body
PF: predicated region fallthrough
CT: control target
= control target key end

     0   :  { %15 = vsyncpa [#allocation4], 0  ;;  %s1332_s13 = smov 0   ;;  %s1545_s0 = inlined_call_operand.vmem [shape: bf16[256,128], index: 0, kind: input, shape index: {}]   ;;  %s1546_s1 = inlined_call_operand.vmem [shape: f32[1,128], index: 1, kind: input, shape index: {}]   ;;  %s1547_s2 = inlined_call_operand.vmem [shape: f32[1,128], index: 2, kind: input, shape index: {}]   ;;  %s1548_s3 = inlined_call_operand.vmem [shape: s32[1,256], index: 3, kind: input, shape index: {}]   ;;  %s1549_s4 = inlined_call_operand.vmem [shape: bf16[16,32], index: 4, kind: input, shape index: {}]   ;;  %s1550_s5 = inlined_call_operand.vmem [shape: bf16[32,128], index: 5, kind: input, shape index: {}]   ;;  %s1551_s6 = inlined_call_operand.vmem [shape: bf16[128,128], index: 6, kind: input, shape index: {}]   ;;  %s1552_s7 = inlined_call_operand.vmem [shape: f32[1,128], index: 7, kind: input, shape index: {}]   ;;  %s1553_s8 = inlined_call_operand.vmem [shape: bf16[128,128], index: 8, kind: input, shape index: {}]   ;;  %s1554_s9 = inlined_call_operand.vmem [shape: f32[1,128], index: 9, kind: input, shape index: {}]   ;;  %s1555_s10 = inlined_call_operand.hbm [shape: bf16[16,128], index: 10, kind: output, shape index: {}]  }
   0x1 LB: > { %s1338_s14 = sadd.s32 4294967295, %s1265_s13   ;;  %p995_p0 = scmp.ge.s32.totalorder %s1265_s13, 1  ;;  %s1265_s13 = sphi %s1332_s13, %s21_s13  }
   0x2   : > { %p317_p1 = scmp.lt.s32.totalorder %s1265_s13, 3 }
   0x4   : > { %p318_p2 = pnand %p995_p0, %p317_p1 }
   0x5   : > { %s996_s15 = sshll.u32 (!%p318_p2), %s1338_s14, 4  ;;  %p359_p3 = scmp.lt.s32.totalorder (!%p318_p2), %s1338_s14, 1 }
   0x6   : > { %321 = sbr.rel (%p318_p2) target bundleno = 967 (0x3c7), region = 60  ;;  %p354_p4 = scmp.lt.s32.totalorder (!%p318_p2), %s996_s15, 31 }
   0x7   : > { %p998_p5 = scmp.ne.s32.totalorder (!%p318_p2), %s1338_s14, 0 }
   0xb   : > { %s1345_s16 = scalar_select %p359_p3, %s1338_s14, 1 }
   0xc   : > { %s1557_s15 = smov (!%p354_p4, %s996_s15), 31  ;;  %366 = sbr.rel (%p998_p5) target bundleno = 19 (0x13), region = 64 }
   0xd   : > { %s361_s19 = scalar_lea.vmem %s1548_s3, %s1345_s16  ;;  %s997_s20 = sshll.u32 %s1557_s15, 2 }
   0xe   : > { %s1354_s23 = scalar_lea.vmem %s1545_s0, %s997_s20 }
  0x11   : > { %v1267_v0 = vmov 0.0  }
  0x12   : > { %367 = vst [vmem:[#allocation2] sm:$0xff] %v1267_v0  ;;  %368 = vst [vmem:[#allocation2 + $0x8] sm:$0xff] %v1267_v0 }
  0x13 PF: > { %v401_v1 = vld [vmem:[%s1546_s1] sm:$0x1]  ;;  %v1268_v3 = vmov 0.0   ;;  %vm1269_vm0 = vmmov 0   ;;  %v408_v8 = vlaneseq  ;;  %v1078_v12 = vld [vmem:[%s1354_s23 + $0x38] sm:$0xff]   ;;  %v1077_v13 = vld [vmem:[%s1354_s23 + $0x30] sm:$0xff]  }
  0x14   : > { %v402_v2 = vmul.f32 0.005, %v401_v1  ;;  %1109 = vmatprep.subr.bf16.mxu0 %v1268_v3  ;;  %v403_v4 = vld [vmem:[%s1547_s2] sm:$0x1]  ;;  %1125 = vmatprep.mubr.msk.bf16.mxu0 %vm1269_vm0, %v1268_v3  ;;  %v1076_v14 = vld [vmem:[%s1354_s23 + $0x28] sm:$0xff]   ;;  %v1065_v16 = vunpack.c.l.bf16 %v1078_v12  ;;  %v1066_v18 = vunpack.c.h.bf16 %v1078_v12  ;;  %v1061_v19 = vunpack.c.l.bf16 %v1077_v13  ;;  %v1074_v28 = vld [vmem:[%s1354_s23 + $0x18] sm:$0xff]  }
  0x15   : > { %v1365_v10 = vshrl.u32 %v408_v8, 7  ;;  %v454_v15 = vand.u32 127, %v408_v8  ;;  %v1062_v20 = vunpack.c.h.bf16 %v1077_v13  ;;  %v1057_v21 = vunpack.c.l.bf16 %v1076_v14  ;;  %v1075_v23 = vld [vmem:[%s1354_s23 + $0x20] sm:$0xff]   ;;  %v1073_v46 = vld [vmem:[%s1354_s23 + $0x10] sm:$0xff]   ;;  %v1072_v57 = vld [vmem:[%s1354_s23 + $0x8] sm:$0xff]   ;;  %p1004_p6 = scmp.ne.s32.totalorder %s1338_s14, 1 }
  0x16   : > { %v404_v5 = vmul.f32 %v402_v2, %v401_v1  ;;  %v1058_v22 = vunpack.c.h.bf16 %v1076_v14  ;;  %v1053_v32 = vunpack.c.l.bf16 %v1075_v23  ;;  %v1054_v33 = vunpack.c.h.bf16 %v1075_v23 }
  0x17   : > { %v410_v11 = vsub.s32 0, %v1365_v10  ;;  %vm455_vm1 = vcmp.eq.s32.totalorder %v454_v15, 32  ;;  %v1049_v36 = vunpack.c.l.bf16 %v1074_v28  ;;  %v1050_v37 = vunpack.c.h.bf16 %v1074_v28 }
  0x18   : > { %v405_v6 = vsub.f32 %v403_v4, %v404_v5  ;;  %v1384_v35 = vsel %vm455_vm1, 1.0, %v1268_v3  ;;  %v1045_v52 = vunpack.c.l.bf16 %v1073_v46  ;;  %v1046_v56 = vunpack.c.h.bf16 %v1073_v46  ;;  %v1036_v4 = vld [vmem:[%s1354_s23] sm:$0xff]  }
  0x19   : > { %v1371_v17 = vrot.slane %v402_v2, %v410_v11  ;;  %v1041_v62 = vunpack.c.l.bf16 %v1072_v57  ;;  %v1042_v2 = vunpack.c.h.bf16 %v1072_v57  ;;  %v1038_v14 = vunpack.c.h.bf16 %v1036_v4 }
  0x1a   : > { %v406_v7 = vmul.f32 0.0050251256, %v405_v6 }
  0x1b   : > { %v427_v24 = vsub.f32 %v1065_v16, %v1371_v17  ;;  %v428_v25 = vsub.f32 %v1066_v18, %v1371_v17  ;;  %v425_v26 = vsub.f32 %v1061_v19, %v1371_v17  ;;  %v426_v27 = vsub.f32 %v1062_v20, %v1371_v17 }
  0x1c   : > { %v429_v9 = vadd.f32 1e-05, %v406_v7  ;;  %v423_v30 = vsub.f32 %v1057_v21, %v1371_v17  ;;  %v424_v31 = vsub.f32 %v1058_v22, %v1371_v17  ;;  %v421_v44 = vsub.f32 %v1053_v32, %v1371_v17 }
  0x1d   : > { %v422_v45 = vsub.f32 %v1054_v33, %v1371_v17  ;;  %v419_v55 = vsub.f32 %v1049_v36, %v1371_v17  ;;  %v420_v61 = vsub.f32 %v1050_v37, %v1371_v17  ;;  %v417_v1 = vsub.f32 %v1045_v52, %v1371_v17  ;;  %v999_v37 = vld [vmem:[%s361_s19] ss:$0 sm:$0xff] }
  0x1e   : > { %1201 = vrsqrt.f32 %v429_v9  ;;  %v418_v8 = vsub.f32 %v1046_v56, %v1371_v17  ;;  %v1037_v9 = vunpack.c.l.bf16 %v1036_v4  ;;  %v415_v12 = vsub.f32 %v1041_v62, %v1371_v17 }
  0x1f   : > { %v416_v13 = vsub.f32 %v1042_v2, %v1371_v17  ;;  %v414_v22 = vsub.f32 %v1038_v14, %v1371_v17  ;;  %v483_v36 = vadd.s32 8, %v1365_v10  ;;  %vm489_vm2 = vcmp.eq.s32.totalorder %v1365_v10, %v999_v37 }
  0x20   : > { %v413_v21 = vsub.f32 %v1037_v9, %v1371_v17 }
  0x21   : > { %vm490_vm3 = vcmp.eq.s32.totalorder %v483_v36, %v999_v37 }
  0x22   : > { %vm1002_vm4 = vmpackc.low %vm490_vm3, %vm489_vm2 }
  0x2b   : > { %v1202_v29 = vpop.eup %1201 }
  0x2c   : > { %v1381_v34 = vrot.slane %v1202_v29, %v410_v11 }
  0x2e   : > { %v451_v38 = vmul.f32 %v1381_v34, %v427_v24  ;;  %v452_v39 = vmul.f32 %v1381_v34, %v428_v25  ;;  %v449_v40 = vmul.f32 %v1381_v34, %v425_v26  ;;  %v450_v41 = vmul.f32 %v1381_v34, %v426_v27 }
  0x2f   : > { %v447_v42 = vmul.f32 %v1381_v34, %v423_v30  ;;  %v448_v43 = vmul.f32 %v1381_v34, %v424_v31  ;;  %v445_v53 = vmul.f32 %v1381_v34, %v421_v44  ;;  %v446_v54 = vmul.f32 %v1381_v34, %v422_v45 }
  0x30   : > { %v471_v47 = vadd.f32 %v1384_v35, %v451_v38  ;;  %v472_v48 = vadd.f32 %v1384_v35, %v452_v39  ;;  %v469_v49 = vadd.f32 %v1384_v35, %v449_v40  ;;  %v470_v50 = vadd.f32 %v1384_v35, %v450_v41 }
  0x31   : > { %v467_v59 = vadd.f32 %v1384_v35, %v447_v42  ;;  %v468_v60 = vadd.f32 %v1384_v35, %v448_v43  ;;  %v465_v63 = vadd.f32 %v1384_v35, %v445_v53  ;;  %v466_v0 = vadd.f32 %v1384_v35, %v446_v54  ;;  %v497_v42 = vld [vmem:[#allocation2 + $0x8] sm:$0xff] }
  0x32   : > { %v480_v51 = vpack.c.bf16 %v472_v48, %v471_v47  ;;  %v479_v58 = vpack.c.bf16 %v470_v50, %v469_v49  ;;  %v443_v6 = vmul.f32 %v1381_v34, %v419_v55  ;;  %v444_v7 = vmul.f32 %v1381_v34, %v420_v61 }
  0x33   : > { %v478_v5 = vpack.c.bf16 %v468_v60, %v467_v59  ;;  %v477_v11 = vpack.c.bf16 %v466_v0, %v465_v63  ;;  %v441_v18 = vmul.f32 %v1381_v34, %v417_v1  ;;  %v442_v19 = vmul.f32 %v1381_v34, %v418_v8 }
  0x34   : > { %1110 = vmatpush3.bf16.msra.mxu0 %v480_v51  ;;  %v463_v15 = vadd.f32 %v1384_v35, %v443_v6  ;;  %v464_v16 = vadd.f32 %v1384_v35, %v444_v7  ;;  %v439_v20 = vmul.f32 %v1381_v34, %v415_v12  ;;  %v440_v26 = vmul.f32 %v1381_v34, %v416_v13 }
  0x35   : > { %1111 = vmatprep.subr.bf16.mxu0 %v1268_v3  ;;  %v461_v24 = vadd.f32 %v1384_v35, %v441_v18  ;;  %v462_v25 = vadd.f32 %v1384_v35, %v442_v19  ;;  %v437_v27 = vmul.f32 %v1381_v34, %v413_v21  ;;  %v438_v17 = vmul.f32 %v1381_v34, %v414_v22 }
  0x36   : > { %v476_v23 = vpack.c.bf16 %v464_v16, %v463_v15  ;;  %v459_v29 = vadd.f32 %v1384_v35, %v439_v20  ;;  %v460_v30 = vadd.f32 %v1384_v35, %v440_v26  ;;  %v1270_v34 = vmov 1.0|1.0  }
  0x37   : > { %v475_v28 = vpack.c.bf16 %v462_v25, %v461_v24  ;;  %v457_v32 = vadd.f32 %v1384_v35, %v437_v27  ;;  %v458_v33 = vadd.f32 %v1384_v35, %v438_v17  ;;  %v496_v35 = vld [vmem:[#allocation2] sm:$0xff] }
  0x38   : > { %1112 = vmatpush3.bf16.msra.mxu0 %v479_v58  ;;  %v474_v31 = vpack.c.bf16 %v460_v30, %v459_v29 }
  0x39   : > { %1113 = vmatprep.subr.bf16.mxu0 %v1268_v3  ;;  %v473_v38 = vpack.c.bf16 %v458_v33, %v457_v32 }
  0x3c   : > { %1114 = vmatpush3.bf16.msra.mxu0 %v478_v5 }
  0x3d   : > { %1115 = vmatprep.subr.bf16.mxu0 %v1268_v3 }
  0x40   : > { %1116 = vmatpush3.bf16.msra.mxu0 %v477_v11 }
  0x41   : > { %1117 = vmatprep.subr.bf16.mxu0 %v1268_v3 }
  0x44   : > { %1118 = vmatpush3.bf16.msra.mxu0 %v476_v23 }
  0x45   : > { %1119 = vmatprep.subr.bf16.mxu0 %v1268_v3 }
  0x48   : > { %1120 = vmatpush3.bf16.msra.mxu0 %v475_v28 }
  0x49   : > { %1121 = vmatprep.subr.bf16.mxu0 %v1268_v3 }
  0x4c   : > { %1122 = vmatpush3.bf16.msra.mxu0 %v474_v31 }
  0x4d   : > { %1123 = vmatprep.subr.bf16.mxu0 %v1268_v3 }
  0x50   : > { %1124 = vmatpush3.bf16.msra.mxu0 %v473_v38 }
  0x53   : > { %1126 = vmatmul.mubr.msk.bf16.vlgmr.msra.gmra.mxu0 %vm1002_vm4, %v1270_v34 }
 0x113   : > { %v532_v39 = vpop.f32.mrf.mxu0 }
 0x114   : > { %v539_v40 = vadd.f32 %v532_v39, %v496_v35 }
 0x115   : > { %v1127_v41 = vpop.f32.mrf.mxu0 }
 0x116   : > { %541 = vst [vmem:[#allocation2] sm:$0xff] %v539_v40  ;;  %546 = sbr.rel (%p1004_p6) target bundleno = 951 (0x3b7), region = 68 }
 0x117   : > { %v535_v43 = vpop.f32.mrf.mxu0 }
 0x118   : > { %v540_v44 = vadd.f32 %v535_v43, %v497_v42 }
 0x119   : > { %v1128_v45 = vpop.f32.mrf.mxu0 }
 0x11a   : > { %542 = vst [vmem:[#allocation2 + $0x8] sm:$0xff] %v540_v44 }
 0x11b   : > { %v1271_v46 = vmov 32   ;;  %v1272_v49 = vmov 0.0   ;;  %v1204_v50 = vld [vmem:[%s1551_s6 + $0x38] sm:$0xff]   ;;  %v1205_v51 = vld [vmem:[%s1551_s6 + $0x30] sm:$0xff]   ;;  %v1209_v52 = vld [vmem:[%s1550_s5 + $0x8] sm:$0xff]   ;;  %vm696_vm5 = vcmask 261120  }
 0x11c   : > { %1203 = vset.pattern.permute.xlu0 %v1271_v46  ;;  %1129 = vmatprep.subr.bf16.mxu0 %v1272_v49  ;;  %v1206_v53 = vld [vmem:[%s1551_s6 + $0x28] sm:$0xff]   ;;  %v1211_v54 = vld [vmem:[%s1550_s5] sm:$0xff]   ;;  %v1208_v56 = vld [vmem:[%s1551_s6 + $0x18] sm:$0xff]   ;;  %vm1273_vm6 = vmmov 0  }
 0x11d   : > { %v547_v3 = vld [vmem:[#allocation2] sm:$0xff]  ;;  %1149 = vmatprep.subr.bf16.mxu1 %v1272_v49  ;;  %1130 = vmatpush3.bf16.msra.mxu0 %v1204_v50  ;;  %v1210_v60 = vld [vmem:[%s1551_s6 + $0x10] sm:$0xff]   ;;  %v1212_v61 = vld [vmem:[%s1551_s6 + $0x8] sm:$0xff]  }
 0x11e   : > { %v549_v47 = vmax.f32 %v547_v3, 1.0  ;;  %1131 = vmatprep.subr.bf16.mxu0 %v1272_v49  ;;  %1150 = vmatpush3.bf16.msra.mxu1 %v1209_v52  ;;  %v1207_v55 = vld [vmem:[%s1551_s6 + $0x20] sm:$0xff]   ;;  %v1215_v9 = vld [vmem:[%s1553_s8 + $0x38] sm:$0xff]   ;;  %v1216_v11 = vld [vmem:[%s1553_s8 + $0x30] sm:$0xff]  }
 0x11f   : > { %1151 = vmatprep.subr.bf16.mxu1 %v1272_v49  ;;  %v1213_v57 = vld [vmem:[%s1549_s4] sm:$0xff]   ;;  %1153 = vmatprep.mubr.msk.bf16.mxu1 %vm1273_vm6, %v1272_v49  ;;  %v1217_v12 = vld [vmem:[%s1553_s8 + $0x28] sm:$0xff]   ;;  %v1219_v14 = vld [vmem:[%s1553_s8 + $0x18] sm:$0xff]  }
 0x120   : > { %1223 = vrcp.f32 %v549_v47  ;;  %1145 = vmatprep.mubr.msk.bf16.mxu0 %vm1273_vm6, %v1272_v49  ;;  %v1214_v62 = vld [vmem:[%s1551_s6] sm:$0xff]   ;;  %v1220_v15 = vld [vmem:[%s1553_s8 + $0x10] sm:$0xff]   ;;  %v1221_v16 = vld [vmem:[%s1553_s8 + $0x8] sm:$0xff]  }
 0x121   : > { %v548_v10 = vld [vmem:[#allocation2 + $0x8] sm:$0xff]  ;;  %1132 = vmatpush3.bf16.msra.mxu0 %v1205_v51  ;;  %v1218_v13 = vld [vmem:[%s1553_s8 + $0x20] sm:$0xff]  }
 0x122   : > { %v550_v48 = vmax.f32 %v548_v10, 1.0  ;;  %1133 = vmatprep.subr.bf16.mxu0 %v1272_v49  ;;  %1152 = vmatpush3.bf16.msra.mxu1 %v1211_v54  ;;  %v1222_v18 = vld [vmem:[%s1553_s8] sm:$0xff]  }
 0x123   : > { %1157 = vmatprep.subr.bf16.mxu1 %v1272_v49  ;;  %v1017_v21 = vld [vmem:[%s1552_s7] ss:$0 sm:$0xff] }
 0x124   : > { %1225 = vrcp.f32 %v550_v48  ;;  %v1018_v52 = vld [vmem:[%s1554_s9] ss:$0 sm:$0xff] }
 0x125   : > { %1134 = vmatpush3.bf16.msra.mxu0 %v1206_v53  ;;  %1154 = vmatmul.mubr.msk.bf16.vlgmr.msra.gmra.mxu1 %vm696_vm5, %v1213_v57 }
 0x126   : > { %1135 = vmatprep.subr.bf16.mxu0 %v1272_v49  ;;  %1173 = vmatprep.mubr.msk.bf16.mxu1 %vm1273_vm6, %v1272_v49 }
 0x127   : > { %1158 = vmatpush3.bf16.msra.mxu1 %v1215_v9 }
 0x128   : > { %1159 = vmatprep.subr.bf16.mxu1 %v1272_v49 }
 0x129   : > { %1136 = vmatpush3.bf16.msra.mxu0 %v1207_v55 }
 0x12a   : > { %1137 = vmatprep.subr.bf16.mxu0 %v1272_v49 }
 0x12b   : > { %1160 = vmatpush3.bf16.msra.mxu1 %v1216_v11 }
 0x12c   : > { %1161 = vmatprep.subr.bf16.mxu1 %v1272_v49 }
 0x12d   : > { %v1224_v58 = vpop.eup %1223  ;;  %1138 = vmatpush3.bf16.msra.mxu0 %v1208_v56 }
 0x12e   : > { %557 = vperm.xlu0 %1203, %v1224_v58   ;;  %1139 = vmatprep.subr.bf16.mxu0 %v1272_v49 }
 0x12f   : > { %1162 = vmatpush3.bf16.msra.mxu1 %v1217_v12 }
 0x130   : > { %1163 = vmatprep.subr.bf16.mxu1 %v1272_v49 }
 0x131   : > { %v1226_v59 = vpop.eup %1225  ;;  %1140 = vmatpush3.bf16.msra.mxu0 %v1210_v60 }
 0x132   : > { %562 = vperm.xlu0 %1203, %v1226_v59   ;;  %1141 = vmatprep.subr.bf16.mxu0 %v1272_v49 }
 0x133   : > { %1164 = vmatpush3.bf16.msra.mxu1 %v1218_v13 }
 0x134   : > { %1165 = vmatprep.subr.bf16.mxu1 %v1272_v49 }
 0x135   : > { %1142 = vmatpush3.bf16.msra.mxu0 %v1212_v61 }
 0x136   : > { %1143 = vmatprep.subr.bf16.mxu0 %v1272_v49 }
 0x137   : > { %1166 = vmatpush3.bf16.msra.mxu1 %v1219_v14 }
 0x138   : > { %1167 = vmatprep.subr.bf16.mxu1 %v1272_v49 }
 0x139   : > { %1144 = vmatpush3.bf16.msra.mxu0 %v1214_v62 }
 0x13b   : > { %1168 = vmatpush3.bf16.msra.mxu1 %v1220_v15 }
 0x13c   : > { %1169 = vmatprep.subr.bf16.mxu1 %v1272_v49 }
 0x13f   : > { %1170 = vmatpush3.bf16.msra.mxu1 %v1221_v16 }
 0x140   : > { %1171 = vmatprep.subr.bf16.mxu1 %v1272_v49 }
 0x143   : > { %1172 = vmatpush3.bf16.msra.mxu1 %v1222_v18 }
 0x1a9   : > { %v558_v63 = vpop.permute.xlu0 %557 }
 0x1aa   : > { %v565_v1 = vmul.f32 %v558_v63, %v547_v3 }
 0x1ad   : > { %v563_v0 = vpop.permute.xlu0 %562 }
 0x1ae   : > { %v566_v2 = vmul.f32 %v563_v0, %v548_v10 }
 0x1b0   : > { %v573_v4 = vpack.c.bf16 %v566_v2, %v565_v1 }
 0x1b2   : > { %1146 = vmatmul.mubr.bf16.vlgmr.msra.gmra.mxu0 %v573_v4 }
 0x1e5   : > { %v734_v5 = vpop.f32.mrf.mxu1 }
 0x1e7   : > { %v1155_v6 = vpop.f32.mrf.mxu1 }
 0x1e9   : > { %v737_v7 = vpop.f32.mrf.mxu1 }
 0x1eb   : > { %v1156_v8 = vpop.f32.mrf.mxu1 }
 0x272   : > { %v672_v19 = vpop.f32.mrf.mxu0 }
 0x273   : > { %v735_v20 = vadd.f32 %v734_v5, %v672_v19 }
 0x274   : > { %v1147_v22 = vpop.f32.mrf.mxu0 }
 0x275   : > { %v748_v24 = vadd.f32 %v1017_v21, %v735_v20 }
 0x276   : > { %v675_v23 = vpop.f32.mrf.mxu0 }
 0x277   : > { %v738_v25 = vadd.f32 %v737_v7, %v675_v23  ;;  %v750_v28 = vmax.f32 %v748_v24, 0.0 }
 0x278   : > { %v1148_v26 = vpop.f32.mrf.mxu0 }
 0x279   : > { %v749_v27 = vadd.f32 %v1017_v21, %v738_v25 }
 0x27b   : > { %v751_v29 = vmax.f32 %v749_v27, 0.0 }
 0x27d   : > { %v756_v30 = vadd.f32 %v751_v29, %v750_v28 }
 0x27f   : > { %v757_v17 = vrot.slane %v756_v30, 4 }
 0x281   : > { %v758_v31 = vadd.f32 %v757_v17, %v756_v30 }
 0x283   : > { %v759_v32 = vrot.slane %v758_v31, 2 }
 0x285   : > { %v760_v33 = vadd.f32 %v759_v32, %v758_v31 }
 0x287   : > { %v761_v36 = vrot.slane %v760_v33, 1 }
 0x289   : > { %v762_v37 = vadd.f32 %v761_v36, %v760_v33 }
 0x28b   : > { %v763_v38 = vmul.f32 0.0625, %v762_v37 }
 0x28d   : > { %v764_v34 = vsub.f32 %v750_v28, %v763_v38  ;;  %v765_v35 = vsub.f32 %v751_v29, %v763_v38 }
 0x28f   : > { %v766_v39 = vmul.f32 %v764_v34, %v764_v34  ;;  %v767_v40 = vmul.f32 %v765_v35, %v765_v35 }
 0x291   : > { %v770_v41 = vadd.f32 %v767_v40, %v766_v39 }
 0x293   : > { %v771_v42 = vrot.slane %v770_v41, 4 }
 0x295   : > { %v772_v43 = vadd.f32 %v771_v42, %v770_v41 }
 0x297   : > { %v773_v44 = vrot.slane %v772_v43, 2 }
 0x299   : > { %v774_v45 = vadd.f32 %v773_v44, %v772_v43 }
 0x29b   : > { %v775_v3 = vrot.slane %v774_v45, 1 }
 0x29d   : > { %v776_v10 = vadd.f32 %v775_v3, %v774_v45 }
 0x29f   : > { %v777_v46 = vmul.f32 0.06666667, %v776_v10 }
 0x2a1   : > { %v778_v47 = vadd.f32 1e-05, %v777_v46 }
 0x2a3   : > { %1227 = vrsqrt.f32 %v778_v47 }
 0x2b0   : > { %v1228_v48 = vpop.eup %1227 }
 0x2b1   : > { %v781_v49 = vmul.f32 %v1228_v48, %v765_v35  ;;  %v780_v50 = vmul.f32 %v1228_v48, %v764_v34 }
 0x2b3   : > { %v782_v51 = vpack.c.bf16 %v781_v49, %v780_v50 }
 0x2b5   : > { %1174 = vmatmul.mubr.bf16.vlgmr.msra.gmra.mxu1 %v782_v51 }
 0x375   : > { %v888_v53 = vpop.f32.mrf.mxu1 }
 0x376   : > { %v889_v55 = vadd.f32 %v1018_v52, %v888_v53 }
 0x377   : > { %v1175_v54 = vpop.f32.mrf.mxu1 }
 0x378   : > { %v895_v59 = vmax.f32 %v889_v55, 0.0 }
 0x379   : > { %v891_v56 = vpop.f32.mrf.mxu1 }
 0x37a   : > { %v892_v57 = vadd.f32 %v1018_v52, %v891_v56 }
 0x37b   : > { %v1176_v58 = vpop.f32.mrf.mxu1 }
 0x37c   : > { %v896_v60 = vmax.f32 %v892_v57, 0.0 }
 0x37e   : > { %v899_v61 = vadd.f32 %v896_v60, %v895_v59 }
 0x380   : > { %v900_v62 = vrot.slane %v899_v61, 4 }
 0x382   : > { %v901_v63 = vadd.f32 %v900_v62, %v899_v61 }
 0x384   : > { %v902_v0 = vrot.slane %v901_v63, 2 }
 0x386   : > { %v903_v1 = vadd.f32 %v902_v0, %v901_v63 }
 0x388   : > { %v904_v2 = vrot.slane %v903_v1, 1 }
 0x38a   : > { %v905_v4 = vadd.f32 %v904_v2, %v903_v1 }
 0x38c   : > { %v906_v5 = vmul.f32 0.0625, %v905_v4 }
 0x38e   : > { %v907_v6 = vsub.f32 %v895_v59, %v906_v5  ;;  %v908_v7 = vsub.f32 %v896_v60, %v906_v5 }
 0x390   : > { %v909_v8 = vmul.f32 %v907_v6, %v907_v6  ;;  %v910_v9 = vmul.f32 %v908_v7, %v908_v7 }
 0x392   : > { %v913_v11 = vadd.f32 %v910_v9, %v909_v8 }
 0x394   : > { %v914_v12 = vrot.slane %v913_v11, 4 }
 0x396   : > { %v915_v13 = vadd.f32 %v914_v12, %v913_v11 }
 0x398   : > { %v916_v14 = vrot.slane %v915_v13, 2 }
 0x39a   : > { %v917_v15 = vadd.f32 %v916_v14, %v915_v13 }
 0x39c   : > { %v918_v16 = vrot.slane %v917_v15, 1 }
 0x39e   : > { %v919_v18 = vadd.f32 %v918_v16, %v917_v15 }
 0x3a0   : > { %v920_v19 = vmul.f32 0.06666667, %v919_v18 }
 0x3a2   : > { %v921_v20 = vadd.f32 1e-05, %v920_v19 }
 0x3a4   : > { %1229 = vrsqrt.f32 %v921_v20 }
 0x3b1   : > { %v1230_v21 = vpop.eup %1229 }
 0x3b2   : > { %v923_v22 = vmul.f32 %v1230_v21, %v907_v6  ;;  %v924_v23 = vmul.f32 %v1230_v21, %v908_v7 }
 0x3b4   : > { %v1070_v24 = vpack.c.bf16 %v924_v23, %v923_v22 }
 0x3b6   : > { %1071 = vst [vmem:[#allocation3] sm:$0xff] %v1070_v24  }
 0x3b7 PF: > { %p1181_p7 = scmp.eq.s32.totalorder %s1338_s14, 1  ;;  %s1274_s18 = smov [#allocation3]  }
 0x3b8   : > { %s941_s19 = sshll.u32 %s1274_s18, 4  ;;  %s942_s19 = int_to_ptr.vmem [resolvable:$true] %s941_s19 }
 0x3b9   : > { %s1231_s20 = scalar_lea.vmem %s942_s19, 128  ;;  %p1238_p11 = scmp.lt.s32.totalorder %s942_s19, %s942_s19 }
 0x3ba   : > { %p1232_p8 = scmp.ne.s32.totalorder %s942_s19, %s1231_s20  ;;  %p1239_p12 = scmp.lt.s32.totalorder %s1231_s20, %s1231_s20 }
 0x3bc   : > { %p1233_p9 = pnand %p1232_p8, %p1181_p7  ;;  %p1240_p13 = por %p1239_p12, %p1238_p11 }
 0x3be   : > { %p1234_p10 = pneg %p1233_p9 }
 0x3c0   : > { %p1241_p0 = pnand %p1240_p13, %p1234_p10 }
 0x3c2   : > { %1244 = shalt.err (!%p1241_p0)
}
 0x3c3   : > { %s1275_s21 = smov 64   ;;  %s1276_s22 = smov 4  }
 0x3c4   : > { %1178 = dma.vmem_to_hbm [thread:$0]  (%p1181_p7), %s942_s19, 128, %s1555_s10, [#allocation4], %s1275_s21, %s1275_s21, %s1276_s22  }
 0x3c5   : > { %1260 = dma.done.wait (%p1181_p7), [#allocation4], 128  }
 0x3c6   : > { %1262 = vsyncadd (%p1181_p7), [#allocation4], 4294967168 }
 0x3c7 PF: > { %s21_s13 = sadd.s32 1, %s1265_s13  }
 0x3c8   : > { %p18_p1 = scmp.ge.s32.totalorder %s21_s13, 4  }
 0x3ca   :  { %20 = sbr.rel (!%p18_p1) target bundleno = 1 (0x1), region = 98 }
 0x3cf   :  { %957 = vsyncpa [#allocation4], 1 }
 0x3d0   :  { %959 = vsyncpa [#allocation4 + $0x1], 1 }

</bundles_post_ra>
